<compile_context>
chip_gen: v7x
topology: tpu7x:2x2x1
jax: 0.10.0
libtpu: 0.0.40
codegen_flags: <defaults>
</compile_context>

<pallas_src>
import functools

import jax
import jax.numpy as jnp
from jax import lax
from jax.experimental import pallas as pl
from jax.experimental.pallas import tpu as pltpu


# ----------------------------------------------------------------------------
# Fused kernel: cv1 (1x1 conv+BN+SiLU) -> SPP(F) pooling -> concat/cv2 fused
# ----------------------------------------------------------------------------
def _spp_fused_kernel(x_ref, w1_ref, b1_ref, w2_ref, b2_ref, o_ref, pad_ref,
                      *, steps, r, cl, w_valid):
    # x_ref:   (1, H, Wk, C1)   NHWC input block, W padded so Wk % 8 == 0
    # w1_ref:  (C1, C_)         cv1 weight, BN scale folded, compute dtype
    # b1_ref:  (1, C_)          cv1 folded BN bias (f32)
    # w2_ref:  (nb*C_, Cout)    cv2 weight, BN scale folded, compute dtype
    # b2_ref:  (1, Cout)        cv2 folded BN bias (f32)
    # o_ref:   (1, H*Wk, Cout)  lane-dense output slab
    # pad_ref: VMEM scratch (H + 2r, cl + Wk + cr, C_) in compute dtype
    # steps:   tuple of (k, from_prev); from_prev=True => SPPF cascade stage
    _, H, Wk, C1 = x_ref.shape
    C = w1_ref.shape[1]
    Wp = pad_ref.shape[1]
    cdt = pad_ref.dtype
    neg_inf = jnp.array(-jnp.inf, dtype=cdt)

    # ---- -inf border only (interior is rewritten by every stage). ----
    # Kept per grid step on purpose: scratch is per-core under megacore.
    pad_ref[0:r, :, :] = jnp.full((r, Wp, C), neg_inf, cdt)
    pad_ref[r + H:r + H + r, :, :] = jnp.full((r, Wp, C), neg_inf, cdt)
    pad_ref[r:r + H, 0:cl, :] = jnp.full((H, cl, C), neg_inf, cdt)
    cr = Wp - cl - Wk
    pad_ref[r:r + H, cl + Wk:Wp, :] = jnp.full((H, cr, C), neg_inf, cdt)

    # ---- cv1: 1x1 conv (BN folded into weight/bias) + SiLU (f32 accum) ----
    x_flat = x_ref[0].reshape(H * Wk, C1)               # free: Wk % 8 == 0
    y1 = jnp.dot(x_flat, w1_ref[...], preferred_element_type=jnp.float32)
    y1 = y1 + b1_ref[...]
    y1 = y1 * jax.nn.sigmoid(y1)                        # SiLU in f32
    x0_flat = y1.astype(cdt)                            # (H*Wk, C)
    x0 = x0_flat.reshape(H, Wk, C)                      # free reshape

    # Branch 0 (identity) contracted immediately against its cv2 slice — the
    # nb*C_-wide concat never exists anywhere.
    acc = jnp.dot(x0_flat, w2_ref[0:C, :], preferred_element_type=jnp.float32)

    # Stage input lives in the scratch interior.  Columns [w_valid, Wk) are
    # conv-of-zero-padding junk: overwrite them with -inf so the max pools see
    # them as outside the image.  (Later stages may overwrite them with pooled
    # values: those are maxima of in-image boundary pixels and cannot leak a
    # wrong value back into valid columns.)
    pad_ref[r:r + H, cl:cl + Wk, :] = x0
    if w_valid < Wk:
        pad_ref[r:r + H, cl + w_valid:cl + Wk, :] = jnp.full(
            (H, Wk - w_valid, C), neg_inf, cdt)

    pooled = x0
    for b, (k, from_prev) in enumerate(steps, start=1):
        rk = k // 2
        if b > 1 and from_prev:
            # SPPF cascade: next stage pools the previous stage's output.
            pad_ref[r:r + H, cl:cl + Wk, :] = pooled
        roff, coff = r - rk, cl - rk
        # Column pass first: read the scratch ref at sublane offsets (plain
        # vlds) instead of value-slicing along the sublane axis (XLU).
        colmax = pad_ref[roff:roff + H + 2 * rk, coff:coff + Wk, :]
        for dx in range(1, k):
            colmax = jnp.maximum(
                colmax,
                pad_ref[roff:roff + H + 2 * rk, coff + dx:coff + dx + Wk, :])
        # Row pass second: leading-dim slices of a value are free vreg selects.
        pooled = colmax[0:H]
        for dy in range(1, k):
            pooled = jnp.maximum(pooled, colmax[dy:dy + H])
        # Fused cv2: accumulate this branch's contribution (f32 accumulator).
        acc = acc + jnp.dot(pooled.reshape(H * Wk, C),   # free reshape
                            w2_ref[b * C:(b + 1) * C, :],
                            preferred_element_type=jnp.float32)

    y = acc + b2_ref[...]                                # folded BN bias
    y = y * jax.nn.sigmoid(y)                            # SiLU
    o_ref[0] = y.astype(o_ref.dtype)


# ----------------------------------------------------------------------------
# Wrapper / glue
# ----------------------------------------------------------------------------
def _fold_bn(w, gamma, beta, mean, var, eps, cdt):
    inv = gamma / jnp.sqrt(var + eps)
    w_f = (w * inv[None, :]).astype(cdt)                  # MXU operand dtype
    b_f = (beta - mean * inv).reshape(1, -1).astype(jnp.float32)  # f32 accum
    return w_f, b_f


def _round_up(v, m):
    return ((v + m - 1) // m) * m


def spp_forward(x_nchw, p, ks=(5, 9, 13), eps=1e-3, compute_dtype=None):
    """SPP forward. x_nchw: (N, C1, H, W). Returns (N, C2, H, W)."""
    N, C1, H, W = x_nchw.shape
    cdt = jnp.dtype(compute_dtype) if compute_dtype is not None else x_nchw.dtype
    out_dtype = x_nchw.dtype
    ks = tuple(int(k) for k in ks)

    if ks == (5, 9, 13):
        # SPPF equivalence (stride-1 same padding): 9 = 5∘5, 13 = 5∘5∘5.
        steps = ((5, True), (5, True), (5, True))
        r = 2
    else:
        assert all(k % 2 == 1 for k in ks), "odd kernel sizes expected"
        steps = tuple((k, False) for k in ks)
        r = max(ks) // 2

    C_ = p["w1"].shape[1]
    Cout = p["w2"].shape[1]
    assert p["w1"].shape[0] == C1
    assert p["w2"].shape[0] == (len(ks) + 1) * C_

    w1_f, b1_f = _fold_bn(p["w1"], p["g1"], p["b1"], p["m1"], p["v1"], eps, cdt)
    w2_f, b2_f = _fold_bn(p["w2"], p["g2"], p["b2"], p["m2"], p["v2"], eps, cdt)

    # Lane/sublane-friendly geometry: W padded to a multiple of 8 so in-kernel
    # reshapes are layout-free; scratch column borders are 8-aligned.
    Wk = _round_up(W, 8)
    cl = _round_up(r, 8)
    Wp = cl + Wk + cl
    Hp = H + 2 * r

    x = jnp.transpose(x_nchw, (0, 2, 3, 1)).astype(cdt)   # NCHW -> NHWC
    if Wk != W:
        x = jnp.pad(x, ((0, 0), (0, 0), (0, Wk - W), (0, 0)))

    kernel = functools.partial(_spp_fused_kernel, steps=steps, r=r, cl=cl,
                               w_valid=W)
    out = pl.pallas_call(
        kernel,
        out_shape=jax.ShapeDtypeStruct((N, H * Wk, Cout), out_dtype),
        grid_spec=pltpu.PrefetchScalarGridSpec(
            num_scalar_prefetch=0,
            grid=(N,),
            in_specs=[
                pl.BlockSpec((1, H, Wk, C1), lambda n: (n, 0, 0, 0)),
                pl.BlockSpec((C1, C_), lambda n: (0, 0)),
                pl.BlockSpec((1, C_), lambda n: (0, 0)),
                pl.BlockSpec(w2_f.shape, lambda n: (0, 0)),
                pl.BlockSpec((1, Cout), lambda n: (0, 0)),
            ],
            out_specs=pl.BlockSpec((1, H * Wk, Cout), lambda n: (n, 0, 0)),
            scratch_shapes=[pltpu.VMEM((Hp, Wp, C_), cdt)],
        ),
        compiler_params=pltpu.CompilerParams(
            dimension_semantics=("parallel",),
            vmem_limit_bytes=32 * 1024 * 1024,
        ),
    )(x, w1_f, b1_f, w2_f, b2_f)

    out = out.reshape(N, H, Wk, Cout)[:, :, :W, :]        # drop lane-pad cols
    return jnp.transpose(out, (0, 3, 1, 2))               # NHWC -> NCHW


# ----------------------------------------------------------------------------
# Pure-JAX reference (for correctness check)
# ----------------------------------------------------------------------------
def _ref_conv_bn_silu(x_nhwc, w, g, b, m, v, eps=1e-3):
    y = jnp.einsum("nhwc,cd->nhwd", x_nhwc, w)
    y = (y - m) / jnp.sqrt(v + eps) * g + b
    return y * jax.nn.sigmoid(y)


def _ref_maxpool_same(x_nhwc, k):
    r = k // 2
    return lax.reduce_window(
        x_nhwc, -jnp.inf, lax.max,
        window_dimensions=(1, k, k, 1), window_strides=(1, 1, 1, 1),
        padding=((0, 0), (r, r), (r, r), (0, 0)))


def spp_reference(x_nchw, p, ks=(5, 9, 13)):
    x = jnp.transpose(x_nchw, (0, 2, 3, 1))
    y = _ref_conv_bn_silu(x, p["w1"], p["g1"], p["b1"], p["m1"], p["v1"])
    cat = jnp.concatenate([y] + [_ref_maxpool_same(y, k) for k in ks], axis=-1)
    y = _ref_conv_bn_silu(cat, p["w2"], p["g2"], p["b2"], p["m2"], p["v2"])
    return jnp.transpose(y, (0, 3, 1, 2))


# ----------------------------------------------------------------------------
# Main
# ----------------------------------------------------------------------------
if __name__ == "__main__":
    N, C1, H, W = 2, 8, 16, 16
    C2 = 8
    KS = (5, 9, 13)
    C_ = C1 // 2
    CCAT = C_ * (len(KS) + 1)

    key = jax.random.PRNGKey(0)
    keys = jax.random.split(key, 12)

    x = jax.random.normal(keys[0], (N, C1, H, W), dtype=jnp.float32)

    params = {
        # cv1: Conv2d(c1, c_, 1, 1, bias=False) -> matmul weight (C1, C_)
        "w1": 0.3 * jax.random.normal(keys[1], (C1, C_), dtype=jnp.float32),
        "g1": 1.0 + 0.1 * jax.random.normal(keys[2], (C_,), dtype=jnp.float32),
        "b1": 0.1 * jax.random.normal(keys[3], (C_,), dtype=jnp.float32),
        "m1": 0.1 * jax.random.normal(keys[4], (C_,), dtype=jnp.float32),
        "v1": 1.0 + 0.1 * jnp.abs(jax.random.normal(keys[5], (C_,), dtype=jnp.float32)),
        # cv2: Conv2d(c_*4, c2, 1, 1, bias=False) -> matmul weight (CCAT, C2)
        "w2": 0.3 * jax.random.normal(keys[6], (CCAT, C2), dtype=jnp.float32),
        "g2": 1.0 + 0.1 * jax.random.normal(keys[7], (C2,), dtype=jnp.float32),
        "b2": 0.1 * jax.random.normal(keys[8], (C2,), dtype=jnp.float32),
        "m2": 0.1 * jax.random.normal(keys[9], (C2,), dtype=jnp.float32),
        "v2": 1.0 + 0.1 * jnp.abs(jax.random.normal(keys[10], (C2,), dtype=jnp.float32)),
    }

    # 1) SPPF fast path (k = 5, 9, 13), f32 compute.
    out = jax.block_until_ready(spp_forward(x, params, KS))
    assert out.shape == (N, C2, H, W), out.shape
    ref = jax.block_until_ready(spp_reference(x, params, KS))
    assert jnp.allclose(out, ref, atol=2e-3, rtol=2e-3), float(jnp.max(jnp.abs(out - ref)))

    # 2) Generic (non-SPPF) fallback path, e.g. k = 3, 5, 7.
    KS2 = (3, 5, 7)
    out2 = jax.block_until_ready(spp_forward(x, params, KS2))
    ref2 = jax.block_until_ready(spp_reference(x, params, KS2))
    assert jnp.allclose(out2, ref2, atol=2e-3, rtol=2e-3), float(jnp.max(jnp.abs(out2 - ref2)))

    # 3) Non-8-aligned spatial width (W = 13) exercising the lane-padding path.
    x3 = jax.random.normal(keys[11], (N, C1, 13, 13), dtype=jnp.float32)
    out3 = jax.block_until_ready(spp_forward(x3, params, KS))
    ref3 = jax.block_until_ready(spp_reference(x3, params, KS))
    assert out3.shape == (N, C2, 13, 13), out3.shape
    assert jnp.allclose(out3, ref3, atol=2e-3, rtol=2e-3), float(jnp.max(jnp.abs(out3 - ref3)))

    # 4) bf16 compute path (bf16 MXU/VPU operands, f32 accumulation).
    outb = jax.block_until_ready(spp_forward(x, params, KS, compute_dtype=jnp.bfloat16))
    assert jnp.allclose(outb, ref, atol=2e-1, rtol=2e-1), float(jnp.max(jnp.abs(outb - ref)))

    print("KERNEL_OK")
</pallas_src>

<mosaic_0001>
module attributes {stable_mosaic.version = 11 : i64} {
  func.func @_spp_fused_kernel(%arg0: i32, %arg1: memref<1x16x16x8xf32, #tpu.memory_space<vmem>>, %arg2: memref<8x4xf32, #tpu.memory_space<vmem>>, %arg3: memref<1x4xf32, #tpu.memory_space<vmem>>, %arg4: memref<16x8xf32, #tpu.memory_space<vmem>>, %arg5: memref<1x8xf32, #tpu.memory_space<vmem>>, %arg6: memref<1x256x8xf32, #tpu.memory_space<vmem>>, %arg7: memref<20x32x4xf32, #tpu.memory_space<vmem>>) attributes {dimension_semantics = [#tpu.dimension_semantics<parallel>], iteration_bounds = array<i64: 2>, scalar_prefetch = 0 : i64, scratch_operands = 1 : i64, tpu.core_type = #tpu.core_type<tc>, window_params = [{transform_indices = @transform_0, window_bounds = array<i64: 1, 16, 16, 8>}, {pipeline_mode = #tpu.pipeline_mode<synchronous>, transform_indices = @transform_1, window_bounds = array<i64: 8, 4>}, {pipeline_mode = #tpu.pipeline_mode<synchronous>, transform_indices = @transform_2, window_bounds = array<i64: 1, 4>}, {pipeline_mode = #tpu.pipeline_mode<synchronous>, transform_indices = @transform_3, window_bounds = array<i64: 16, 8>}, {pipeline_mode = #tpu.pipeline_mode<synchronous>, transform_indices = @transform_4, window_bounds = array<i64: 1, 8>}, {transform_indices = @transform_5, window_bounds = array<i64: 1, 256, 8>}]} {
    %cst = arith.constant 0xFF800000 : f32
    %0 = vector.broadcast %cst : f32 to vector<2x32x4xf32>
    %c0 = arith.constant 0 : index
    %c0_0 = arith.constant 0 : index
    %c0_1 = arith.constant 0 : index
    %1 = vector.load %arg7[%c0, %c0_0, %c0_1] : memref<20x32x4xf32, #tpu.memory_space<vmem>>, vector<2x32x4xf32>
    tpu.vector_store %arg7[%c0, %c0_0, %c0_1], %0 {strides = array<i32>} : memref<20x32x4xf32, #tpu.memory_space<vmem>>, vector<2x32x4xf32>,
    %cst_2 = arith.constant 0xFF800000 : f32
    %2 = vector.broadcast %cst_2 : f32 to vector<2x32x4xf32>
    %c18 = arith.constant 18 : index
    %c0_3 = arith.constant 0 : index
    %c0_4 = arith.constant 0 : index
    %3 = vector.load %arg7[%c18, %c0_3, %c0_4] : memref<20x32x4xf32, #tpu.memory_space<vmem>>, vector<2x32x4xf32>
    tpu.vector_store %arg7[%c18, %c0_3, %c0_4], %2 {strides = array<i32>} : memref<20x32x4xf32, #tpu.memory_space<vmem>>, vector<2x32x4xf32>,
    %cst_5 = arith.constant 0xFF800000 : f32
    %4 = vector.broadcast %cst_5 : f32 to vector<16x8x4xf32>
    %c2 = arith.constant 2 : index
    %c0_6 = arith.constant 0 : index
    %c0_7 = arith.constant 0 : index
    %5 = vector.load %arg7[%c2, %c0_6, %c0_7] : memref<20x32x4xf32, #tpu.memory_space<vmem>>, vector<16x8x4xf32>
    tpu.vector_store %arg7[%c2, %c0_6, %c0_7], %4 {strides = array<i32>} : memref<20x32x4xf32, #tpu.memory_space<vmem>>, vector<16x8x4xf32>,
    %cst_8 = arith.constant 0xFF800000 : f32
    %6 = vector.broadcast %cst_8 : f32 to vector<16x8x4xf32>
    %c2_9 = arith.constant 2 : index
    %c24 = arith.constant 24 : index
    %c0_10 = arith.constant 0 : index
    %7 = vector.load %arg7[%c2_9, %c24, %c0_10] : memref<20x32x4xf32, #tpu.memory_space<vmem>>, vector<16x8x4xf32>
    tpu.vector_store %arg7[%c2_9, %c24, %c0_10], %6 {strides = array<i32>} : memref<20x32x4xf32, #tpu.memory_space<vmem>>, vector<16x8x4xf32>,
    %c0_11 = arith.constant 0 : index
    %c0_12 = arith.constant 0 : index
    %c0_13 = arith.constant 0 : index
    %c0_14 = arith.constant 0 : index
    %8 = vector.load %arg1[%c0_11, %c0_12, %c0_13, %c0_14] : memref<1x16x16x8xf32, #tpu.memory_space<vmem>>, vector<1x16x16x8xf32>
    %9 = vector.shape_cast %8 : vector<1x16x16x8xf32> to vector<16x16x8xf32>
    %10 = vector.shape_cast %9 : vector<16x16x8xf32> to vector<256x8xf32>
    %c0_15 = arith.constant 0 : index
    %c0_16 = arith.constant 0 : index
    %11 = vector.load %arg2[%c0_15, %c0_16] : memref<8x4xf32, #tpu.memory_space<vmem>>, vector<8x4xf32>
    %cst_17 = arith.constant dense<0.000000e+00> : vector<256x4xf32>
    %12 = tpu.matmul %10, %11, %cst_17 {dimension_numbers = #tpu.dot_dimension_numbers<[1], [0], [0], [1], [0, 0, 1, 1], [], []>} : vector<256x8xf32>, vector<8x4xf32>, vector<256x4xf32> -> vector<256x4xf32>
    %c0_18 = arith.constant 0 : index
    %c0_19 = arith.constant 0 : index
    %13 = vector.load %arg3[%c0_18, %c0_19] : memref<1x4xf32, #tpu.memory_space<vmem>>, vector<1x4xf32>
    %14 = vector.broadcast %13 : vector<1x4xf32> to vector<256x4xf32>
    %15 = arith.addf %12, %14 : vector<256x4xf32>
    %16 = arith.negf %15 : vector<256x4xf32>
    %17 = math.exp %16 : vector<256x4xf32>
    %cst_20 = arith.constant 1.000000e+00 : f32
    %18 = vector.broadcast %cst_20 : f32 to vector<256x4xf32>
    %19 = arith.addf %18, %17 : vector<256x4xf32>
    %20 = arith.divf %18, %19 : vector<256x4xf32>
    %21 = arith.mulf %15, %20 : vector<256x4xf32>
    %22 = vector.shape_cast %21 : vector<256x4xf32> to vector<16x16x4xf32>
    %c0_21 = arith.constant 0 : index
    %c0_22 = arith.constant 0 : index
    %23 = vector.load %arg4[%c0_21, %c0_22] : memref<16x8xf32, #tpu.memory_space<vmem>>, vector<4x8xf32>
    %cst_23 = arith.constant dense<0.000000e+00> : vector<256x8xf32>
    %24 = tpu.matmul %21, %23, %cst_23 {dimension_numbers = #tpu.dot_dimension_numbers<[1], [0], [0], [1], [0, 0, 1, 1], [], []>} : vector<256x4xf32>, vector<4x8xf32>, vector<256x8xf32> -> vector<256x8xf32>
    %c2_24 = arith.constant 2 : index
    %c8 = arith.constant 8 : index
    %c0_25 = arith.constant 0 : index
    %25 = vector.load %arg7[%c2_24, %c8, %c0_25] : memref<20x32x4xf32, #tpu.memory_space<vmem>>, vector<16x16x4xf32>
    tpu.vector_store %arg7[%c2_24, %c8, %c0_25], %22 {strides = array<i32>} : memref<20x32x4xf32, #tpu.memory_space<vmem>>, vector<16x16x4xf32>,
    %c0_26 = arith.constant 0 : index
    %c6 = arith.constant 6 : index
    %c0_27 = arith.constant 0 : index
    %26 = vector.load %arg7[%c0_26, %c6, %c0_27] : memref<20x32x4xf32, #tpu.memory_space<vmem>>, vector<20x16x4xf32>
    %c0_28 = arith.constant 0 : index
    %c7 = arith.constant 7 : index
    %c0_29 = arith.constant 0 : index
    %27 = vector.load %arg7[%c0_28, %c7, %c0_29] : memref<20x32x4xf32, #tpu.memory_space<vmem>>, vector<20x16x4xf32>
    %28 = arith.maximumf %26, %27 : vector<20x16x4xf32>
    %c0_30 = arith.constant 0 : index
    %c8_31 = arith.constant 8 : index
    %c0_32 = arith.constant 0 : index
    %29 = vector.load %arg7[%c0_30, %c8_31, %c0_32] : memref<20x32x4xf32, #tpu.memory_space<vmem>>, vector<20x16x4xf32>
    %30 = arith.maximumf %28, %29 : vector<20x16x4xf32>
    %c0_33 = arith.constant 0 : index
    %c9 = arith.constant 9 : index
    %c0_34 = arith.constant 0 : index
    %31 = vector.load %arg7[%c0_33, %c9, %c0_34] : memref<20x32x4xf32, #tpu.memory_space<vmem>>, vector<20x16x4xf32>
    %32 = arith.maximumf %30, %31 : vector<20x16x4xf32>
    %c0_35 = arith.constant 0 : index
    %c10 = arith.constant 10 : index
    %c0_36 = arith.constant 0 : index
    %33 = vector.load %arg7[%c0_35, %c10, %c0_36] : memref<20x32x4xf32, #tpu.memory_space<vmem>>, vector<20x16x4xf32>
    %34 = arith.maximumf %32, %33 : vector<20x16x4xf32>
    %35 = vector.extract_strided_slice %34 {offsets = [0, 0, 0], sizes = [16, 16, 4], strides = [1, 1, 1]} : vector<20x16x4xf32> to vector<16x16x4xf32>
    %36 = vector.extract_strided_slice %34 {offsets = [1, 0, 0], sizes = [16, 16, 4], strides = [1, 1, 1]} : vector<20x16x4xf32> to vector<16x16x4xf32>
    %37 = arith.maximumf %35, %36 : vector<16x16x4xf32>
    %38 = vector.extract_strided_slice %34 {offsets = [2, 0, 0], sizes = [16, 16, 4], strides = [1, 1, 1]} : vector<20x16x4xf32> to vector<16x16x4xf32>
    %39 = arith.maximumf %37, %38 : vector<16x16x4xf32>
    %40 = vector.extract_strided_slice %34 {offsets = [3, 0, 0], sizes = [16, 16, 4], strides = [1, 1, 1]} : vector<20x16x4xf32> to vector<16x16x4xf32>
    %41 = arith.maximumf %39, %40 : vector<16x16x4xf32>
    %42 = vector.extract_strided_slice %34 {offsets = [4, 0, 0], sizes = [16, 16, 4], strides = [1, 1, 1]} : vector<20x16x4xf32> to vector<16x16x4xf32>
    %43 = arith.maximumf %41, %42 : vector<16x16x4xf32>
    %44 = vector.shape_cast %43 : vector<16x16x4xf32> to vector<256x4xf32>
    %c4 = arith.constant 4 : index
    %c0_37 = arith.constant 0 : index
    %45 = vector.load %arg4[%c4, %c0_37] : memref<16x8xf32, #tpu.memory_space<vmem>>, vector<4x8xf32>
    %cst_38 = arith.constant dense<0.000000e+00> : vector<256x8xf32>
    %46 = tpu.matmul %44, %45, %cst_38 {dimension_numbers = #tpu.dot_dimension_numbers<[1], [0], [0], [1], [0, 0, 1, 1], [], []>} : vector<256x4xf32>, vector<4x8xf32>, vector<256x8xf32> -> vector<256x8xf32>
    %47 = arith.addf %24, %46 : vector<256x8xf32>
    %c2_39 = arith.constant 2 : index
    %c8_40 = arith.constant 8 : index
    %c0_41 = arith.constant 0 : index
    %48 = vector.load %arg7[%c2_39, %c8_40, %c0_41] : memref<20x32x4xf32, #tpu.memory_space<vmem>>, vector<16x16x4xf32>
    tpu.vector_store %arg7[%c2_39, %c8_40, %c0_41], %43 {strides = array<i32>} : memref<20x32x4xf32, #tpu.memory_space<vmem>>, vector<16x16x4xf32>,
    %c0_42 = arith.constant 0 : index
    %c6_43 = arith.constant 6 : index
    %c0_44 = arith.constant 0 : index
    %49 = vector.load %arg7[%c0_42, %c6_43, %c0_44] : memref<20x32x4xf32, #tpu.memory_space<vmem>>, vector<20x16x4xf32>
    %c0_45 = arith.constant 0 : index
    %c7_46 = arith.constant 7 : index
    %c0_47 = arith.constant 0 : index
    %50 = vector.load %arg7[%c0_45, %c7_46, %c0_47] : memref<20x32x4xf32, #tpu.memory_space<vmem>>, vector<20x16x4xf32>
    %51 = arith.maximumf %49, %50 : vector<20x16x4xf32>
    %c0_48 = arith.constant 0 : index
    %c8_49 = arith.constant 8 : index
    %c0_50 = arith.constant 0 : index
    %52 = vector.load %arg7[%c0_48, %c8_49, %c0_50] : memref<20x32x4xf32, #tpu.memory_space<vmem>>, vector<20x16x4xf32>
    %53 = arith.maximumf %51, %52 : vector<20x16x4xf32>
    %c0_51 = arith.constant 0 : index
    %c9_52 = arith.constant 9 : index
    %c0_53 = arith.constant 0 : index
    %54 = vector.load %arg7[%c0_51, %c9_52, %c0_53] : memref<20x32x4xf32, #tpu.memory_space<vmem>>, vector<20x16x4xf32>
    %55 = arith.maximumf %53, %54 : vector<20x16x4xf32>
    %c0_54 = arith.constant 0 : index
    %c10_55 = arith.constant 10 : index
    %c0_56 = arith.constant 0 : index
    %56 = vector.load %arg7[%c0_54, %c10_55, %c0_56] : memref<20x32x4xf32, #tpu.memory_space<vmem>>, vector<20x16x4xf32>
    %57 = arith.maximumf %55, %56 : vector<20x16x4xf32>
    %58 = vector.extract_strided_slice %57 {offsets = [0, 0, 0], sizes = [16, 16, 4], strides = [1, 1, 1]} : vector<20x16x4xf32> to vector<16x16x4xf32>
    %59 = vector.extract_strided_slice %57 {offsets = [1, 0, 0], sizes = [16, 16, 4], strides = [1, 1, 1]} : vector<20x16x4xf32> to vector<16x16x4xf32>
    %60 = arith.maximumf %58, %59 : vector<16x16x4xf32>
    %61 = vector.extract_strided_slice %57 {offsets = [2, 0, 0], sizes = [16, 16, 4], strides = [1, 1, 1]} : vector<20x16x4xf32> to vector<16x16x4xf32>
    %62 = arith.maximumf %60, %61 : vector<16x16x4xf32>
    %63 = vector.extract_strided_slice %57 {offsets = [3, 0, 0], sizes = [16, 16, 4], strides = [1, 1, 1]} : vector<20x16x4xf32> to vector<16x16x4xf32>
    %64 = arith.maximumf %62, %63 : vector<16x16x4xf32>
    %65 = vector.extract_strided_slice %57 {offsets = [4, 0, 0], sizes = [16, 16, 4], strides = [1, 1, 1]} : vector<20x16x4xf32> to vector<16x16x4xf32>
    %66 = arith.maximumf %64, %65 : vector<16x16x4xf32>
    %67 = vector.shape_cast %66 : vector<16x16x4xf32> to vector<256x4xf32>
    %c8_57 = arith.constant 8 : index
    %c0_58 = arith.constant 0 : index
    %68 = vector.load %arg4[%c8_57, %c0_58] : memref<16x8xf32, #tpu.memory_space<vmem>>, vector<4x8xf32>
    %cst_59 = arith.constant dense<0.000000e+00> : vector<256x8xf32>
    %69 = tpu.matmul %67, %68, %cst_59 {dimension_numbers = #tpu.dot_dimension_numbers<[1], [0], [0], [1], [0, 0, 1, 1], [], []>} : vector<256x4xf32>, vector<4x8xf32>, vector<256x8xf32> -> vector<256x8xf32>
    %70 = arith.addf %47, %69 : vector<256x8xf32>
    %c2_60 = arith.constant 2 : index
    %c8_61 = arith.constant 8 : index
    %c0_62 = arith.constant 0 : index
    %71 = vector.load %arg7[%c2_60, %c8_61, %c0_62] : memref<20x32x4xf32, #tpu.memory_space<vmem>>, vector<16x16x4xf32>
    tpu.vector_store %arg7[%c2_60, %c8_61, %c0_62], %66 {strides = array<i32>} : memref<20x32x4xf32, #tpu.memory_space<vmem>>, vector<16x16x4xf32>,
    %c0_63 = arith.constant 0 : index
    %c6_64 = arith.constant 6 : index
    %c0_65 = arith.constant 0 : index
    %72 = vector.load %arg7[%c0_63, %c6_64, %c0_65] : memref<20x32x4xf32, #tpu.memory_space<vmem>>, vector<20x16x4xf32>
    %c0_66 = arith.constant 0 : index
    %c7_67 = arith.constant 7 : index
    %c0_68 = arith.constant 0 : index
    %73 = vector.load %arg7[%c0_66, %c7_67, %c0_68] : memref<20x32x4xf32, #tpu.memory_space<vmem>>, vector<20x16x4xf32>
    %74 = arith.maximumf %72, %73 : vector<20x16x4xf32>
    %c0_69 = arith.constant 0 : index
    %c8_70 = arith.constant 8 : index
    %c0_71 = arith.constant 0 : index
    %75 = vector.load %arg7[%c0_69, %c8_70, %c0_71] : memref<20x32x4xf32, #tpu.memory_space<vmem>>, vector<20x16x4xf32>
    %76 = arith.maximumf %74, %75 : vector<20x16x4xf32>
    %c0_72 = arith.constant 0 : index
    %c9_73 = arith.constant 9 : index
    %c0_74 = arith.constant 0 : index
    %77 = vector.load %arg7[%c0_72, %c9_73, %c0_74] : memref<20x32x4xf32, #tpu.memory_space<vmem>>, vector<20x16x4xf32>
    %78 = arith.maximumf %76, %77 : vector<20x16x4xf32>
    %c0_75 = arith.constant 0 : index
    %c10_76 = arith.constant 10 : index
    %c0_77 = arith.constant 0 : index
    %79 = vector.load %arg7[%c0_75, %c10_76, %c0_77] : memref<20x32x4xf32, #tpu.memory_space<vmem>>, vector<20x16x4xf32>
    %80 = arith.maximumf %78, %79 : vector<20x16x4xf32>
    %81 = vector.extract_strided_slice %80 {offsets = [0, 0, 0], sizes = [16, 16, 4], strides = [1, 1, 1]} : vector<20x16x4xf32> to vector<16x16x4xf32>
    %82 = vector.extract_strided_slice %80 {offsets = [1, 0, 0], sizes = [16, 16, 4], strides = [1, 1, 1]} : vector<20x16x4xf32> to vector<16x16x4xf32>
    %83 = arith.maximumf %81, %82 : vector<16x16x4xf32>
    %84 = vector.extract_strided_slice %80 {offsets = [2, 0, 0], sizes = [16, 16, 4], strides = [1, 1, 1]} : vector<20x16x4xf32> to vector<16x16x4xf32>
    %85 = arith.maximumf %83, %84 : vector<16x16x4xf32>
    %86 = vector.extract_strided_slice %80 {offsets = [3, 0, 0], sizes = [16, 16, 4], strides = [1, 1, 1]} : vector<20x16x4xf32> to vector<16x16x4xf32>
    %87 = arith.maximumf %85, %86 : vector<16x16x4xf32>
    %88 = vector.extract_strided_slice %80 {offsets = [4, 0, 0], sizes = [16, 16, 4], strides = [1, 1, 1]} : vector<20x16x4xf32> to vector<16x16x4xf32>
    %89 = arith.maximumf %87, %88 : vector<16x16x4xf32>
    %90 = vector.shape_cast %89 : vector<16x16x4xf32> to vector<256x4xf32>
    %c12 = arith.constant 12 : index
    %c0_78 = arith.constant 0 : index
    %91 = vector.load %arg4[%c12, %c0_78] : memref<16x8xf32, #tpu.memory_space<vmem>>, vector<4x8xf32>
    %cst_79 = arith.constant dense<0.000000e+00> : vector<256x8xf32>
    %92 = tpu.matmul %90, %91, %cst_79 {dimension_numbers = #tpu.dot_dimension_numbers<[1], [0], [0], [1], [0, 0, 1, 1], [], []>} : vector<256x4xf32>, vector<4x8xf32>, vector<256x8xf32> -> vector<256x8xf32>
    %93 = arith.addf %70, %92 : vector<256x8xf32>
    %c0_80 = arith.constant 0 : index
    %c0_81 = arith.constant 0 : index
    %94 = vector.load %arg5[%c0_80, %c0_81] : memref<1x8xf32, #tpu.memory_space<vmem>>, vector<1x8xf32>
    %95 = vector.broadcast %94 : vector<1x8xf32> to vector<256x8xf32>
    %96 = arith.addf %93, %95 : vector<256x8xf32>
    %97 = arith.negf %96 : vector<256x8xf32>
    %98 = math.exp %97 : vector<256x8xf32>
    %cst_82 = arith.constant 1.000000e+00 : f32
    %99 = vector.broadcast %cst_82 : f32 to vector<256x8xf32>
    %100 = arith.addf %99, %98 : vector<256x8xf32>
    %101 = arith.divf %99, %100 : vector<256x8xf32>
    %102 = arith.mulf %96, %101 : vector<256x8xf32>
    %c0_83 = arith.constant 0 : index
    %c0_84 = arith.constant 0 : index
    %c0_85 = arith.constant 0 : index
    %103 = vector.load %arg6[%c0_83, %c0_84, %c0_85] : memref<1x256x8xf32, #tpu.memory_space<vmem>>, vector<1x256x8xf32>
    %104 = vector.shape_cast %103 : vector<1x256x8xf32> to vector<256x8xf32>
    %105 = vector.shape_cast %102 : vector<256x8xf32> to vector<1x256x8xf32>
    tpu.vector_store %arg6[%c0_83, %c0_84, %c0_85], %105 {strides = array<i32>} : memref<1x256x8xf32, #tpu.memory_space<vmem>>, vector<1x256x8xf32>,
    return
  }
  func.func @transform_0(%arg0: i32) -> (i32, i32, i32, i32) {
    %c0_i32 = arith.constant 0 : i32
    %c0_i32_0 = arith.constant 0 : i32
    %c0_i32_1 = arith.constant 0 : i32
    %c0_i32_2 = arith.constant 0 : i32
    return %arg0, %c0_i32, %c0_i32_0, %c0_i32_1 : i32, i32, i32, i32
  }
  func.func @transform_1(%arg0: i32) -> (i32, i32) {
    %c0_i32 = arith.constant 0 : i32
    %c0_i32_0 = arith.constant 0 : i32
    %c0_i32_1 = arith.constant 0 : i32
    return %c0_i32, %c0_i32_0 : i32, i32
  }
  func.func @transform_2(%arg0: i32) -> (i32, i32) {
    %c0_i32 = arith.constant 0 : i32
    %c0_i32_0 = arith.constant 0 : i32
    %c0_i32_1 = arith.constant 0 : i32
    return %c0_i32, %c0_i32_0 : i32, i32
  }
  func.func @transform_3(%arg0: i32) -> (i32, i32) {
    %c0_i32 = arith.constant 0 : i32
    %c0_i32_0 = arith.constant 0 : i32
    %c0_i32_1 = arith.constant 0 : i32
    return %c0_i32, %c0_i32_0 : i32, i32
  }
  func.func @transform_4(%arg0: i32) -> (i32, i32) {
    %c0_i32 = arith.constant 0 : i32
    %c0_i32_0 = arith.constant 0 : i32
    %c0_i32_1 = arith.constant 0 : i32
    return %c0_i32, %c0_i32_0 : i32, i32
  }
  func.func @transform_5(%arg0: i32) -> (i32, i32, i32) {
    %c0_i32 = arith.constant 0 : i32
    %c0_i32_0 = arith.constant 0 : i32
    %c0_i32_1 = arith.constant 0 : i32
    return %arg0, %c0_i32, %c0_i32_0 : i32, i32, i32
  }
}

</mosaic_0001>

<bundles_post_ra>
// kernel: tpu_custom_call.1
= control target key start
LH: loop header
LB: loop body
LE: loop exit
PB: predicated region body
PF: predicated region fallthrough
CT: control target
= control target key end

     0   :  { %s5197_s18 = smov 0   ;;  %s6845_s0 = inlined_call_operand.vmem [shape: f32[2,16,16,8], index: 0, kind: input, shape index: {}]   ;;  %s6846_s1 = inlined_call_operand.vmem [shape: f32[8,4], index: 1, kind: input, shape index: {}]   ;;  %s6847_s2 = inlined_call_operand.vmem [shape: f32[1,4], index: 2, kind: input, shape index: {}]   ;;  %s6848_s3 = inlined_call_operand.vmem [shape: f32[16,8], index: 3, kind: input, shape index: {}]   ;;  %s6849_s4 = inlined_call_operand.vmem [shape: f32[1,8], index: 4, kind: input, shape index: {}]   ;;  %s6850_s5 = inlined_call_operand.vmem [shape: f32[2,256,8], index: 5, kind: output, shape index: {}]  }
   0x1 LB: > { %s4137_s19 = sadd.s32 4294967295, %s5164_s18   ;;  %p4141_p0 = scmp.ge.s32.totalorder %s5164_s18, 1  ;;  %s5164_s18 = sphi %s5197_s18, %s15_s18  }
   0x2   : > { %p187_p1 = scmp.lt.s32.totalorder %s5164_s18, 3 }
   0x4   : > { %p188_p2 = pnand %p4141_p0, %p187_p1 }
   0x6   : > { %191 = sbr.rel (%p188_p2) target bundleno = 819 (0x333), region = 40 }
   0xd   : > { %v308_v0 = vld [vmem:[%s6846_s1] sm:$0xff]  ;;  %p215_p3 = scmp.lt.s32.totalorder %s4137_s19, 1  ;;  %vm316_vm0 = vcmask 64512   ;;  %vm225_vm1 = vcmask 31744   ;;  %v5166_v33 = vmov -inf   ;;  %vm1480_vm2 = vcmask 1043456  }
   0xe   : > { %4545 = vmatprep.subr.mxu0 %v308_v0  ;;  %226 = vst.msk [vmem:[#allocation2] sm:$0xff] %vm225_vm1, %v5166_v33  ;;  %227 = vst.msk [vmem:[#allocation2 + $0x8] sm:$0xff] %vm225_vm1, %v5166_v33  ;;  %v1383_v34 = vld [vmem:[%s6848_s3 + $0x4] sm:$0xf]  ;;  %v5338_v35 = vld [vmem:[%s6848_s3] sm:$0xf] }
   0xf   : > { %4546 = vmatpush3.msra.mxu0 %v308_v0  ;;  %s6885_s19 = smov (!%p215_p3, %s4137_s19), 1  ;;  %228 = vst.msk [vmem:[#allocation2 + $0x10] sm:$0xff] %vm225_vm1, %v5166_v33  ;;  %230 = vst.msk [vmem:[#allocation2 + $0x20] sm:$0xff] %vm225_vm1, %v5166_v33  ;;  %4795 = vmatprep.subr.msk.mxu1 %vm1480_vm2, %v5338_v35  ;;  %v5349_v36 = vld [vmem:[%s6848_s3 + $0x8] sm:$0xf] }
  0x10   : > { %s4378_s22 = sshll.u32 %s6885_s19, 8  ;;  %231 = vst.msk [vmem:[#allocation2 + $0x28] sm:$0xff] %vm225_vm1, %v5166_v33  ;;  %232 = vst.msk [vmem:[#allocation2 + $0x30] sm:$0xff] %vm225_vm1, %v5166_v33  ;;  %4595 = vmatprep.subr.msk.mxu0 %vm1480_vm2, %v1383_v34  ;;  %4796 = vmatpush3.msk.msra.mxu1 %vm1480_vm2, %v5338_v35  ;;  %v5356_v37 = vld [vmem:[%s6847_s2] ss:$0 sm:$0xff] }
  0x11   : > { %s5216_s25 = scalar_lea.vmem %s6845_s0, %s4378_s22  ;;  %244 = vst.msk [vmem:[#allocation2 + $0x40] sm:$0xff] %vm225_vm1, %v5166_v33  ;;  %245 = vst.msk [vmem:[#allocation2 + $0x60] sm:$0xff] %vm225_vm1, %v5166_v33  ;;  %4695 = vmatprep.subr.msk.mxu1 %vm1480_vm2, %v5349_v36  ;;  %s6654_s15 = scalar_lea.vmem %s6850_s5, %s4378_s22 }
  0x12   : > { %v276_v1 = vld [vmem:[%s5216_s25] sm:$0xff]  ;;  %v277_v2 = vld [vmem:[%s5216_s25 + $0x8] sm:$0xff]  ;;  %v278_v3 = vld [vmem:[%s5216_s25 + $0x10] sm:$0xff]  ;;  %246 = vst.msk [vmem:[#allocation2 + $0x80] sm:$0xff] %vm225_vm1, %v5166_v33 }
  0x13   : > { %4547 = vmatprep.mubr.msk.f32.mxu0 %vm316_vm0, %v276_v1  ;;  %v279_v4 = vld [vmem:[%s5216_s25 + $0x18] sm:$0xff]  ;;  %v280_v5 = vld [vmem:[%s5216_s25 + $0x20] sm:$0xff]  ;;  %v281_v6 = vld [vmem:[%s5216_s25 + $0x28] sm:$0xff]  ;;  %229 = vst.msk [vmem:[#allocation2 + $0x18] sm:$0xff] %vm225_vm1, %v5166_v33 }
  0x14   : > { %4548 = vmatmul.mubr.msk.f32.vlgmr.msra.gmra.mrb[0].mxu0 %vm316_vm0, %v277_v2  ;;  %v282_v7 = vld [vmem:[%s5216_s25 + $0x30] sm:$0xff]  ;;  %v283_v8 = vld [vmem:[%s5216_s25 + $0x38] sm:$0xff]  ;;  %v284_v9 = vld [vmem:[%s5216_s25 + $0x40] sm:$0xff]  ;;  %233 = vst.msk [vmem:[#allocation2 + $0x38] sm:$0xff] %vm225_vm1, %v5166_v33 }
  0x15   : > { %4550 = vmatprep.mubr.msk.f32.mxu0 %vm316_vm0, %v278_v3  ;;  %v285_v10 = vld [vmem:[%s5216_s25 + $0x48] sm:$0xff]  ;;  %v286_v11 = vld [vmem:[%s5216_s25 + $0x50] sm:$0xff]  ;;  %v287_v12 = vld [vmem:[%s5216_s25 + $0x58] sm:$0xff]  ;;  %235 = vst.msk [vmem:[#allocation2 + $0x240] sm:$0xff] %vm225_vm1, %v5166_v33  ;;  %4596 = vmatpush3.msk.msra.mxu0 %vm1480_vm2, %v1383_v34 }
  0x16   : > { %v288_v13 = vld [vmem:[%s5216_s25 + $0x60] sm:$0xff]  ;;  %v289_v14 = vld [vmem:[%s5216_s25 + $0x68] sm:$0xff]  ;;  %v290_v15 = vld [vmem:[%s5216_s25 + $0x70] sm:$0xff]  ;;  %236 = vst.msk [vmem:[#allocation2 + $0x248] sm:$0xff] %vm225_vm1, %v5166_v33  ;;  %4645 = vmatprep.subr.msk.mxu0 %vm1480_vm2, %v5338_v35 }
  0x17   : > { %v291_v16 = vld [vmem:[%s5216_s25 + $0x78] sm:$0xff]  ;;  %v292_v17 = vld [vmem:[%s5216_s25 + $0x80] sm:$0xff]  ;;  %v293_v18 = vld [vmem:[%s5216_s25 + $0x88] sm:$0xff]  ;;  %237 = vst.msk [vmem:[#allocation2 + $0x250] sm:$0xff] %vm225_vm1, %v5166_v33 }
  0x18   : > { %4551 = vmatmul.mubr.msk.f32.gmra.mrb[2].mxu0 %vm316_vm0, %v279_v4  ;;  %v294_v19 = vld [vmem:[%s5216_s25 + $0x90] sm:$0xff]  ;;  %v295_v20 = vld [vmem:[%s5216_s25 + $0x98] sm:$0xff]  ;;  %v296_v21 = vld [vmem:[%s5216_s25 + $0xa0] sm:$0xff]  ;;  %238 = vst.msk [vmem:[#allocation2 + $0x258] sm:$0xff] %vm225_vm1, %v5166_v33 }
  0x19   : > { %4553 = vmatprep.mubr.msk.f32.mxu0 %vm316_vm0, %v280_v5  ;;  %v297_v22 = vld [vmem:[%s5216_s25 + $0xa8] sm:$0xff]  ;;  %v298_v23 = vld [vmem:[%s5216_s25 + $0xb0] sm:$0xff]  ;;  %v299_v24 = vld [vmem:[%s5216_s25 + $0xb8] sm:$0xff]  ;;  %239 = vst.msk [vmem:[#allocation2 + $0x260] sm:$0xff] %vm225_vm1, %v5166_v33 }
  0x1a   : > { %v300_v25 = vld [vmem:[%s5216_s25 + $0xc0] sm:$0xff]  ;;  %v301_v26 = vld [vmem:[%s5216_s25 + $0xc8] sm:$0xff]  ;;  %v302_v27 = vld [vmem:[%s5216_s25 + $0xd0] sm:$0xff]  ;;  %240 = vst.msk [vmem:[#allocation2 + $0x268] sm:$0xff] %vm225_vm1, %v5166_v33 }
  0x1b   : > { %v303_v28 = vld [vmem:[%s5216_s25 + $0xd8] sm:$0xff]  ;;  %v304_v29 = vld [vmem:[%s5216_s25 + $0xe0] sm:$0xff]  ;;  %v305_v30 = vld [vmem:[%s5216_s25 + $0xe8] sm:$0xff]  ;;  %241 = vst.msk [vmem:[#allocation2 + $0x270] sm:$0xff] %vm225_vm1, %v5166_v33 }
  0x1c   : > { %4554 = vmatmul.mubr.msk.f32.gmra.mrb[4].mxu0 %vm316_vm0, %v281_v6  ;;  %v306_v31 = vld [vmem:[%s5216_s25 + $0xf0] sm:$0xff]  ;;  %v307_v32 = vld [vmem:[%s5216_s25 + $0xf8] sm:$0xff]  ;;  %242 = vst.msk [vmem:[#allocation2 + $0x278] sm:$0xff] %vm225_vm1, %v5166_v33  ;;  %247 = vst.msk [vmem:[#allocation2 + $0xa0] sm:$0xff] %vm225_vm1, %v5166_v33 }
  0x1d   : > { %4556 = vmatprep.mubr.msk.f32.mxu0 %vm316_vm0, %v282_v7  ;;  %248 = vst.msk [vmem:[#allocation2 + $0xc0] sm:$0xff] %vm225_vm1, %v5166_v33  ;;  %249 = vst.msk [vmem:[#allocation2 + $0xe0] sm:$0xff] %vm225_vm1, %v5166_v33  ;;  %v895_v49 = vld [vmem:[#allocation2 + $0x6] sm:$0xff]  ;;  %v896_v55 = vld [vmem:[#allocation2 + $0xe] sm:$0xff] }
  0x1e   : > { %250 = vst.msk [vmem:[#allocation2 + $0x100] sm:$0xff] %vm225_vm1, %v5166_v33  ;;  %251 = vst.msk [vmem:[#allocation2 + $0x120] sm:$0xff] %vm225_vm1, %v5166_v33  ;;  %v897_v50 = vld [vmem:[#allocation2 + $0x26] sm:$0xff]  ;;  %v936_v56 = vld [vmem:[#allocation2 + $0xf] sm:$0xff] }
  0x1f   : > { %252 = vst.msk [vmem:[#allocation2 + $0x140] sm:$0xff] %vm225_vm1, %v5166_v33  ;;  %253 = vst.msk [vmem:[#allocation2 + $0x160] sm:$0xff] %vm225_vm1, %v5166_v33  ;;  %v935_v51 = vld [vmem:[#allocation2 + $0x7] sm:$0xff]  ;;  %v938_v60 = vld [vmem:[#allocation2 + $0x2f] sm:$0xff]  ;;  %v976_v2 = vmax.f32 %v896_v55, %v936_v56 }
  0x20   : > { %4557 = vmatmul.mubr.msk.f32.gmra.mrb[6].mxu0 %vm316_vm0, %v283_v8  ;;  %254 = vst.msk [vmem:[#allocation2 + $0x180] sm:$0xff] %vm225_vm1, %v5166_v33  ;;  %255 = vst.msk [vmem:[#allocation2 + $0x1a0] sm:$0xff] %vm225_vm1, %v5166_v33  ;;  %v937_v54 = vld [vmem:[#allocation2 + $0x27] sm:$0xff]  ;;  %v975_v62 = vmax.f32 %v895_v49, %v935_v51  ;;  %v1016_v7 = vld [vmem:[#allocation2 + $0x10] sm:$0xff] }
  0x21   : > { %4559 = vmatprep.mubr.msk.f32.mxu0 %vm316_vm0, %v284_v9  ;;  %256 = vst.msk [vmem:[#allocation2 + $0x1c0] sm:$0xff] %vm225_vm1, %v5166_v33  ;;  %257 = vst.msk [vmem:[#allocation2 + $0x1e0] sm:$0xff] %vm225_vm1, %v5166_v33  ;;  %v898_v59 = vld [vmem:[#allocation2 + $0x2e] sm:$0xff]  ;;  %v977_v0 = vmax.f32 %v897_v50, %v937_v54 }
  0x22   : > { %258 = vst.msk [vmem:[#allocation2 + $0x200] sm:$0xff] %vm225_vm1, %v5166_v33  ;;  %259 = vst.msk [vmem:[#allocation2 + $0x220] sm:$0xff] %vm225_vm1, %v5166_v33  ;;  %v1015_v1 = vld [vmem:[#allocation2 + $0x8] sm:$0xff]  ;;  %v978_v6 = vmax.f32 %v898_v59, %v938_v60  ;;  %v1176_v49 = vld [vmem:[#allocation2 + $0x12] sm:$0xff] }
  0x23   : > { %260 = vst.msk [vmem:[#allocation2 + $0x58] sm:$0xff] %vm225_vm1, %v5166_v33  ;;  %261 = vst.msk [vmem:[#allocation2 + $0x78] sm:$0xff] %vm225_vm1, %v5166_v33  ;;  %v1017_v5 = vld [vmem:[#allocation2 + $0x28] sm:$0xff] }
  0x24   : > { %4560 = vmatmul.mubr.msk.f32.gmra.mrb[8].mxu0 %vm316_vm0, %v285_v10  ;;  %262 = vst.msk [vmem:[#allocation2 + $0x98] sm:$0xff] %vm225_vm1, %v5166_v33  ;;  %263 = vst.msk [vmem:[#allocation2 + $0xb8] sm:$0xff] %vm225_vm1, %v5166_v33  ;;  %v1018_v10 = vld [vmem:[#allocation2 + $0x30] sm:$0xff] }
  0x25   : > { %4562 = vmatprep.mubr.msk.f32.mxu0 %vm316_vm0, %v286_v11  ;;  %264 = vst.msk [vmem:[#allocation2 + $0xd8] sm:$0xff] %vm225_vm1, %v5166_v33  ;;  %265 = vst.msk [vmem:[#allocation2 + $0xf8] sm:$0xff] %vm225_vm1, %v5166_v33  ;;  %v1175_v34 = vld [vmem:[#allocation2 + $0xa] sm:$0xff] }
  0x26   : > { %266 = vst.msk [vmem:[#allocation2 + $0x118] sm:$0xff] %vm225_vm1, %v5166_v33  ;;  %267 = vst.msk [vmem:[#allocation2 + $0x138] sm:$0xff] %vm225_vm1, %v5166_v33 }
  0x27   : > { %268 = vst.msk [vmem:[#allocation2 + $0x158] sm:$0xff] %vm225_vm1, %v5166_v33  ;;  %269 = vst.msk [vmem:[#allocation2 + $0x178] sm:$0xff] %vm225_vm1, %v5166_v33 }
  0x28   : > { %4563 = vmatmul.mubr.msk.f32.gmra.mrb[10].mxu0 %vm316_vm0, %v287_v12  ;;  %270 = vst.msk [vmem:[#allocation2 + $0x198] sm:$0xff] %vm225_vm1, %v5166_v33  ;;  %271 = vst.msk [vmem:[#allocation2 + $0x1b8] sm:$0xff] %vm225_vm1, %v5166_v33  ;;  %v1055_v12 = vmax.f32 %v975_v62, %v1015_v1 }
  0x29   : > { %4565 = vmatprep.mubr.msk.f32.mxu0 %vm316_vm0, %v288_v13  ;;  %272 = vst.msk [vmem:[#allocation2 + $0x1d8] sm:$0xff] %vm225_vm1, %v5166_v33  ;;  %273 = vst.msk [vmem:[#allocation2 + $0x1f8] sm:$0xff] %vm225_vm1, %v5166_v33 }
  0x2a   : > { %274 = vst.msk [vmem:[#allocation2 + $0x218] sm:$0xff] %vm225_vm1, %v5166_v33  ;;  %275 = vst.msk [vmem:[#allocation2 + $0x238] sm:$0xff] %vm225_vm1, %v5166_v33 }
  0x2c   : > { %4566 = vmatmul.mubr.msk.f32.gmra.mrb[12].mxu0 %vm316_vm0, %v289_v14 }
  0x2d   : > { %4568 = vmatprep.mubr.msk.f32.mxu0 %vm316_vm0, %v290_v15  ;;  %v1057_v15 = vmax.f32 %v977_v0, %v1017_v5 }
  0x30   : > { %4569 = vmatmul.mubr.msk.f32.gmra.mrb[14].mxu0 %vm316_vm0, %v291_v16  ;;  %v1095_v16 = vld [vmem:[#allocation2 + $0x9] sm:$0xff] }
  0x31   : > { %4571 = vmatprep.mubr.msk.f32.mxu0 %vm316_vm0, %v292_v17  ;;  %v1056_v17 = vmax.f32 %v976_v2, %v1016_v7  ;;  %v931_v7 = vld [vmem:[#allocation2 + $0x246] sm:$0xff] }
  0x34   : > { %4572 = vmatmul.mubr.msk.f32.gmra.mrb[16].mxu0 %vm316_vm0, %v293_v18 }
  0x35   : > { %4574 = vmatprep.mubr.msk.f32.mxu0 %vm316_vm0, %v294_v19 }
  0x38   : > { %4575 = vmatmul.mubr.msk.f32.gmra.mrb[18].mxu0 %vm316_vm0, %v295_v20 }
  0x39   : > { %4577 = vmatprep.mubr.msk.f32.mxu0 %vm316_vm0, %v296_v21 }
  0x3c   : > { %4578 = vmatmul.mubr.msk.f32.gmra.mrb[20].mxu0 %vm316_vm0, %v297_v22  ;;  %v1097_v22 = vld [vmem:[#allocation2 + $0x29] sm:$0xff] }
  0x3d   : > { %4580 = vmatprep.mubr.msk.f32.mxu0 %vm316_vm0, %v298_v23  ;;  %v1058_v23 = vmax.f32 %v978_v6, %v1018_v10  ;;  %v1137_v33 = vmax.f32 %v1057_v15, %v1097_v22  ;;  %v1051_v10 = vld [vmem:[#allocation2 + $0x248] sm:$0xff] }
  0x3e   : > { %v5424_v22 = vld [vmem:[#allocation2 + $0x6] sm:$0xff] }
  0x3f   : > { %6861 = vst [vmem:[#allocation3_spill] sm:$0xff] %v5424_v22 }
  0x40   : > { %4581 = vmatmul.mubr.msk.f32.gmra.mrb[22].mxu0 %vm316_vm0, %v299_v24  ;;  %v1096_v24 = vld [vmem:[#allocation2 + $0x11] sm:$0xff] }
  0x41   : > { %4583 = vmatprep.mubr.msk.f32.mxu0 %vm316_vm0, %v300_v25 }
  0x44   : > { %4584 = vmatmul.mubr.msk.f32.gmra.mrb[24].mxu0 %vm316_vm0, %v301_v26 }
  0x45   : > { %4586 = vmatprep.mubr.msk.f32.mxu0 %vm316_vm0, %v302_v27 }
  0x48   : > { %4587 = vmatmul.mubr.msk.f32.gmra.mrb[26].mxu0 %vm316_vm0, %v303_v28  ;;  %v1098_v28 = vld [vmem:[#allocation2 + $0x31] sm:$0xff] }
  0x49   : > { %4589 = vmatprep.mubr.msk.f32.mxu0 %vm316_vm0, %v304_v29 }
  0x4c   : > { %4590 = vmatmul.mubr.msk.f32.gmra.mrb[28].mxu0 %vm316_vm0, %v305_v30  ;;  %v1135_v30 = vmax.f32 %v1055_v12, %v1095_v16 }
  0x4d   : > { %4592 = vmatprep.mubr.msk.f32.mxu0 %vm316_vm0, %v306_v31 }
  0x4e   : > { %v1215_v55 = vmax.f32 %v1135_v30, %v1175_v34  ;;  %v5432_v30 = vld [vmem:[#allocation2 + $0x26] sm:$0xff] }
  0x4f   : > { %6862 = vst [vmem:[#allocation4_spill] sm:$0xff] %v5432_v30 }
  0x50   : > { %4593 = vmatmul.mubr.msk.f32.gmra.mrb[30].mxu0 %vm316_vm0, %v307_v32 }
  0xe7   : > { %v4549_v38 = vpop.f32.mrb[0].mxu0 }
  0xe8   : > { %v5359_v39 = vadd.f32 %v4549_v38, %v5356_v37  ;;  %v479_v40 = vpop.f32.mrb[1].mxu0  ;;  %v1136_v38 = vmax.f32 %v1056_v17, %v1096_v24 }
  0xe9   : > { %v5362_v41 = vadd.f32 %v5356_v37, %v479_v40 }
  0xea   : > { %v4180_v42 = vmul.f32 -1.442695, %v5359_v39  ;;  %v1216_v60 = vmax.f32 %v1136_v38, %v1176_v49  ;;  %v1211_v38 = vld [vmem:[#allocation2 + $0x24a] sm:$0xff] }
  0xeb   : > { %v4179_v43 = vmul.f32 -1.442695, %v5362_v41  ;;  %v4552_v44 = vpop.f32.mrb[2].mxu0  ;;  %v1052_v49 = vld [vmem:[#allocation2 + $0x250] sm:$0xff] }
  0xec   : > { %4902 = vpow2.f32 %v4180_v42  ;;  %v5367_v45 = vadd.f32 %v4552_v44, %v5356_v37  ;;  %v489_v46 = vpop.f32.mrb[3].mxu0 }
  0xed   : > { %4904 = vpow2.f32 %v4179_v43  ;;  %v5370_v47 = vadd.f32 %v5356_v37, %v489_v46  ;;  %v1177_v46 = vld [vmem:[#allocation2 + $0x2a] sm:$0xff] }
  0xee   : > { %v4182_v48 = vmul.f32 -1.442695, %v5367_v45  ;;  %v5405_v59 = vmax.f32 %v1137_v33, %v1177_v46 }
  0xef   : > { %v4181_v52 = vmul.f32 -1.442695, %v5370_v47  ;;  %v4555_v53 = vpop.f32.mrb[4].mxu0 }
  0xf0   : > { %4906 = vpow2.f32 %v4182_v48  ;;  %v5375_v57 = vadd.f32 %v4555_v53, %v5356_v37  ;;  %v499_v58 = vpop.f32.mrb[5].mxu0  ;;  %v1138_v48 = vmax.f32 %v1058_v23, %v1098_v28  ;;  %v1178_v53 = vld [vmem:[#allocation2 + $0x32] sm:$0xff] }
  0xf1   : > { %4908 = vpow2.f32 %v4181_v52  ;;  %v5378_v61 = vadd.f32 %v5356_v37, %v499_v58 }
  0xf2   : > { %v4184_v63 = vmul.f32 -1.442695, %v5375_v57  ;;  %v5408_v2 = vmax.f32 %v1138_v48, %v1178_v53  ;;  %v932_v48 = vld [vmem:[#allocation2 + $0x24e] sm:$0xff] }
  0xf3   : > { %v4183_v3 = vmul.f32 -1.442695, %v5378_v61  ;;  %v4558_v4 = vpop.f32.mrb[6].mxu0 }
  0xf4   : > { %4910 = vpow2.f32 %v4184_v63  ;;  %v5383_v8 = vadd.f32 %v4558_v4, %v5356_v37  ;;  %v509_v9 = vpop.f32.mrb[7].mxu0 }
  0xf5   : > { %4912 = vpow2.f32 %v4183_v3  ;;  %v5386_v11 = vadd.f32 %v5356_v37, %v509_v9  ;;  %v971_v9 = vld [vmem:[#allocation2 + $0x247] sm:$0xff] }
  0xf6   : > { %v4903_v13 = vpop.eup %4902  ;;  %v4186_v14 = vmul.f32 -1.442695, %v5383_v8  ;;  %v1011_v15 = vmax.f32 %v931_v7, %v971_v9  ;;  %v973_v7 = vld [vmem:[#allocation2 + $0x267] sm:$0xff] }
  0xf7   : > { %v4905_v18 = vpop.eup %4904  ;;  %v735_v19 = vadd.f32 1.0, %v4903_v13  ;;  %v4185_v20 = vmul.f32 -1.442695, %v5386_v11  ;;  %v4561_v21 = vpop.f32.mrb[8].mxu0 }
  0xf8   : > { %v734_v25 = vadd.f32 1.0, %v4905_v18  ;;  %4914 = vpow2.f32 %v4186_v14  ;;  %v5391_v26 = vadd.f32 %v4561_v21, %v5356_v37  ;;  %v519_v27 = vpop.f32.mrb[9].mxu0  ;;  %v5418_v14 = vmax.f32 %v1215_v55, %v5405_v59  ;;  %v1131_v21 = vld [vmem:[#allocation2 + $0x249] sm:$0xff] }
  0xf9   : > { %4916 = vrcp.f32 %v735_v19  ;;  %v5394_v29 = vadd.f32 %v5356_v37, %v519_v27  ;;  %v1091_v28 = vmax.f32 %v1011_v15, %v1051_v10 }
  0xfa   : > { %v4907_v31 = vpop.eup %4906  ;;  %4918 = vrcp.f32 %v734_v25  ;;  %v4188_v32 = vmul.f32 -1.442695, %v5391_v26 }
  0xfb   : > { %v4909_v40 = vpop.eup %4908  ;;  %v737_v42 = vadd.f32 1.0, %v4907_v31  ;;  %4920 = vpow2.f32 %v4185_v20  ;;  %v4187_v43 = vmul.f32 -1.442695, %v5394_v29  ;;  %v4564_v44 = vpop.f32.mrb[10].mxu0  ;;  %v5422_v20 = vmax.f32 %v1216_v60, %v5408_v2  ;;  %v5434_v31 = vld [vmem:[#allocation2 + $0x7] sm:$0xff] }
  0xfc   : > { %v736_v50 = vadd.f32 1.0, %v4909_v40  ;;  %4922 = vpow2.f32 %v4188_v32  ;;  %v5399_v51 = vadd.f32 %v4564_v44, %v5356_v37  ;;  %v529_v52 = vpop.f32.mrb[11].mxu0  ;;  %6863 = vst [vmem:[#allocation5_spill] sm:$0xff] %v5434_v31  ;;  %v5436_v32 = vld [vmem:[#allocation2 + $0x27] sm:$0xff]  ;;  %v1171_v46 = vmax.f32 %v1091_v28, %v1131_v21 }
  0xfd   : > { %4924 = vrcp.f32 %v737_v42  ;;  %v5402_v54 = vadd.f32 %v5356_v37, %v529_v52  ;;  %6864 = vst [vmem:[#allocation6_spill] sm:$0xff] %v5436_v32 }
  0xfe   : > { %v4911_v56 = vpop.eup %4910  ;;  %4926 = vrcp.f32 %v736_v50  ;;  %v4190_v58 = vmul.f32 -1.442695, %v5399_v51 }
  0xff   : > { %v4913_v62 = vpop.eup %4912  ;;  %v739_v63 = vadd.f32 1.0, %v4911_v56  ;;  %4928 = vpow2.f32 %v4187_v43  ;;  %v4189_v0 = vmul.f32 -1.442695, %v5402_v54  ;;  %v4567_v1 = vpop.f32.mrb[12].mxu0 }
 0x100   : > { %v738_v3 = vadd.f32 1.0, %v4913_v62  ;;  %4930 = vpow2.f32 %v4190_v58  ;;  %v5411_v4 = vadd.f32 %v4567_v1, %v5356_v37  ;;  %v539_v5 = vpop.f32.mrb[13].mxu0  ;;  %v5460_v1 = vmax.f32 %v1171_v46, %v1211_v38 }
 0x101   : > { %4932 = vrcp.f32 %v739_v63  ;;  %v5414_v6 = vadd.f32 %v5356_v37, %v539_v5  ;;  %v933_v5 = vld [vmem:[#allocation2 + $0x266] sm:$0xff] }
 0x102   : > { %v4915_v12 = vpop.eup %4914  ;;  %4934 = vrcp.f32 %v738_v3  ;;  %v4192_v13 = vmul.f32 -1.442695, %v5411_v4  ;;  %v1132_v3 = vld [vmem:[#allocation2 + $0x251] sm:$0xff] }
 0x103   : > { %v4917_v16 = vpop.eup %4916  ;;  %v741_v17 = vadd.f32 1.0, %v4915_v12  ;;  %4936 = vpow2.f32 %v4189_v0  ;;  %v4191_v18 = vmul.f32 -1.442695, %v5414_v6  ;;  %v4570_v19 = vpop.f32.mrb[14].mxu0 }
 0x104   : > { %v4919_v23 = vpop.eup %4918  ;;  %v5427_v24 = vmul.f32 %v4917_v16, %v5359_v39  ;;  %4938 = vpow2.f32 %v4192_v13  ;;  %v5430_v25 = vadd.f32 %v4570_v19, %v5356_v37  ;;  %v549_v27 = vpop.f32.mrb[15].mxu0  ;;  %v1053_v13 = vld [vmem:[#allocation2 + $0x268] sm:$0xff]  ;;  %v1013_v19 = vmax.f32 %v933_v5, %v973_v7 }
 0x105   : > { %v4921_v33 = vpop.eup %4920  ;;  %v5439_v34 = vmul.f32 %v4919_v23, %v5362_v41  ;;  %4940 = vrcp.f32 %v741_v17  ;;  %v5442_v39 = vadd.f32 %v5356_v37, %v549_v27  ;;  %v972_v41 = vld [vmem:[#allocation2 + $0x24f] sm:$0xff] }
 0x106   : > { %v4923_v42 = vpop.eup %4922  ;;  %864 = vst.msk [vmem:[#allocation2 + $0x50] sm:$0xff] %vm225_vm1, %v5427_v24  ;;  %v740_v43 = vadd.f32 1.0, %v4921_v33  ;;  %4942 = vpow2.f32 %v4191_v18  ;;  %v4194_v44 = vmul.f32 -1.442695, %v5430_v25  ;;  %v1012_v56 = vmax.f32 %v932_v48, %v972_v41  ;;  %v1212_v18 = vld [vmem:[#allocation2 + $0x252] sm:$0xff]  ;;  %v1133_v33 = vld [vmem:[#allocation2 + $0x269] sm:$0xff] }
 0x107   : > { %v4925_v50 = vpop.eup %4924  ;;  %863 = vst.msk [vmem:[#allocation2 + $0x48] sm:$0xff] %vm225_vm1, %v5439_v34  ;;  %v743_v52 = vadd.f32 1.0, %v4923_v42  ;;  %v4193_v53 = vmul.f32 -1.442695, %v5442_v39  ;;  %v4573_v55 = vpop.f32.mrb[16].mxu0  ;;  %v1093_v46 = vmax.f32 %v1013_v19, %v1053_v13  ;;  %v1213_v13 = vld [vmem:[#allocation2 + $0x26a] sm:$0xff] }
 0x108   : > { %v4927_v60 = vpop.eup %4926  ;;  %v5455_v62 = vmul.f32 %v4925_v50, %v5367_v45  ;;  %4944 = vrcp.f32 %v740_v43  ;;  %v5458_v63 = vadd.f32 %v4573_v55, %v5356_v37  ;;  %v559_v0 = vpop.f32.mrb[17].mxu0  ;;  %v1092_v45 = vmax.f32 %v1012_v56, %v1052_v49 }
 0x109   : > { %v4929_v9 = vpop.eup %4928  ;;  %v5463_v10 = vmul.f32 %v4927_v60, %v5370_v47  ;;  %4946 = vrcp.f32 %v743_v52  ;;  %v5466_v12 = vadd.f32 %v5356_v37, %v559_v0  ;;  %v1173_v0 = vmax.f32 %v1093_v46, %v1133_v33 }
 0x10a   : > { %v4931_v15 = vpop.eup %4930  ;;  %866 = vst.msk [vmem:[#allocation2 + $0x70] sm:$0xff] %vm225_vm1, %v5455_v62  ;;  %v742_v16 = vadd.f32 1.0, %v4929_v9  ;;  %4948 = vpow2.f32 %v4194_v44  ;;  %v4196_v17 = vmul.f32 -1.442695, %v5458_v63  ;;  %v1172_v28 = vmax.f32 %v1092_v45, %v1132_v3 }
 0x10b   : > { %v4933_v21 = vpop.eup %4932  ;;  %865 = vst.msk [vmem:[#allocation2 + $0x68] sm:$0xff] %vm225_vm1, %v5463_v10  ;;  %v745_v47 = vadd.f32 1.0, %v4931_v15  ;;  %4950 = vpow2.f32 %v4193_v53  ;;  %v4195_v23 = vmul.f32 -1.442695, %v5466_v12  ;;  %v4576_v27 = vpop.f32.mrb[18].mxu0 }
 0x10c   : > { %v4935_v38 = vpop.eup %4934  ;;  %v5475_v42 = vmul.f32 %v4933_v21, %v5375_v57  ;;  %4952 = vrcp.f32 %v742_v16  ;;  %v5478_v43 = vadd.f32 %v4576_v27, %v5356_v37  ;;  %v569_v44 = vpop.f32.mrb[19].mxu0  ;;  %v5486_v50 = vmax.f32 %v1172_v28, %v1212_v18 }
 0x10d   : > { %v4937_v48 = vpop.eup %4936  ;;  %v5481_v41 = vmul.f32 %v4935_v38, %v5378_v61  ;;  %4954 = vrcp.f32 %v745_v47  ;;  %v5484_v49 = vadd.f32 %v5356_v37, %v569_v44  ;;  %v1020_v21 = vld [vmem:[#allocation2 + $0x50] sm:$0xff] }
 0x10e   : > { %v4939_v52 = vpop.eup %4938  ;;  %v900_v53 = vld [vmem:[#allocation2 + $0x4e] sm:$0xff]  ;;  %868 = vst.msk [vmem:[#allocation2 + $0x90] sm:$0xff] %vm225_vm1, %v5475_v42  ;;  %v744_v55 = vadd.f32 1.0, %v4937_v48  ;;  %4956 = vpow2.f32 %v4196_v17  ;;  %v4198_v56 = vmul.f32 -1.442695, %v5478_v43  ;;  %v899_v60 = vld [vmem:[#allocation2 + $0x46] sm:$0xff] }
 0x10f   : > { %v940_v57 = vld [vmem:[#allocation2 + $0x4f] sm:$0xff]  ;;  %v4941_v61 = vpop.eup %4940  ;;  %867 = vst.msk [vmem:[#allocation2 + $0x88] sm:$0xff] %vm225_vm1, %v5481_v41  ;;  %v747_v3 = vadd.f32 1.0, %v4939_v52  ;;  %4958 = vpow2.f32 %v4195_v23  ;;  %v4197_v5 = vmul.f32 -1.442695, %v5484_v49  ;;  %v4579_v7 = vpop.f32.mrb[20].mxu0  ;;  %v5512_v52 = vmax.f32 %v1173_v0, %v1213_v13 }
 0x110   : > { %v939_v9 = vld [vmem:[#allocation2 + $0x47] sm:$0xff]  ;;  %v980_v45 = vmax.f32 %v900_v53, %v940_v57  ;;  %v4943_v15 = vpop.eup %4942  ;;  %v5495_v16 = vmul.f32 %v4941_v61, %v5383_v8  ;;  %4960 = vrcp.f32 %v744_v55  ;;  %v5498_v17 = vadd.f32 %v4579_v7, %v5356_v37  ;;  %v579_v18 = vpop.f32.mrb[21].mxu0 }
 0x111   : > { %v979_v19 = vmax.f32 %v899_v60, %v939_v9  ;;  %4962 = vrcp.f32 %v747_v3  ;;  %v746_v47 = vadd.f32 1.0, %v4943_v15  ;;  %v5501_v23 = vadd.f32 %v5356_v37, %v579_v18  ;;  %v1019_v27 = vld [vmem:[#allocation2 + $0x48] sm:$0xff] }
 0x112   : > { %v5503_v28 = vmax.f32 %v980_v45, %v1020_v21  ;;  %v4945_v33 = vpop.eup %4944  ;;  %v5505_v38 = vld [vmem:[#allocation2 + $0x6e] sm:$0xff]  ;;  %870 = vst.msk [vmem:[#allocation2 + $0xb0] sm:$0xff] %vm225_vm1, %v5495_v16  ;;  %4964 = vpow2.f32 %v4198_v56  ;;  %v4200_v44 = vmul.f32 -1.442695, %v5498_v17  ;;  %v901_v46 = vld [vmem:[#allocation2 + $0x66] sm:$0xff] }
 0x113   : > { %v5507_v8 = vld [vmem:[#allocation2 + $0x6f] sm:$0xff]  ;;  %v1059_v48 = vmax.f32 %v979_v19, %v1019_v27  ;;  %v4947_v53 = vpop.eup %4946  ;;  %v5515_v57 = vmul.f32 %v4945_v33, %v5386_v11  ;;  %4966 = vrcp.f32 %v746_v47  ;;  %v4199_v55 = vmul.f32 -1.442695, %v5501_v23  ;;  %v4582_v60 = vpop.f32.mrb[22].mxu0  ;;  %v941_v61 = vld [vmem:[#allocation2 + $0x67] sm:$0xff] }
 0x114   : > { %v4949_v7 = vpop.eup %4948  ;;  %v5521_v56 = vmul.f32 %v4947_v53, %v5391_v26  ;;  %4968 = vpow2.f32 %v4197_v5  ;;  %v5524_v0 = vadd.f32 %v4582_v60, %v5356_v37  ;;  %v589_v9 = vpop.f32.mrb[23].mxu0  ;;  %v981_v45 = vmax.f32 %v901_v46, %v941_v61  ;;  %v1099_v11 = vld [vmem:[#allocation2 + $0x49] sm:$0xff] }
 0x115   : > { %v4951_v13 = vpop.eup %4950  ;;  %869 = vst.msk [vmem:[#allocation2 + $0xa8] sm:$0xff] %vm225_vm1, %v5515_v57  ;;  %v749_v15 = vadd.f32 1.0, %v4949_v7  ;;  %4970 = vpow2.f32 %v4200_v44  ;;  %v5529_v18 = vadd.f32 %v5356_v37, %v589_v9  ;;  %v1021_v19 = vld [vmem:[#allocation2 + $0x68] sm:$0xff]  ;;  %v1139_v21 = vmax.f32 %v1059_v48, %v1099_v11 }
 0x116   : > { %v4953_v26 = vpop.eup %4952  ;;  %872 = vst.msk [vmem:[#allocation2 + $0xd0] sm:$0xff] %vm225_vm1, %v5521_v56  ;;  %v748_v5 = vadd.f32 1.0, %v4951_v13  ;;  %4972 = vpow2.f32 %v4199_v55  ;;  %v4202_v47 = vmul.f32 -1.442695, %v5524_v0  ;;  %v903_v27 = vld [vmem:[#allocation2 + $0x86] sm:$0xff]  ;;  %v1061_v33 = vmax.f32 %v981_v45, %v1021_v19 }
 0x117   : > { %v1179_v46 = vld [vmem:[#allocation2 + $0x4a] sm:$0xff]  ;;  %v4955_v53 = vpop.eup %4954  ;;  %v5535_v60 = vmul.f32 %v4953_v26, %v5394_v29  ;;  %4974 = vrcp.f32 %v749_v15  ;;  %v4201_v44 = vmul.f32 -1.442695, %v5529_v18  ;;  %v4585_v61 = vpop.f32.mrb[24].mxu0 }
 0x118   : > { %v943_v48 = vld [vmem:[#allocation2 + $0x87] sm:$0xff]  ;;  %v5538_v7 = vmax.f32 %v1139_v21, %v1179_v46  ;;  %v4957_v9 = vpop.eup %4956  ;;  %v5541_v11 = vmul.f32 %v4955_v53, %v5399_v51  ;;  %4976 = vrcp.f32 %v748_v5  ;;  %v5544_v55 = vadd.f32 %v4585_v61, %v5356_v37  ;;  %v599_v45 = vpop.f32.mrb[25].mxu0 }
 0x119   : > { %v983_v13 = vmax.f32 %v903_v27, %v943_v48  ;;  %v1101_v19 = vld [vmem:[#allocation2 + $0x69] sm:$0xff]  ;;  %v4959_v29 = vpop.eup %4958  ;;  %871 = vst.msk [vmem:[#allocation2 + $0xc8] sm:$0xff] %vm225_vm1, %v5535_v60  ;;  %v751_v15 = vadd.f32 1.0, %v4957_v9  ;;  %4978 = vpow2.f32 %v4202_v47  ;;  %v5549_v21 = vadd.f32 %v5356_v37, %v599_v45 }
 0x11a   : > { %6865 = vst [vmem:[#allocation7_spill] sm:$0xff] %v5541_v11  ;;  %v1023_v26 = vld [vmem:[#allocation2 + $0x88] sm:$0xff]  ;;  %v1141_v46 = vmax.f32 %v1061_v33, %v1101_v19  ;;  %v4961_v51 = vpop.eup %4960  ;;  %874 = vst.msk [vmem:[#allocation2 + $0xf0] sm:$0xff] %vm225_vm1, %v5541_v11  ;;  %v750_v5 = vadd.f32 1.0, %v4959_v29  ;;  %4980 = vpow2.f32 %v4201_v44  ;;  %v4204_v27 = vmul.f32 -1.442695, %v5544_v55 }
 0x11b   : > { %v1063_v53 = vmax.f32 %v983_v13, %v1023_v26  ;;  %v1181_v61 = vld [vmem:[#allocation2 + $0x6a] sm:$0xff]  ;;  %v4963_v48 = vpop.eup %4962  ;;  %v5555_v58 = vmul.f32 %v4961_v51, %v5402_v54  ;;  %4982 = vrcp.f32 %v751_v15  ;;  %v4203_v47 = vmul.f32 -1.442695, %v5549_v21  ;;  %v4588_v9 = vpop.f32.mrb[26].mxu0 }
 0x11c   : > { %v1103_v45 = vld [vmem:[#allocation2 + $0x89] sm:$0xff]  ;;  %v5558_v33 = vmax.f32 %v1141_v46, %v1181_v61  ;;  %v4965_v19 = vpop.eup %4964  ;;  %v5561_v40 = vmul.f32 %v4963_v48, %v5411_v4  ;;  %4984 = vrcp.f32 %v750_v5  ;;  %v5564_v44 = vadd.f32 %v4588_v9, %v5356_v37  ;;  %v609_v13 = vpop.f32.mrb[27].mxu0 }
 0x11d   : > { %6866 = vst [vmem:[#allocation8_spill] sm:$0xff] %v5555_v58  ;;  %v1143_v29 = vmax.f32 %v1063_v53, %v1103_v45  ;;  %v4967_v26 = vpop.eup %4966  ;;  %v904_v54 = vld [vmem:[#allocation2 + $0x8e] sm:$0xff]  ;;  %873 = vst.msk [vmem:[#allocation2 + $0xe8] sm:$0xff] %vm225_vm1, %v5555_v58  ;;  %v753_v15 = vadd.f32 1.0, %v4965_v19  ;;  %4986 = vpow2.f32 %v4204_v27  ;;  %v5569_v46 = vadd.f32 %v5356_v37, %v609_v13 }
 0x11e   : > { %6867 = vst [vmem:[#allocation9_spill] sm:$0xff] %v5561_v40  ;;  %v944_v51 = vld [vmem:[#allocation2 + $0x8f] sm:$0xff]  ;;  %v1287_v4 = vmax.f32 %v5418_v14, %v5538_v7  ;;  %v4969_v5 = vpop.eup %4968  ;;  %876 = vst.msk [vmem:[#allocation2 + $0x110] sm:$0xff] %vm225_vm1, %v5561_v40  ;;  %v5576_v53 = vmul.f32 %v4967_v26, %v5414_v6  ;;  %4988 = vpow2.f32 %v4203_v47  ;;  %v4206_v48 = vmul.f32 -1.442695, %v5564_v44 }
 0x11f   : > { %v1183_v61 = vld [vmem:[#allocation2 + $0x8a] sm:$0xff]  ;;  %v4971_v27 = vpop.eup %4970  ;;  %4990 = vrcp.f32 %v753_v15  ;;  %v752_v45 = vadd.f32 1.0, %v4969_v5  ;;  %v4205_v19 = vmul.f32 -1.442695, %v5569_v46  ;;  %v4591_v13 = vpop.f32.mrb[28].mxu0 }
 0x120   : > { %6868 = vst [vmem:[#allocation10_spill] sm:$0xff] %v5576_v53  ;;  %v5579_v9 = vmax.f32 %v1143_v29, %v1183_v61  ;;  %v1319_v3 = vmax.f32 %v1287_v4, %v5558_v33  ;;  %v4973_v32 = vpop.eup %4972  ;;  %875 = vst.msk [vmem:[#allocation2 + $0x108] sm:$0xff] %vm225_vm1, %v5576_v53  ;;  %v755_v30 = vadd.f32 1.0, %v4971_v27  ;;  %4992 = vpow2.f32 %v4206_v48  ;;  %v619_v47 = vpop.f32.mrb[29].mxu0  ;;  %v1022_v4 = vld [vmem:[#allocation2 + $0x70] sm:$0xff] }
 0x121   : > { %v5586_v6 = vadd.f32 %v4591_v13, %v5356_v37  ;;  %v984_v29 = vmax.f32 %v904_v54, %v944_v51  ;;  %v4975_v26 = vpop.eup %4974  ;;  %4994 = vrcp.f32 %v752_v45  ;;  %v754_v15 = vadd.f32 1.0, %v4973_v32  ;;  %v1024_v27 = vld [vmem:[#allocation2 + $0x90] sm:$0xff] }
 0x122   : > { %v5589_v61 = vadd.f32 %v5356_v37, %v619_v47  ;;  %v1351_v5 = vmax.f32 %v1319_v3, %v5579_v9  ;;  %v4977_v31 = vpop.eup %4976  ;;  %v5593_v22 = vmul.f32 %v4975_v26, %v5430_v25  ;;  %4996 = vrcp.f32 %v755_v30  ;;  %v1100_v30 = vld [vmem:[#allocation2 + $0x51] sm:$0xff] }
 0x123   : > { %v4208_v48 = vmul.f32 -1.442695, %v5586_v6  ;;  %v6870_v54 = vmax.f32 %v5505_v38, %v5507_v8  ;;  %v4979_v45 = vpop.eup %4978  ;;  %v5600_v32 = vmul.f32 %v4977_v31, %v5442_v39  ;;  %4998 = vrcp.f32 %v754_v15  ;;  %v1102_v13 = vld [vmem:[#allocation2 + $0x71] sm:$0xff]  ;;  %v4594_v47 = vpop.f32.mrb[30].mxu0 }
 0x124   : > { %6869 = vst [vmem:[#allocation11_spill] sm:$0xff] %v5593_v22  ;;  %v4207_v3 = vmul.f32 -1.442695, %v5589_v61  ;;  %4597 = vmatprep.mubr.msk.f32.mxu0 %vm225_vm1, %v1351_v5  ;;  %2033 = vst.msk [vmem:[#allocation2 + $0x48] sm:$0xff] %vm225_vm1, %v1351_v5  ;;  %v1064_v25 = vmax.f32 %v984_v29, %v1024_v27  ;;  %v4981_v26 = vpop.eup %4980  ;;  %v757_v38 = vadd.f32 1.0, %v4979_v45  ;;  %5000 = vpow2.f32 %v4205_v19  ;;  %v1104_v8 = vld [vmem:[#allocation2 + $0x91] sm:$0xff] }
 0x125   : > { %v1062_v51 = vmax.f32 %v6870_v54, %v1022_v4  ;;  %6871 = vst [vmem:[#allocation12_spill] sm:$0xff] %v5600_v32  ;;  %878 = vst.msk [vmem:[#allocation2 + $0x130] sm:$0xff] %vm225_vm1, %v5593_v22  ;;  %v1140_v31 = vmax.f32 %v5503_v28, %v1100_v30  ;;  %v1180_v15 = vld [vmem:[#allocation2 + $0x52] sm:$0xff]  ;;  %v629_v4 = vpop.f32.mrb[31].mxu0  ;;  %v4983_v54 = vpop.eup %4982  ;;  %v756_v29 = vadd.f32 1.0, %v4981_v26  ;;  %5002 = vpow2.f32 %v4208_v48  ;;  %v905_v22 = vld [vmem:[#allocation2 + $0xa6] sm:$0xff] }
 0x126   : > { %877 = vst.msk [vmem:[#allocation2 + $0x128] sm:$0xff] %vm225_vm1, %v5600_v32  ;;  %v1144_v5 = vmax.f32 %v1064_v25, %v1104_v8  ;;  %v1182_v27 = vld [vmem:[#allocation2 + $0x72] sm:$0xff]  ;;  %v5611_v40 = vadd.f32 %v4594_v47, %v5356_v37  ;;  %v945_v45 = vld [vmem:[#allocation2 + $0xa7] sm:$0xff]  ;;  %v4985_v19 = vpop.eup %4984  ;;  %v5614_v53 = vmul.f32 %v4983_v54, %v5458_v63  ;;  %5004 = vrcp.f32 %v757_v38 }
 0x127   : > { %v1142_v39 = vmax.f32 %v1062_v51, %v1102_v13  ;;  %v1184_v28 = vld [vmem:[#allocation2 + $0x92] sm:$0xff]  ;;  %v5616_v51 = vmax.f32 %v1140_v31, %v1180_v15  ;;  %v4987_v13 = vpop.eup %4986  ;;  %5006 = vrcp.f32 %v756_v29  ;;  %v5624_v47 = vadd.f32 %v5356_v37, %v629_v4 }
 0x128   : > { %v5620_v48 = vmax.f32 %v1144_v5, %v1184_v28  ;;  %v4210_v25 = vmul.f32 -1.442695, %v5611_v40  ;;  %v4989_v26 = vpop.eup %4988  ;;  %880 = vst.msk [vmem:[#allocation2 + $0x150] sm:$0xff] %vm225_vm1, %v5614_v53  ;;  %v759_v63 = vadd.f32 1.0, %v4987_v13  ;;  %5008 = vpow2.f32 %v4207_v3  ;;  %v906_v31 = vld [vmem:[#allocation2 + $0xae] sm:$0xff] }
 0x129   : > { %v5618_v30 = vmax.f32 %v1142_v39, %v1182_v27  ;;  %v1288_v38 = vmax.f32 %v5422_v20, %v5616_v51  ;;  %v985_v8 = vmax.f32 %v905_v22, %v945_v45  ;;  %v946_v39 = vld [vmem:[#allocation2 + $0xaf] sm:$0xff]  ;;  %v4991_v15 = vpop.eup %4990  ;;  %v758_v54 = vadd.f32 1.0, %v4989_v26 }
 0x12a   : > { %5010 = vpow2.f32 %v4210_v25  ;;  %v4209_v29 = vmul.f32 -1.442695, %v5624_v47  ;;  %v1025_v5 = vld [vmem:[#allocation2 + $0xa8] sm:$0xff]  ;;  %v1257_v37 = vmax.f32 %v5405_v59, %v5538_v7  ;;  %v4993_v4 = vpop.eup %4992  ;;  %v5634_v27 = vmul.f32 %v4991_v15, %v5478_v43 }
 0x12b   : > { %5012 = vrcp.f32 %v759_v63  ;;  %v1320_v3 = vmax.f32 %v1288_v38, %v5618_v30  ;;  %v1065_v28 = vmax.f32 %v985_v8, %v1025_v5  ;;  %v4995_v22 = vpop.eup %4994  ;;  %v761_v45 = vadd.f32 1.0, %v4993_v4  ;;  %v1105_v13 = vld [vmem:[#allocation2 + $0xa9] sm:$0xff] }
 0x12c   : > { %5014 = vrcp.f32 %v758_v54  ;;  %v1289_v25 = vmax.f32 %v1257_v37, %v5558_v33  ;;  %v986_v26 = vmax.f32 %v906_v31, %v946_v39  ;;  %v4997_v32 = vpop.eup %4996  ;;  %882 = vst.msk [vmem:[#allocation2 + $0x170] sm:$0xff] %vm225_vm1, %v5634_v27  ;;  %v5641_v11 = vmul.f32 %v4995_v22, %v5484_v49  ;;  %v1026_v38 = vld [vmem:[#allocation2 + $0xb0] sm:$0xff]  ;;  %v907_v8 = vld [vmem:[#allocation2 + $0xc6] sm:$0xff] }
 0x12d   : > { %v1352_v43 = vmax.f32 %v1320_v3, %v5620_v48  ;;  %5016 = vpow2.f32 %v4209_v29  ;;  %v1145_v63 = vmax.f32 %v1065_v28, %v1105_v13  ;;  %v947_v15 = vld [vmem:[#allocation2 + $0xc7] sm:$0xff]  ;;  %v4999_v54 = vpop.eup %4998  ;;  %v5645_v5 = vmul.f32 %v4997_v32, %v5498_v17  ;;  %v948_v58 = vld [vmem:[#allocation2 + $0xcf] sm:$0xff] }
 0x12e   : > { %5018 = vrcp.f32 %v761_v45  ;;  %v1185_v31 = vld [vmem:[#allocation2 + $0xaa] sm:$0xff]  ;;  %v1321_v39 = vmax.f32 %v1289_v25, %v5579_v9  ;;  %v1066_v37 = vmax.f32 %v986_v26, %v1026_v38  ;;  %v5001_v49 = vpop.eup %5000  ;;  %881 = vst.msk [vmem:[#allocation2 + $0x168] sm:$0xff] %vm225_vm1, %v5641_v11  ;;  %v5651_v29 = vmul.f32 %v4999_v54, %v5501_v23 }
 0x12f   : > { %v908_v4 = vld [vmem:[#allocation2 + $0xce] sm:$0xff]  ;;  %4598 = vmatmul.mubr.msk.f32.vlgmr.msra.gmra.mrb[32].mxu0 %vm225_vm1, %v1352_v43  ;;  %2034 = vst.msk [vmem:[#allocation2 + $0x50] sm:$0xff] %vm225_vm1, %v1352_v43  ;;  %v5655_v17 = vmax.f32 %v1145_v63, %v1185_v31  ;;  %v1258_v3 = vmax.f32 %v5408_v2, %v5616_v51  ;;  %v846_v28 = vmul.f32 %v4985_v19, %v5466_v12  ;;  %v5003_v22 = vpop.eup %5002  ;;  %884 = vst.msk [vmem:[#allocation2 + $0x190] sm:$0xff] %vm225_vm1, %v5645_v5 }
 0x130   : > { %v1106_v32 = vld [vmem:[#allocation2 + $0xb1] sm:$0xff]  ;;  %v760_v45 = vadd.f32 1.0, %v5001_v49  ;;  %v987_v23 = vmax.f32 %v907_v8, %v947_v15  ;;  %v1259_v25 = vmax.f32 %v5538_v7, %v5558_v33  ;;  %4646 = vmatpush3.msk.msra.mxu0 %vm1480_vm2, %v5338_v35  ;;  %v5005_v26 = vpop.eup %5004  ;;  %883 = vst.msk [vmem:[#allocation2 + $0x188] sm:$0xff] %vm225_vm1, %v5651_v29  ;;  %v763_v43 = vadd.f32 1.0, %v5003_v22  ;;  %v1027_v38 = vld [vmem:[#allocation2 + $0xc8] sm:$0xff] }
 0x131   : > { %v1146_v13 = vmax.f32 %v1066_v37, %v1106_v32  ;;  %v1353_v12 = vmax.f32 %v1321_v39, %v5655_v17  ;;  %v1186_v19 = vld [vmem:[#allocation2 + $0xb2] sm:$0xff]  ;;  %v1290_v63 = vmax.f32 %v1258_v3, %v5618_v30  ;;  %879 = vst.msk [vmem:[#allocation2 + $0x148] sm:$0xff] %vm225_vm1, %v846_v28  ;;  %4671 = vmatprep.mubr.msk.f32.mxu1 %vm225_vm1, %v846_v28  ;;  %v5675_v35 = vld [vmem:[%s6848_s3 + $0xc] sm:$0xf]  ;;  %v5007_v7 = vpop.eup %5006 }
 0x132   : > { %v988_v8 = vmax.f32 %v908_v4, %v948_v58  ;;  %v5678_v15 = vmul.f32 %v5005_v26, %v5524_v0  ;;  %5020 = vrcp.f32 %v760_v45  ;;  %4672 = vmatmul.mubr.msk.f32.vlgmr.msra.gmra.mrb[0].mxu1 %vm225_vm1, %v5614_v53  ;;  %v1067_v31 = vmax.f32 %v987_v23, %v1027_v38  ;;  %v909_v39 = vld [vmem:[#allocation2 + $0xe6] sm:$0xff]  ;;  %v5009_v49 = vpop.eup %5008  ;;  %v1028_v32 = vld [vmem:[#allocation2 + $0xd0] sm:$0xff] }
 0x133   : > { %v5680_v54 = vmax.f32 %v1146_v13, %v1186_v19  ;;  %v949_v37 = vld [vmem:[#allocation2 + $0xe7] sm:$0xff]  ;;  %v5685_v58 = vmul.f32 %v5007_v7, %v5529_v18  ;;  %5022 = vrcp.f32 %v763_v43  ;;  %4600 = vmatprep.mubr.msk.f32.mxu0 %vm225_vm1, %v1353_v12  ;;  %2035 = vst.msk [vmem:[#allocation2 + $0x68] sm:$0xff] %vm225_vm1, %v1353_v12  ;;  %v1322_v0 = vmax.f32 %v1290_v63, %v5620_v48  ;;  %v1108_v43 = vld [vmem:[#allocation2 + $0xd1] sm:$0xff] }
 0x134   : > { %4696 = vmatpush3.msk.msra.mxu1 %vm1480_vm2, %v5349_v36  ;;  %v1107_v4 = vld [vmem:[#allocation2 + $0xc9] sm:$0xff]  ;;  %v1291_v53 = vmax.f32 %v1259_v25, %v5579_v9  ;;  %v5011_v3 = vpop.eup %5010  ;;  %886 = vst.msk [vmem:[#allocation2 + $0x1b0] sm:$0xff] %vm225_vm1, %v5678_v15  ;;  %v762_v18 = vadd.f32 1.0, %v5009_v49  ;;  %v1068_v22 = vmax.f32 %v988_v8, %v1028_v32  ;;  %v1260_v45 = vmax.f32 %v5616_v51, %v5618_v30 }
 0x135   : > { %v1147_v28 = vmax.f32 %v1067_v31, %v1107_v4  ;;  %4674 = vmatprep.mubr.msk.f32.mxu1 %vm225_vm1, %v5641_v11  ;;  %4745 = vmatprep.subr.msk.mxu1 %vm1480_vm2, %v5675_v35  ;;  %v5013_v36 = vpop.eup %5012  ;;  %885 = vst.msk [vmem:[#allocation2 + $0x1a8] sm:$0xff] %vm225_vm1, %v5685_v58  ;;  %v765_v13 = vadd.f32 1.0, %v5011_v3  ;;  %v1354_v23 = vmax.f32 %v1322_v0, %v5680_v54  ;;  %v1187_v25 = vld [vmem:[#allocation2 + $0xca] sm:$0xff] }
 0x136   : > { %v1323_v26 = vmax.f32 %v1291_v53, %v5655_v17  ;;  %v989_v12 = vmax.f32 %v909_v39, %v949_v37  ;;  %v5015_v19 = vpop.eup %5014  ;;  %v5706_v51 = vmul.f32 %v5013_v36, %v5544_v55  ;;  %5024 = vrcp.f32 %v762_v18  ;;  %4675 = vmatmul.mubr.msk.f32.gmra.mrb[2].mxu1 %vm225_vm1, %v5634_v27  ;;  %v1029_v38 = vld [vmem:[#allocation2 + $0xe8] sm:$0xff]  ;;  %v1188_v55 = vld [vmem:[#allocation2 + $0xd2] sm:$0xff] }
 0x137   : > { %v5708_v11 = vmax.f32 %v1147_v28, %v1187_v25  ;;  %v1148_v63 = vmax.f32 %v1068_v22, %v1108_v43  ;;  %v910_v8 = vld [vmem:[#allocation2 + $0xee] sm:$0xff]  ;;  %v5017_v31 = vpop.eup %5016  ;;  %v5713_v49 = vmul.f32 %v5015_v19, %v5549_v21  ;;  %5026 = vrcp.f32 %v765_v13  ;;  %4601 = vmatmul.mubr.msk.f32.gmra.mrb[34].mxu0 %vm225_vm1, %v1354_v23  ;;  %2036 = vst.msk [vmem:[#allocation2 + $0x70] sm:$0xff] %vm225_vm1, %v1354_v23  ;;  %v911_v27 = vld [vmem:[#allocation2 + $0x106] sm:$0xff] }
 0x138   : > { %v950_v7 = vld [vmem:[#allocation2 + $0xef] sm:$0xff]  ;;  %v1292_v39 = vmax.f32 %v1260_v45, %v5620_v48  ;;  %v1069_v37 = vmax.f32 %v989_v12, %v1029_v38  ;;  %4677 = vmatprep.mubr.msk.f32.mxu1 %vm225_vm1, %v5651_v29  ;;  %v951_v0 = vld [vmem:[#allocation2 + $0x107] sm:$0xff]  ;;  %v5019_v4 = vpop.eup %5018  ;;  %888 = vst.msk [vmem:[#allocation2 + $0x1d0] sm:$0xff] %vm225_vm1, %v5706_v51  ;;  %v764_v21 = vadd.f32 1.0, %v5017_v31  ;;  %v1261_v18 = vmax.f32 %v5558_v33, %v5579_v9 }
 0x139   : > { %v1355_v53 = vmax.f32 %v1323_v26, %v5708_v11  ;;  %v5723_v32 = vmax.f32 %v1148_v63, %v1188_v55  ;;  %v1109_v3 = vld [vmem:[#allocation2 + $0xe9] sm:$0xff]  ;;  %887 = vst.msk [vmem:[#allocation2 + $0x1c8] sm:$0xff] %vm225_vm1, %v5713_v49  ;;  %v5730_v29 = vmul.f32 %v5019_v4, %v5564_v44  ;;  %v990_v45 = vmax.f32 %v910_v8, %v950_v7 }
 0x13a   : > { %v1324_v28 = vmax.f32 %v1292_v39, %v5680_v54  ;;  %v1149_v22 = vmax.f32 %v1069_v37, %v1109_v3  ;;  %v912_v36 = vld [vmem:[#allocation2 + $0x10e] sm:$0xff]  ;;  %5028 = vrcp.f32 %v764_v21  ;;  %v1293_v33 = vmax.f32 %v1261_v18, %v5655_v17  ;;  %4678 = vmatmul.mubr.msk.f32.gmra.mrb[4].mxu1 %vm225_vm1, %v5645_v5  ;;  %v913_v37 = vld [vmem:[#allocation2 + $0x126] sm:$0xff] }
 0x13b   : > { %v952_v13 = vld [vmem:[#allocation2 + $0x10f] sm:$0xff]  ;;  %4603 = vmatprep.mubr.msk.f32.mxu0 %vm225_vm1, %v1355_v53  ;;  %2037 = vst.msk [vmem:[#allocation2 + $0x88] sm:$0xff] %vm225_vm1, %v1355_v53  ;;  %v1262_v26 = vmax.f32 %v5618_v30, %v5620_v48  ;;  %v991_v44 = vmax.f32 %v911_v27, %v951_v0  ;;  %890 = vst.msk [vmem:[#allocation2 + $0x1f0] sm:$0xff] %vm225_vm1, %v5730_v29  ;;  %v1263_v38 = vmax.f32 %v5579_v9, %v5655_v17  ;;  %v953_v21 = vld [vmem:[#allocation2 + $0x127] sm:$0xff] }
 0x13c   : > { %v1189_v23 = vld [vmem:[#allocation2 + $0xea] sm:$0xff]  ;;  %v1356_v43 = vmax.f32 %v1324_v28, %v5723_v32  ;;  %4680 = vmatprep.mubr.msk.f32.mxu1 %vm225_vm1, %v5685_v58  ;;  %v5021_v30 = vpop.eup %5020  ;;  %v1325_v8 = vmax.f32 %v1293_v33, %v5708_v11  ;;  %v992_v39 = vmax.f32 %v912_v36, %v952_v13  ;;  %v1264_v4 = vmax.f32 %v5620_v48, %v5680_v54 }
 0x13d   : > { %v1030_v25 = vld [vmem:[#allocation2 + $0xf0] sm:$0xff]  ;;  %v5743_v12 = vmax.f32 %v1149_v22, %v1189_v23  ;;  %v1031_v63 = vld [vmem:[#allocation2 + $0x108] sm:$0xff]  ;;  %v1294_v7 = vmax.f32 %v1262_v26, %v5680_v54  ;;  %v5023_v27 = vpop.eup %5022  ;;  %v5752_v0 = vmul.f32 %v5021_v30, %v5569_v46  ;;  %v1295_v58 = vmax.f32 %v1263_v38, %v5708_v11 }
 0x13e   : > { %v1070_v19 = vmax.f32 %v990_v45, %v1030_v25  ;;  %v1110_v5 = vld [vmem:[#allocation2 + $0xf1] sm:$0xff]  ;;  %v1071_v31 = vmax.f32 %v991_v44, %v1031_v63  ;;  %v1111_v55 = vld [vmem:[#allocation2 + $0x109] sm:$0xff]  ;;  %4604 = vmatmul.mubr.msk.f32.gmra.mrb[36].mxu0 %vm225_vm1, %v1356_v43  ;;  %2038 = vst.msk [vmem:[#allocation2 + $0x90] sm:$0xff] %vm225_vm1, %v1356_v43  ;;  %v5760_v18 = vmul.f32 %v5023_v27, %v5586_v6 }
 0x13f   : > { %v914_v53 = vld [vmem:[#allocation2 + $0x12e] sm:$0xff]  ;;  %v1357_v28 = vmax.f32 %v1325_v8, %v5743_v12  ;;  %v1326_v22 = vmax.f32 %v1294_v7, %v5723_v32  ;;  %4681 = vmatmul.mubr.msk.f32.gmra.mrb[6].mxu1 %vm225_vm1, %v5678_v15  ;;  %889 = vst.msk [vmem:[#allocation2 + $0x1e8] sm:$0xff] %vm225_vm1, %v5752_v0  ;;  %v1327_v23 = vmax.f32 %v1295_v58, %v5743_v12  ;;  %v915_v63 = vld [vmem:[#allocation2 + $0x146] sm:$0xff] }
 0x140   : > { %v1150_v9 = vmax.f32 %v1070_v19, %v1110_v5  ;;  %v954_v3 = vld [vmem:[#allocation2 + $0x12f] sm:$0xff]  ;;  %v1151_v45 = vmax.f32 %v1071_v31, %v1111_v55  ;;  %v1296_v33 = vmax.f32 %v1264_v4, %v5723_v32  ;;  %4683 = vmatprep.mubr.msk.f32.mxu1 %vm225_vm1, %v5713_v49  ;;  %v5025_v25 = vpop.eup %5024  ;;  %892 = vst.msk [vmem:[#allocation2 + $0x210] sm:$0xff] %vm225_vm1, %v5760_v18  ;;  %v955_v38 = vld [vmem:[#allocation2 + $0x147] sm:$0xff] }
 0x141   : > { %v1190_v46 = vld [vmem:[#allocation2 + $0xf2] sm:$0xff]  ;;  %v1191_v13 = vld [vmem:[#allocation2 + $0x10a] sm:$0xff]  ;;  %4606 = vmatprep.mubr.msk.f32.mxu0 %vm225_vm1, %v1357_v28  ;;  %2039 = vst.msk [vmem:[#allocation2 + $0xa8] sm:$0xff] %vm225_vm1, %v1357_v28  ;;  %v993_v44 = vmax.f32 %v913_v37, %v953_v21  ;;  %v1265_v43 = vmax.f32 %v5655_v17, %v5708_v11  ;;  %v994_v19 = vmax.f32 %v914_v53, %v954_v3  ;;  %v5027_v30 = vpop.eup %5026 }
 0x142   : > { %v1032_v36 = vld [vmem:[#allocation2 + $0x110] sm:$0xff]  ;;  %v5768_v48 = vmax.f32 %v1150_v9, %v1190_v46  ;;  %v5778_v15 = vmax.f32 %v1151_v45, %v1191_v13  ;;  %v5783_v49 = vmul.f32 %v5025_v25, %v5589_v61  ;;  %v1033_v31 = vld [vmem:[#allocation2 + $0x128] sm:$0xff]  ;;  %v5788_v37 = vmul.f32 %v5027_v30, %v5611_v40 }
 0x143   : > { %v1072_v6 = vmax.f32 %v992_v39, %v1032_v36  ;;  %v1112_v26 = vld [vmem:[#allocation2 + $0x111] sm:$0xff]  ;;  %v1073_v9 = vmax.f32 %v993_v44, %v1033_v31  ;;  %v1297_v58 = vmax.f32 %v1265_v43, %v5743_v12  ;;  %4684 = vmatmul.mubr.msk.f32.gmra.mrb[8].mxu1 %vm225_vm1, %v5706_v51  ;;  %v1113_v40 = vld [vmem:[#allocation2 + $0x129] sm:$0xff]  ;;  %v1266_v53 = vmax.f32 %v5680_v54, %v5723_v32 }
 0x144   : > { %v1358_v8 = vmax.f32 %v1326_v22, %v5768_v48  ;;  %v1328_v7 = vmax.f32 %v1296_v33, %v5768_v48  ;;  %v916_v55 = vld [vmem:[#allocation2 + $0x14e] sm:$0xff]  ;;  %v1359_v17 = vmax.f32 %v1327_v23, %v5778_v15  ;;  %891 = vst.msk [vmem:[#allocation2 + $0x208] sm:$0xff] %vm225_vm1, %v5783_v49  ;;  %v995_v3 = vmax.f32 %v915_v63, %v955_v38  ;;  %v5029_v28 = vpop.eup %5028  ;;  %v917_v13 = vld [vmem:[#allocation2 + $0x166] sm:$0xff] }
 0x145   : > { %v1152_v5 = vmax.f32 %v1072_v6, %v1112_v26  ;;  %v956_v39 = vld [vmem:[#allocation2 + $0x14f] sm:$0xff]  ;;  %894 = vst.msk [vmem:[#allocation2 + $0x230] sm:$0xff] %vm225_vm1, %v5788_v37  ;;  %v1153_v51 = vmax.f32 %v1073_v9, %v1113_v40  ;;  %v1329_v46 = vmax.f32 %v1297_v58, %v5778_v15  ;;  %v1267_v45 = vmax.f32 %v5708_v11, %v5743_v12  ;;  %v957_v23 = vld [vmem:[#allocation2 + $0x167] sm:$0xff] }
 0x146   : > { %v1192_v27 = vld [vmem:[#allocation2 + $0x112] sm:$0xff]  ;;  %4607 = vmatmul.mubr.msk.f32.gmra.mrb[38].mxu0 %vm225_vm1, %v1358_v8  ;;  %2040 = vst.msk [vmem:[#allocation2 + $0xb0] sm:$0xff] %vm225_vm1, %v1358_v8  ;;  %2041 = vst.msk [vmem:[#allocation2 + $0xc8] sm:$0xff] %vm225_vm1, %v1359_v17  ;;  %v996_v36 = vmax.f32 %v916_v55, %v956_v39  ;;  %v860_v54 = vmul.f32 %v5029_v28, %v5624_v47  ;;  %v1193_v33 = vld [vmem:[#allocation2 + $0x12a] sm:$0xff]  ;;  %v1298_v26 = vmax.f32 %v1266_v53, %v5768_v48 }
 0x147   : > { %v1034_v4 = vld [vmem:[#allocation2 + $0x130] sm:$0xff]  ;;  %v5798_v61 = vmax.f32 %v1152_v5, %v1192_v27  ;;  %4609 = vmatprep.mubr.msk.f32.mxu0 %vm225_vm1, %v1359_v17  ;;  %v1035_v44 = vld [vmem:[#allocation2 + $0x148] sm:$0xff]  ;;  %4686 = vmatprep.mubr.msk.f32.mxu1 %vm225_vm1, %v5752_v0  ;;  %v1299_v38 = vmax.f32 %v1267_v45, %v5778_v15  ;;  %v997_v31 = vmax.f32 %v917_v13, %v957_v23 }
 0x148   : > { %v1074_v21 = vmax.f32 %v994_v19, %v1034_v4  ;;  %v1114_v22 = vld [vmem:[#allocation2 + $0x131] sm:$0xff]  ;;  %v5814_v19 = vmax.f32 %v1153_v51, %v1193_v33  ;;  %v1075_v11 = vmax.f32 %v995_v3, %v1035_v44  ;;  %4687 = vmatmul.mubr.msk.f32.gmra.mrb[10].mxu1 %vm225_vm1, %v5730_v29  ;;  %893 = vst.msk [vmem:[#allocation2 + $0x228] sm:$0xff] %vm225_vm1, %v860_v54  ;;  %v1115_v5 = vld [vmem:[#allocation2 + $0x149] sm:$0xff] }
 0x149   : > { %v1360_v6 = vmax.f32 %v1328_v7, %v5798_v61  ;;  %v1036_v43 = vld [vmem:[#allocation2 + $0x150] sm:$0xff]  ;;  %v1330_v0 = vmax.f32 %v1298_v26, %v5798_v61  ;;  %v1268_v7 = vmax.f32 %v5723_v32, %v5768_v48  ;;  %v1037_v4 = vld [vmem:[#allocation2 + $0x168] sm:$0xff]  ;;  %4689 = vmatprep.mubr.msk.f32.mxu1 %vm225_vm1, %v5783_v49  ;;  %v1269_v3 = vmax.f32 %v5743_v12, %v5778_v15 }
 0x14a   : > { %v1154_v25 = vmax.f32 %v1074_v21, %v1114_v22  ;;  %v1194_v63 = vld [vmem:[#allocation2 + $0x132] sm:$0xff]  ;;  %v1076_v30 = vmax.f32 %v996_v36, %v1036_v43  ;;  %v1361_v17 = vmax.f32 %v1329_v46, %v5814_v19  ;;  %v1155_v29 = vmax.f32 %v1075_v11, %v1115_v5  ;;  %v1195_v21 = vld [vmem:[#allocation2 + $0x14a] sm:$0xff] }
 0x14b   : > { %v1116_v8 = vld [vmem:[#allocation2 + $0x151] sm:$0xff]  ;;  %4610 = vmatmul.mubr.msk.f32.gmra.mrb[40].mxu0 %vm225_vm1, %v1360_v6  ;;  %2042 = vst.msk [vmem:[#allocation2 + $0xd0] sm:$0xff] %vm225_vm1, %v1360_v6  ;;  %v1331_v27 = vmax.f32 %v1299_v38, %v5814_v19  ;;  %v1300_v53 = vmax.f32 %v1268_v7, %v5798_v61  ;;  %v1077_v32 = vmax.f32 %v997_v31, %v1037_v4  ;;  %v919_v28 = vld [vmem:[#allocation2 + $0x186] sm:$0xff] }
 0x14c   : > { %v5822_v47 = vmax.f32 %v1154_v25, %v1194_v63  ;;  %v918_v55 = vld [vmem:[#allocation2 + $0x16e] sm:$0xff]  ;;  %v1156_v9 = vmax.f32 %v1076_v30, %v1116_v8  ;;  %4612 = vmatprep.mubr.msk.f32.mxu0 %vm225_vm1, %v1361_v17  ;;  %2043 = vst.msk [vmem:[#allocation2 + $0xe8] sm:$0xff] %vm225_vm1, %v1361_v17  ;;  %v5837_v46 = vmax.f32 %v1155_v29, %v1195_v21  ;;  %v5852_v38 = vld [vmem:[#allocation2 + $0x46] sm:$0xff] }
 0x14d   : > { %v958_v39 = vld [vmem:[#allocation2 + $0x16f] sm:$0xff]  ;;  %v959_v51 = vld [vmem:[#allocation2 + $0x187] sm:$0xff]  ;;  %v1270_v36 = vmax.f32 %v5768_v48, %v5798_v61  ;;  %v1301_v23 = vmax.f32 %v1269_v3, %v5814_v19  ;;  %4690 = vmatmul.mubr.msk.f32.gmra.mrb[12].mxu1 %vm225_vm1, %v5760_v18  ;;  %v1271_v5 = vmax.f32 %v5778_v15, %v5814_v19 }
 0x14e   : > { %v1196_v58 = vld [vmem:[#allocation2 + $0x152] sm:$0xff]  ;;  %v1362_v40 = vmax.f32 %v1330_v0, %v5822_v47  ;;  %v1117_v49 = vld [vmem:[#allocation2 + $0x169] sm:$0xff]  ;;  %v998_v45 = vmax.f32 %v918_v55, %v958_v39  ;;  %v1332_v12 = vmax.f32 %v1300_v53, %v5822_v47  ;;  %v1363_v26 = vmax.f32 %v1331_v27, %v5837_v46  ;;  %4692 = vmatprep.mubr.msk.f32.mxu1 %vm225_vm1, %v860_v54 }
 0x14f   : > { %v5839_v22 = vmax.f32 %v1156_v9, %v1196_v58  ;;  %v1157_v13 = vmax.f32 %v1077_v32, %v1117_v49  ;;  %v1038_v6 = vld [vmem:[#allocation2 + $0x170] sm:$0xff]  ;;  %v1302_v63 = vmax.f32 %v1270_v36, %v5822_v47  ;;  %v999_v11 = vmax.f32 %v919_v28, %v959_v51  ;;  %v1039_v0 = vld [vmem:[#allocation2 + $0x188] sm:$0xff] }
 0x150   : > { %4613 = vmatmul.mubr.msk.f32.gmra.mrb[42].mxu0 %vm225_vm1, %v1362_v40  ;;  %2044 = vst.msk [vmem:[#allocation2 + $0xf0] sm:$0xff] %vm225_vm1, %v1362_v40  ;;  %v920_v33 = vld [vmem:[#allocation2 + $0x18e] sm:$0xff]  ;;  %v1078_v43 = vmax.f32 %v998_v45, %v1038_v6  ;;  %v1333_v18 = vmax.f32 %v1301_v23, %v5837_v46  ;;  %v921_v7 = vld [vmem:[#allocation2 + $0x1a6] sm:$0xff]  ;;  %2045 = vst.msk [vmem:[#allocation2 + $0x108] sm:$0xff] %vm225_vm1, %v1363_v26  ;;  %v1303_v4 = vmax.f32 %v1271_v5, %v5837_v46 }
 0x151   : > { %v960_v25 = vld [vmem:[#allocation2 + $0x18f] sm:$0xff]  ;;  %v1364_v30 = vmax.f32 %v1332_v12, %v5839_v22  ;;  %v961_v31 = vld [vmem:[#allocation2 + $0x1a7] sm:$0xff]  ;;  %4615 = vmatprep.mubr.msk.f32.mxu0 %vm225_vm1, %v1363_v26  ;;  %v1334_v39 = vmax.f32 %v1302_v63, %v5839_v22  ;;  %v1079_v17 = vmax.f32 %v999_v11, %v1039_v0  ;;  %v1272_v21 = vmax.f32 %v5798_v61, %v5822_v47 }
 0x152   : > { %v1197_v44 = vld [vmem:[#allocation2 + $0x16a] sm:$0xff]  ;;  %v1198_v54 = vld [vmem:[#allocation2 + $0x172] sm:$0xff]  ;;  %v1000_v27 = vmax.f32 %v920_v33, %v960_v25  ;;  %4693 = vmatmul.mubr.msk.f32.gmra.mrb[14].mxu1 %vm225_vm1, %v5788_v37  ;;  %v1001_v51 = vmax.f32 %v921_v7, %v961_v31  ;;  %v1273_v6 = vmax.f32 %v5814_v19, %v5837_v46 }
 0x153   : > { %v1118_v48 = vld [vmem:[#allocation2 + $0x171] sm:$0xff]  ;;  %v5855_v8 = vmax.f32 %v1157_v13, %v1197_v44  ;;  %v1119_v29 = vld [vmem:[#allocation2 + $0x189] sm:$0xff]  ;;  %2046 = vst.msk [vmem:[#allocation2 + $0x110] sm:$0xff] %vm225_vm1, %v1364_v30  ;;  %v1304_v23 = vmax.f32 %v1272_v21, %v5839_v22 }
 0x154   : > { %v1158_v55 = vmax.f32 %v1078_v43, %v1118_v48  ;;  %v2109_v9 = vld [vmem:[#allocation2 + $0x47] sm:$0xff]  ;;  %4616 = vmatmul.mubr.msk.f32.gmra.mrb[44].mxu0 %vm225_vm1, %v1364_v30  ;;  %v1040_v40 = vld [vmem:[#allocation2 + $0x190] sm:$0xff]  ;;  %v1159_v3 = vmax.f32 %v1079_v17, %v1119_v29 }
 0x155   : > { %v1365_v15 = vmax.f32 %v1333_v18, %v5855_v8  ;;  %v1199_v58 = vld [vmem:[#allocation2 + $0x18a] sm:$0xff]  ;;  %v1080_v28 = vmax.f32 %v1000_v27, %v1040_v40  ;;  %v1335_v12 = vmax.f32 %v1303_v4, %v5855_v8  ;;  %v1200_v61 = vld [vmem:[#allocation2 + $0x192] sm:$0xff]  ;;  %v2149_v33 = vmax.f32 %v5852_v38, %v2109_v9 }
 0x156   : > { %v2071_v53 = vld [vmem:[#allocation2 + $0x66] sm:$0xff]  ;;  %v5871_v32 = vmax.f32 %v1158_v55, %v1198_v54  ;;  %v1120_v13 = vld [vmem:[#allocation2 + $0x191] sm:$0xff]  ;;  %v5881_v44 = vmax.f32 %v1159_v3, %v1199_v58  ;;  %v1305_v5 = vmax.f32 %v1273_v6, %v5855_v8 }
 0x157   : > { %v2073_v49 = vld [vmem:[#allocation2 + $0x86] sm:$0xff]  ;;  %4618 = vmatprep.mubr.msk.f32.mxu0 %vm225_vm1, %v1365_v15  ;;  %2047 = vst.msk [vmem:[#allocation2 + $0x128] sm:$0xff] %vm225_vm1, %v1365_v15  ;;  %v1160_v43 = vmax.f32 %v1080_v28, %v1120_v13  ;;  %v922_v11 = vld [vmem:[#allocation2 + $0x1ae] sm:$0xff]  ;;  %v1274_v13 = vmax.f32 %v5822_v47, %v5839_v22 }
 0x158   : > { %v2111_v45 = vld [vmem:[#allocation2 + $0x67] sm:$0xff]  ;;  %v1366_v26 = vmax.f32 %v1334_v39, %v5871_v32  ;;  %v962_v30 = vld [vmem:[#allocation2 + $0x1af] sm:$0xff]  ;;  %v1336_v18 = vmax.f32 %v1304_v23, %v5871_v32  ;;  %v1367_v54 = vmax.f32 %v1335_v12, %v5881_v44  ;;  %v1337_v58 = vmax.f32 %v1305_v5, %v5881_v44 }
 0x159   : > { %v2113_v36 = vld [vmem:[#allocation2 + $0x87] sm:$0xff]  ;;  %v2151_v7 = vmax.f32 %v2071_v53, %v2111_v45  ;;  %v5888_v39 = vmax.f32 %v1160_v43, %v1200_v61  ;;  %v2110_v15 = vld [vmem:[#allocation2 + $0x4f] sm:$0xff]  ;;  %v1002_v53 = vmax.f32 %v922_v11, %v962_v30  ;;  %v1306_v30 = vmax.f32 %v1274_v13, %v5871_v32 }
 0x15a   : > { %v1041_v37 = vld [vmem:[#allocation2 + $0x1a8] sm:$0xff]  ;;  %v2153_v31 = vmax.f32 %v2073_v49, %v2113_v36  ;;  %4619 = vmatmul.mubr.msk.f32.gmra.mrb[46].mxu0 %vm225_vm1, %v1366_v26  ;;  %2048 = vst.msk [vmem:[#allocation2 + $0x130] sm:$0xff] %vm225_vm1, %v1366_v26  ;;  %v1042_v3 = vld [vmem:[#allocation2 + $0x1b0] sm:$0xff]  ;;  %2049 = vst.msk [vmem:[#allocation2 + $0x148] sm:$0xff] %vm225_vm1, %v1367_v54 }
 0x15b   : > { %v2189_v25 = vld [vmem:[#allocation2 + $0x48] sm:$0xff]  ;;  %v1081_v48 = vmax.f32 %v1001_v51, %v1041_v37  ;;  %4621 = vmatprep.mubr.msk.f32.mxu0 %vm225_vm1, %v1367_v54  ;;  %v1368_v49 = vmax.f32 %v1336_v18, %v5888_v39  ;;  %v1082_v26 = vmax.f32 %v1002_v53, %v1042_v3  ;;  %v1122_v43 = vld [vmem:[#allocation2 + $0x1b1] sm:$0xff] }
 0x15c   : > { %v1121_v63 = vld [vmem:[#allocation2 + $0x1a9] sm:$0xff]  ;;  %v2229_v29 = vmax.f32 %v2149_v33, %v2189_v25  ;;  %v2272_v3 = vld [vmem:[#allocation2 + $0x71] sm:$0xff] }
 0x15d   : > { %v1201_v0 = vld [vmem:[#allocation2 + $0x1aa] sm:$0xff]  ;;  %v1161_v17 = vmax.f32 %v1081_v48, %v1121_v63  ;;  %2050 = vst.msk [vmem:[#allocation2 + $0x150] sm:$0xff] %vm225_vm1, %v1368_v49 }
 0x15e   : > { %v2191_v19 = vld [vmem:[#allocation2 + $0x68] sm:$0xff]  ;;  %4622 = vmatmul.mubr.msk.f32.gmra.mrb[48].mxu0 %vm225_vm1, %v1368_v49  ;;  %v2190_v18 = vld [vmem:[#allocation2 + $0x50] sm:$0xff] }
 0x15f   : > { %v2193_v55 = vld [vmem:[#allocation2 + $0x88] sm:$0xff]  ;;  %v2231_v4 = vmax.f32 %v2151_v7, %v2191_v19  ;;  %v5894_v45 = vmax.f32 %v1161_v17, %v1201_v0  ;;  %v1162_v19 = vmax.f32 %v1082_v26, %v1122_v43 }
 0x160   : > { %v2269_v38 = vld [vmem:[#allocation2 + $0x49] sm:$0xff]  ;;  %v2233_v40 = vmax.f32 %v2153_v31, %v2193_v55 }
 0x161   : > { %v2271_v27 = vld [vmem:[#allocation2 + $0x69] sm:$0xff]  ;;  %v2309_v12 = vmax.f32 %v2229_v29, %v2269_v38  ;;  %v1369_v63 = vmax.f32 %v1337_v58, %v5894_v45 }
 0x162   : > { %v2070_v9 = vld [vmem:[#allocation2 + $0x4e] sm:$0xff]  ;;  %v2311_v37 = vmax.f32 %v2231_v4, %v2271_v27  ;;  %v923_v0 = vld [vmem:[#allocation2 + $0x1c6] sm:$0xff] }
 0x163   : > { %v2349_v21 = vld [vmem:[#allocation2 + $0x4a] sm:$0xff]  ;;  %v2150_v48 = vmax.f32 %v2070_v9, %v2110_v15  ;;  %4624 = vmatprep.mubr.msk.f32.mxu0 %vm225_vm1, %v1369_v63  ;;  %2051 = vst.msk [vmem:[#allocation2 + $0x168] sm:$0xff] %vm225_vm1, %v1369_v63  ;;  %v1202_v27 = vld [vmem:[#allocation2 + $0x1b2] sm:$0xff]  ;;  %v1338_v9 = vmax.f32 %v1306_v30, %v5888_v39 }
 0x164   : > { %v2072_v28 = vld [vmem:[#allocation2 + $0x6e] sm:$0xff]  ;;  %v5901_v11 = vmax.f32 %v2309_v12, %v2349_v21  ;;  %v2075_v54 = vld [vmem:[#allocation2 + $0xa6] sm:$0xff]  ;;  %v5913_v21 = vmax.f32 %v1162_v19, %v1202_v27 }
 0x165   : > { %v2112_v51 = vld [vmem:[#allocation2 + $0x6f] sm:$0xff]  ;;  %v963_v5 = vld [vmem:[#allocation2 + $0x1c7] sm:$0xff]  ;;  %v2230_v58 = vmax.f32 %v2150_v48, %v2190_v18 }
 0x166   : > { %v2273_v36 = vld [vmem:[#allocation2 + $0x89] sm:$0xff]  ;;  %v2152_v47 = vmax.f32 %v2072_v28, %v2112_v51  ;;  %v2457_v29 = vmax.f32 %v5418_v14, %v5901_v11  ;;  %v2274_v28 = vld [vmem:[#allocation2 + $0x91] sm:$0xff]  ;;  %v1003_v49 = vmax.f32 %v923_v0, %v963_v5  ;;  %v2427_v27 = vmax.f32 %v5405_v59, %v5901_v11 }
 0x167   : > { %v2074_v61 = vld [vmem:[#allocation2 + $0x8e] sm:$0xff]  ;;  %v2313_v6 = vmax.f32 %v2233_v40, %v2273_v36  ;;  %v1275_v36 = vmax.f32 %v5837_v46, %v5855_v8 }
 0x168   : > { %v2114_v23 = vld [vmem:[#allocation2 + $0x8f] sm:$0xff]  ;;  %v2115_v17 = vld [vmem:[#allocation2 + $0xa7] sm:$0xff] }
 0x169   : > { %v2351_v33 = vld [vmem:[#allocation2 + $0x6a] sm:$0xff]  ;;  %v2154_v55 = vmax.f32 %v2074_v61, %v2114_v23  ;;  %v2350_v51 = vld [vmem:[#allocation2 + $0x52] sm:$0xff]  ;;  %v1307_v43 = vmax.f32 %v1275_v36, %v5881_v44 }
 0x16a   : > { %v2353_v25 = vld [vmem:[#allocation2 + $0x8a] sm:$0xff]  ;;  %v5904_v7 = vmax.f32 %v2311_v37, %v2351_v33  ;;  %v2352_v61 = vld [vmem:[#allocation2 + $0x72] sm:$0xff]  ;;  %v1370_v33 = vmax.f32 %v1338_v9, %v5913_v21 }
 0x16b   : > { %v5906_v31 = vmax.f32 %v2313_v6, %v2353_v25  ;;  %v2192_v38 = vld [vmem:[#allocation2 + $0x70] sm:$0xff]  ;;  %v1043_v37 = vld [vmem:[#allocation2 + $0x1c8] sm:$0xff]  ;;  %v2155_v6 = vmax.f32 %v2075_v54, %v2115_v17  ;;  %v1339_v17 = vmax.f32 %v1307_v43, %v5894_v45 }
 0x16c   : > { %v2194_v15 = vld [vmem:[#allocation2 + $0x90] sm:$0xff]  ;;  %v2232_v4 = vmax.f32 %v2152_v47, %v2192_v38  ;;  %v2489_v12 = vmax.f32 %v2457_v29, %v5904_v7  ;;  %v1083_v26 = vmax.f32 %v1003_v49, %v1043_v37  ;;  %v2195_v48 = vld [vmem:[#allocation2 + $0xa8] sm:$0xff]  ;;  %4625 = vmatmul.mubr.msk.f32.gmra.mrb[50].mxu0 %vm225_vm1, %v1370_v33  ;;  %2052 = vst.msk [vmem:[#allocation2 + $0x170] sm:$0xff] %vm225_vm1, %v1370_v33 }
 0x16d   : > { %v2270_v40 = vld [vmem:[#allocation2 + $0x51] sm:$0xff]  ;;  %v2234_v53 = vmax.f32 %v2154_v55, %v2194_v15  ;;  %v1123_v0 = vld [vmem:[#allocation2 + $0x1c9] sm:$0xff]  ;;  %v2235_v5 = vmax.f32 %v2155_v6, %v2195_v48 }
 0x16e   : > { %v2310_v14 = vmax.f32 %v2230_v58, %v2270_v40  ;;  %v2312_v13 = vmax.f32 %v2232_v4, %v2272_v3  ;;  %v2354_v23 = vld [vmem:[#allocation2 + $0x92] sm:$0xff]  ;;  %v2521_v47 = vmax.f32 %v2489_v12, %v5906_v31  ;;  %v1163_v54 = vmax.f32 %v1083_v26, %v1123_v0  ;;  %v2275_v29 = vld [vmem:[#allocation2 + $0xa9] sm:$0xff] }
 0x16f   : > { %v2314_v25 = vmax.f32 %v2234_v53, %v2274_v28  ;;  %v924_v63 = vld [vmem:[#allocation2 + $0x1ce] sm:$0xff]  ;;  %v2315_v58 = vmax.f32 %v2235_v5, %v2275_v29  ;;  %v1276_v53 = vmax.f32 %v5839_v22, %v5871_v32  ;;  %v2459_v28 = vmax.f32 %v2427_v27, %v5904_v7  ;;  %v925_v36 = vld [vmem:[#allocation2 + $0x1e6] sm:$0xff] }
 0x170   : > { %v964_v30 = vld [vmem:[#allocation2 + $0x1cf] sm:$0xff]  ;;  %v5921_v46 = vmax.f32 %v2310_v14, %v2350_v51  ;;  %v5923_v18 = vmax.f32 %v2312_v13, %v2352_v61  ;;  %4697 = vmatprep.mubr.msk.f32.mxu1 %vm225_vm1, %v2521_v47  ;;  %2910 = vst.msk [vmem:[#allocation2 + $0x48] sm:$0xff] %vm225_vm1, %v2521_v47  ;;  %v2077_v26 = vld [vmem:[#allocation2 + $0xc6] sm:$0xff]  ;;  %v1277_v27 = vmax.f32 %v5855_v8, %v5881_v44 }
 0x171   : > { %v2076_v19 = vld [vmem:[#allocation2 + $0xae] sm:$0xff]  ;;  %v5927_v38 = vmax.f32 %v2314_v25, %v2354_v23  ;;  %v1004_v40 = vmax.f32 %v924_v63, %v964_v30  ;;  %v1308_v61 = vmax.f32 %v1276_v53, %v5888_v39  ;;  %v2491_v37 = vmax.f32 %v2459_v28, %v5906_v31 }
 0x172   : > { %v2116_v55 = vld [vmem:[#allocation2 + $0xaf] sm:$0xff]  ;;  %v2458_v9 = vmax.f32 %v5422_v20, %v5921_v46  ;;  %v2428_v49 = vmax.f32 %v5408_v2, %v5921_v46  ;;  %v965_v20 = vld [vmem:[#allocation2 + $0x1e7] sm:$0xff]  ;;  %v2429_v53 = vmax.f32 %v5901_v11, %v5904_v7  ;;  %v1309_v28 = vmax.f32 %v1277_v27, %v5894_v45 }
 0x173   : > { %v1203_v15 = vld [vmem:[#allocation2 + $0x1ca] sm:$0xff]  ;;  %v2156_v59 = vmax.f32 %v2076_v19, %v2116_v55  ;;  %v1340_v63 = vmax.f32 %v1308_v61, %v5913_v21  ;;  %v1005_v47 = vmax.f32 %v925_v36, %v965_v20  ;;  %v1204_v55 = vld [vmem:[#allocation2 + $0x1d2] sm:$0xff] }
 0x174   : > { %v2355_v4 = vld [vmem:[#allocation2 + $0xaa] sm:$0xff]  ;;  %v5938_v3 = vmax.f32 %v1163_v54, %v1203_v15  ;;  %v2490_v12 = vmax.f32 %v2458_v9, %v5923_v18  ;;  %v2460_v25 = vmax.f32 %v2428_v49, %v5923_v18  ;;  %v2356_v15 = vld [vmem:[#allocation2 + $0xb2] sm:$0xff]  ;;  %v2461_v11 = vmax.f32 %v2429_v53, %v5906_v31 }
 0x175   : > { %v1044_v51 = vld [vmem:[#allocation2 + $0x1d0] sm:$0xff]  ;;  %v5944_v14 = vmax.f32 %v2315_v58, %v2355_v4  ;;  %v2117_v2 = vld [vmem:[#allocation2 + $0xc7] sm:$0xff] }
 0x176   : > { %v1084_v13 = vmax.f32 %v1004_v40, %v1044_v51  ;;  %v2196_v23 = vld [vmem:[#allocation2 + $0xb0] sm:$0xff]  ;;  %v1371_v22 = vmax.f32 %v1339_v17, %v5938_v3  ;;  %v2522_v43 = vmax.f32 %v2490_v12, %v5927_v38  ;;  %v2492_v17 = vmax.f32 %v2460_v25, %v5927_v38  ;;  %v1045_v29 = vld [vmem:[#allocation2 + $0x1e8] sm:$0xff] }
 0x177   : > { %v1124_v6 = vld [vmem:[#allocation2 + $0x1d1] sm:$0xff]  ;;  %v2236_v33 = vmax.f32 %v2156_v59, %v2196_v23  ;;  %v2523_v19 = vmax.f32 %v2491_v37, %v5944_v14  ;;  %v1085_v58 = vmax.f32 %v1005_v47, %v1045_v29  ;;  %v1125_v4 = vld [vmem:[#allocation2 + $0x1e9] sm:$0xff]  ;;  %v2157_v40 = vmax.f32 %v2077_v26, %v2117_v2 }
 0x178   : > { %v1164_v48 = vmax.f32 %v1084_v13, %v1124_v6  ;;  %v2276_v30 = vld [vmem:[#allocation2 + $0xb1] sm:$0xff]  ;;  %4627 = vmatprep.mubr.msk.f32.mxu0 %vm225_vm1, %v1371_v22  ;;  %2053 = vst.msk [vmem:[#allocation2 + $0x188] sm:$0xff] %vm225_vm1, %v1371_v22  ;;  %4698 = vmatmul.mubr.msk.f32.vlgmr.msra.gmra.mrb[16].mxu1 %vm225_vm1, %v2522_v43  ;;  %2911 = vst.msk [vmem:[#allocation2 + $0x50] sm:$0xff] %vm225_vm1, %v2522_v43  ;;  %v2197_v51 = vld [vmem:[#allocation2 + $0xc8] sm:$0xff]  ;;  %v1341_v6 = vmax.f32 %v1309_v28, %v5938_v3 }
 0x179   : > { %v926_v0 = vld [vmem:[#allocation2 + $0x1ee] sm:$0xff]  ;;  %v2316_v54 = vmax.f32 %v2236_v33, %v2276_v30  ;;  %4746 = vmatpush3.msk.msra.mxu1 %vm1480_vm2, %v5675_v35  ;;  %4700 = vmatprep.mubr.msk.f32.mxu1 %vm225_vm1, %v2523_v19  ;;  %2912 = vst.msk [vmem:[#allocation2 + $0x68] sm:$0xff] %vm225_vm1, %v2523_v19  ;;  %v1165_v12 = vmax.f32 %v1085_v58, %v1125_v4  ;;  %v927_v35 = vld [vmem:[#allocation2 + $0x206] sm:$0xff] }
 0x17a   : > { %v966_v5 = vld [vmem:[#allocation2 + $0x1ef] sm:$0xff]  ;;  %v5960_v9 = vmax.f32 %v1164_v48, %v1204_v55  ;;  %v2237_v13 = vmax.f32 %v2157_v40, %v2197_v51  ;;  %v967_v23 = vld [vmem:[#allocation2 + $0x207] sm:$0xff]  ;;  %v1278_v26 = vmax.f32 %v5871_v32, %v5888_v39  ;;  %v2430_v19 = vmax.f32 %v5921_v46, %v5923_v18 }
 0x17b   : > { %v5968_v8 = vmax.f32 %v2316_v54, %v2356_v15  ;;  %v1006_v59 = vmax.f32 %v926_v0, %v966_v5  ;;  %v2078_v49 = vld [vmem:[#allocation2 + $0xce] sm:$0xff]  ;;  %v1007_v55 = vmax.f32 %v927_v35, %v967_v23  ;;  %v2079_v54 = vld [vmem:[#allocation2 + $0xe6] sm:$0xff]  ;;  %v1279_v40 = vmax.f32 %v5881_v44, %v5894_v45 }
 0x17c   : > { %v2118_v36 = vld [vmem:[#allocation2 + $0xcf] sm:$0xff]  ;;  %v1372_v20 = vmax.f32 %v1340_v63, %v5960_v9  ;;  %v2493_v63 = vmax.f32 %v2461_v11, %v5944_v14  ;;  %v1310_v5 = vmax.f32 %v1278_v26, %v5913_v21  ;;  %v2462_v46 = vmax.f32 %v2430_v19, %v5927_v38 }
 0x17d   : > { %v1046_v61 = vld [vmem:[#allocation2 + $0x1f0] sm:$0xff]  ;;  %v2524_v22 = vmax.f32 %v2492_v17, %v5968_v8  ;;  %v2158_v47 = vmax.f32 %v2078_v49, %v2118_v36  ;;  %v2119_v17 = vld [vmem:[#allocation2 + $0xe7] sm:$0xff]  ;;  %v1311_v44 = vmax.f32 %v1279_v40, %v5938_v3 }
 0x17e   : > { %v1205_v37 = vld [vmem:[#allocation2 + $0x1ea] sm:$0xff]  ;;  %v1086_v25 = vmax.f32 %v1006_v59, %v1046_v61  ;;  %4628 = vmatmul.mubr.msk.f32.gmra.mrb[52].mxu0 %vm225_vm1, %v1372_v20  ;;  %2054 = vst.msk [vmem:[#allocation2 + $0x190] sm:$0xff] %vm225_vm1, %v1372_v20  ;;  %v1206_v15 = vld [vmem:[#allocation2 + $0x1f2] sm:$0xff]  ;;  %v1342_v28 = vmax.f32 %v1310_v5, %v5960_v9  ;;  %v2159_v11 = vmax.f32 %v2079_v54, %v2119_v17 }
 0x17f   : > { %v2277_v33 = vld [vmem:[#allocation2 + $0xc9] sm:$0xff]  ;;  %v5979_v2 = vmax.f32 %v1165_v12, %v1205_v37  ;;  %v1126_v30 = vld [vmem:[#allocation2 + $0x1f1] sm:$0xff]  ;;  %4701 = vmatmul.mubr.msk.f32.gmra.mrb[18].mxu1 %vm225_vm1, %v2524_v22  ;;  %2913 = vst.msk [vmem:[#allocation2 + $0x70] sm:$0xff] %vm225_vm1, %v2524_v22  ;;  %v2494_v37 = vmax.f32 %v2462_v46, %v5968_v8 }
 0x180   : > { %v2317_v43 = vmax.f32 %v2237_v13, %v2277_v33  ;;  %v2357_v48 = vld [vmem:[#allocation2 + $0xca] sm:$0xff]  ;;  %v1166_v0 = vmax.f32 %v1086_v25, %v1126_v30  ;;  %v2358_v22 = vld [vmem:[#allocation2 + $0xd2] sm:$0xff]  ;;  %v2431_v25 = vmax.f32 %v5904_v7, %v5906_v31 }
 0x181   : > { %v2198_v32 = vld [vmem:[#allocation2 + $0xd0] sm:$0xff]  ;;  %v1373_v29 = vmax.f32 %v1341_v6, %v5979_v2  ;;  %v1047_v4 = vld [vmem:[#allocation2 + $0x208] sm:$0xff] }
 0x182   : > { %v5988_v27 = vmax.f32 %v2317_v43, %v2357_v48  ;;  %v2238_v58 = vmax.f32 %v2158_v47, %v2198_v32  ;;  %v5992_v53 = vmax.f32 %v1166_v0, %v1206_v15  ;;  %v2278_v51 = vld [vmem:[#allocation2 + $0xd1] sm:$0xff]  ;;  %v1087_v59 = vmax.f32 %v1007_v55, %v1047_v4  ;;  %v1127_v13 = vld [vmem:[#allocation2 + $0x209] sm:$0xff] }
 0x183   : > { %v928_v49 = vld [vmem:[#allocation2 + $0x20e] sm:$0xff]  ;;  %4630 = vmatprep.mubr.msk.f32.mxu0 %vm225_vm1, %v1373_v29  ;;  %2055 = vst.msk [vmem:[#allocation2 + $0x1a8] sm:$0xff] %vm225_vm1, %v1373_v29  ;;  %v1343_v48 = vmax.f32 %v1311_v44, %v5979_v2  ;;  %v2463_v7 = vmax.f32 %v2431_v25, %v5944_v14  ;;  %v1280_v32 = vmax.f32 %v5888_v39, %v5913_v21  ;;  %v929_v55 = vld [vmem:[#allocation2 + $0x226] sm:$0xff] }
 0x184   : > { %v968_v36 = vld [vmem:[#allocation2 + $0x20f] sm:$0xff]  ;;  %v2525_v20 = vmax.f32 %v2493_v63, %v5988_v27  ;;  %v2318_v12 = vmax.f32 %v2238_v58, %v2278_v51  ;;  %v1374_v23 = vmax.f32 %v1342_v28, %v5992_v53  ;;  %v1167_v6 = vmax.f32 %v1087_v59, %v1127_v13  ;;  %v969_v54 = vld [vmem:[#allocation2 + $0x227] sm:$0xff] }
 0x185   : > { %v2080_v61 = vld [vmem:[#allocation2 + $0xee] sm:$0xff]  ;;  %v1008_v47 = vmax.f32 %v928_v49, %v968_v36  ;;  %v2432_v4 = vmax.f32 %v5923_v18, %v5927_v38  ;;  %v2081_v40 = vld [vmem:[#allocation2 + $0x106] sm:$0xff]  ;;  %v2495_v59 = vmax.f32 %v2463_v7, %v5988_v27  ;;  %v1312_v39 = vmax.f32 %v1280_v32, %v5960_v9 }
 0x186   : > { %v2120_v35 = vld [vmem:[#allocation2 + $0xef] sm:$0xff]  ;;  %4703 = vmatprep.mubr.msk.f32.mxu1 %vm225_vm1, %v2525_v20  ;;  %2914 = vst.msk [vmem:[#allocation2 + $0x88] sm:$0xff] %vm225_vm1, %v2525_v20  ;;  %v6006_v26 = vmax.f32 %v2318_v12, %v2358_v22  ;;  %4631 = vmatmul.mubr.msk.f32.gmra.mrb[54].mxu0 %vm225_vm1, %v1374_v23  ;;  %2056 = vst.msk [vmem:[#allocation2 + $0x1b0] sm:$0xff] %vm225_vm1, %v1374_v23  ;;  %v2121_v28 = vld [vmem:[#allocation2 + $0x107] sm:$0xff]  ;;  %v1281_v22 = vmax.f32 %v5894_v45, %v5938_v3 }
 0x187   : > { %v2199_v33 = vld [vmem:[#allocation2 + $0xe8] sm:$0xff]  ;;  %v1048_v5 = vld [vmem:[#allocation2 + $0x210] sm:$0xff]  ;;  %v2160_v19 = vmax.f32 %v2080_v61, %v2120_v35  ;;  %v2464_v44 = vmax.f32 %v2432_v4, %v5968_v8  ;;  %v1344_v61 = vmax.f32 %v1312_v39, %v5992_v53  ;;  %v2433_v45 = vmax.f32 %v5906_v31, %v5944_v14 }
 0x188   : > { %v1207_v43 = vld [vmem:[#allocation2 + $0x20a] sm:$0xff]  ;;  %v2239_v63 = vmax.f32 %v2159_v11, %v2199_v33  ;;  %v2526_v17 = vmax.f32 %v2494_v37, %v6006_v26  ;;  %v1088_v15 = vmax.f32 %v1008_v47, %v1048_v5  ;;  %v1208_v13 = vld [vmem:[#allocation2 + $0x212] sm:$0xff]  ;;  %v1009_v11 = vmax.f32 %v929_v55, %v969_v54 }
 0x189   : > { %v2279_v30 = vld [vmem:[#allocation2 + $0xe9] sm:$0xff]  ;;  %v6011_v0 = vmax.f32 %v1167_v6, %v1207_v43  ;;  %v1128_v49 = vld [vmem:[#allocation2 + $0x211] sm:$0xff]  ;;  %v2161_v37 = vmax.f32 %v2081_v40, %v2121_v28  ;;  %v1313_v32 = vmax.f32 %v1281_v22, %v5979_v2 }
 0x18a   : > { %v2319_v29 = vmax.f32 %v2239_v63, %v2279_v30  ;;  %v2200_v58 = vld [vmem:[#allocation2 + $0xf0] sm:$0xff]  ;;  %4704 = vmatmul.mubr.msk.f32.gmra.mrb[20].mxu1 %vm225_vm1, %v2526_v17  ;;  %2915 = vst.msk [vmem:[#allocation2 + $0x90] sm:$0xff] %vm225_vm1, %v2526_v17  ;;  %v1168_v12 = vmax.f32 %v1088_v15, %v1128_v49  ;;  %v1049_v23 = vld [vmem:[#allocation2 + $0x228] sm:$0xff]  ;;  %v2496_v63 = vmax.f32 %v2464_v44, %v6006_v26 }
 0x18b   : > { %v1375_v51 = vmax.f32 %v1343_v48, %v6011_v0  ;;  %v2359_v46 = vld [vmem:[#allocation2 + $0xea] sm:$0xff]  ;;  %v2240_v36 = vmax.f32 %v2160_v19, %v2200_v58  ;;  %v2360_v48 = vld [vmem:[#allocation2 + $0xf2] sm:$0xff]  ;;  %v1089_v30 = vmax.f32 %v1009_v11, %v1049_v23  ;;  %v1282_v15 = vmax.f32 %v5913_v21, %v5960_v9 }
 0x18c   : > { %v6024_v20 = vmax.f32 %v2319_v29, %v2359_v46  ;;  %v2280_v18 = vld [vmem:[#allocation2 + $0xf1] sm:$0xff]  ;;  %v6033_v43 = vmax.f32 %v1168_v12, %v1208_v13  ;;  %v2201_v47 = vld [vmem:[#allocation2 + $0x108] sm:$0xff]  ;;  %v2465_v46 = vmax.f32 %v2433_v45, %v5988_v27  ;;  %v1283_v12 = vmax.f32 %v5938_v3, %v5979_v2 }
 0x18d   : > { %4633 = vmatprep.mubr.msk.f32.mxu0 %vm225_vm1, %v1375_v51  ;;  %2057 = vst.msk [vmem:[#allocation2 + $0x1c8] sm:$0xff] %vm225_vm1, %v1375_v51  ;;  %v2320_v35 = vmax.f32 %v2240_v36, %v2280_v18  ;;  %v930_v6 = vld [vmem:[#allocation2 + $0x22e] sm:$0xff]  ;;  %v2241_v19 = vmax.f32 %v2161_v37, %v2201_v47  ;;  %v1345_v51 = vmax.f32 %v1313_v32, %v6011_v0  ;;  %v2083_v13 = vld [vmem:[#allocation2 + $0x126] sm:$0xff] }
 0x18e   : > { %v970_v33 = vld [vmem:[#allocation2 + $0x22f] sm:$0xff]  ;;  %v2527_v25 = vmax.f32 %v2495_v59, %v6024_v20  ;;  %v1376_v55 = vmax.f32 %v1344_v61, %v6033_v43  ;;  %v1314_v21 = vmax.f32 %v1282_v15, %v5992_v53  ;;  %v2123_v18 = vld [vmem:[#allocation2 + $0x127] sm:$0xff]  ;;  %v2497_v11 = vmax.f32 %v2465_v46, %v6024_v20 }
 0x18f   : > { %v6036_v7 = vmax.f32 %v2320_v35, %v2360_v48  ;;  %v1129_v5 = vld [vmem:[#allocation2 + $0x229] sm:$0xff]  ;;  %v1010_v29 = vmax.f32 %v930_v6, %v970_v33  ;;  %v1130_v61 = vld [vmem:[#allocation2 + $0x231] sm:$0xff]  ;;  %v2434_v23 = vmax.f32 %v5927_v38, %v5968_v8  ;;  %v1315_v3 = vmax.f32 %v1283_v12, %v6011_v0 }
 0x190   : > { %4706 = vmatprep.mubr.msk.f32.mxu1 %vm225_vm1, %v2527_v25  ;;  %2916 = vst.msk [vmem:[#allocation2 + $0xa8] sm:$0xff] %vm225_vm1, %v2527_v25  ;;  %v1169_v54 = vmax.f32 %v1089_v30, %v1129_v5  ;;  %v2281_v17 = vld [vmem:[#allocation2 + $0x109] sm:$0xff]  ;;  %4634 = vmatmul.mubr.msk.f32.gmra.mrb[56].mxu0 %vm225_vm1, %v1376_v55  ;;  %2058 = vst.msk [vmem:[#allocation2 + $0x1d0] sm:$0xff] %vm225_vm1, %v1376_v55  ;;  %v1346_v6 = vmax.f32 %v1314_v21, %v6033_v43  ;;  %v1210_v48 = vld [vmem:[#allocation2 + $0x232] sm:$0xff] }
 0x191   : > { %v2082_v58 = vld [vmem:[#allocation2 + $0x10e] sm:$0xff]  ;;  %v2528_v40 = vmax.f32 %v2496_v63, %v6036_v7  ;;  %v2321_v31 = vmax.f32 %v2241_v19, %v2281_v17  ;;  %v2466_v47 = vmax.f32 %v2434_v23, %v6006_v26  ;;  %v2163_v5 = vmax.f32 %v2083_v13, %v2123_v18 }
 0x192   : > { %v2122_v4 = vld [vmem:[#allocation2 + $0x10f] sm:$0xff]  ;;  %v2435_v45 = vmax.f32 %v5944_v14, %v5988_v27  ;;  %v1284_v55 = vmax.f32 %v5960_v9, %v5992_v53 }
 0x193   : > { %v1209_v28 = vld [vmem:[#allocation2 + $0x22a] sm:$0xff]  ;;  %4707 = vmatmul.mubr.msk.f32.gmra.mrb[22].mxu1 %vm225_vm1, %v2528_v40  ;;  %2917 = vst.msk [vmem:[#allocation2 + $0xb0] sm:$0xff] %vm225_vm1, %v2528_v40  ;;  %v2162_v35 = vmax.f32 %v2082_v58, %v2122_v4  ;;  %v2498_v15 = vmax.f32 %v2466_v47, %v6036_v7  ;;  %v1285_v4 = vmax.f32 %v5979_v2, %v6011_v0  ;;  %v2362_v9 = vld [vmem:[#allocation2 + $0x112] sm:$0xff] }
 0x194   : > { %v1050_v59 = vld [vmem:[#allocation2 + $0x230] sm:$0xff]  ;;  %v1249_v49 = vmax.f32 %v1169_v54, %v1209_v28  ;;  %v2203_v19 = vld [vmem:[#allocation2 + $0x128] sm:$0xff]  ;;  %v2467_v46 = vmax.f32 %v2435_v45, %v6024_v20 }
 0x195   : > { %v2361_v39 = vld [vmem:[#allocation2 + $0x10a] sm:$0xff]  ;;  %v1090_v36 = vmax.f32 %v1010_v29, %v1050_v59  ;;  %v2243_v58 = vmax.f32 %v2163_v5, %v2203_v19  ;;  %v1316_v59 = vmax.f32 %v1284_v55, %v6033_v43 }
 0x196   : > { %v6056_v44 = vmax.f32 %v2321_v31, %v2361_v39  ;;  %v1377_v22 = vmax.f32 %v1345_v51, %v1249_v49  ;;  %v2202_v33 = vld [vmem:[#allocation2 + $0x110] sm:$0xff]  ;;  %v1347_v32 = vmax.f32 %v1315_v3, %v1249_v49  ;;  %v2085_v40 = vld [vmem:[#allocation2 + $0x146] sm:$0xff]  ;;  %v1317_v21 = vmax.f32 %v1285_v4, %v1249_v49 }
 0x197   : > { %v1170_v37 = vmax.f32 %v1090_v36, %v1130_v61  ;;  %v2242_v63 = vmax.f32 %v2162_v35, %v2202_v33  ;;  %v2282_v30 = vld [vmem:[#allocation2 + $0x111] sm:$0xff]  ;;  %v2125_v28 = vld [vmem:[#allocation2 + $0x147] sm:$0xff]  ;;  %v2436_v61 = vmax.f32 %v5968_v8, %v6006_v26  ;;  %v2437_v8 = vmax.f32 %v5988_v27, %v6024_v20 }
 0x198   : > { %v2529_v25 = vmax.f32 %v2497_v11, %v6056_v44  ;;  %4636 = vmatprep.mubr.msk.f32.mxu0 %vm225_vm1, %v1377_v22  ;;  %2059 = vst.msk [vmem:[#allocation2 + $0x1e8] sm:$0xff] %vm225_vm1, %v1377_v22  ;;  %v2084_v54 = vld [vmem:[#allocation2 + $0x12e] sm:$0xff]  ;;  %v1379_v51 = vmax.f32 %v1347_v32, %v5460_v1  ;;  %v2499_v0 = vmax.f32 %v2467_v46, %v6056_v44 }
 0x199   : > { %v6067_v38 = vmax.f32 %v1170_v37, %v1210_v48  ;;  %v2124_v17 = vld [vmem:[#allocation2 + $0x12f] sm:$0xff]  ;;  %v2322_v29 = vmax.f32 %v2242_v63, %v2282_v30  ;;  %v2165_v35 = vmax.f32 %v2085_v40, %v2125_v28  ;;  %v1349_v37 = vmax.f32 %v1317_v21, %v5460_v1  ;;  %v2087_v40 = vld [vmem:[#allocation2 + $0x166] sm:$0xff] }
 0x19a   : > { %4709 = vmatprep.mubr.msk.f32.mxu1 %vm225_vm1, %v2529_v25  ;;  %2918 = vst.msk [vmem:[#allocation2 + $0xc8] sm:$0xff] %vm225_vm1, %v2529_v25  ;;  %v2283_v31 = vld [vmem:[#allocation2 + $0x129] sm:$0xff]  ;;  %v2164_v12 = vmax.f32 %v2084_v54, %v2124_v17  ;;  %2061 = vst.msk [vmem:[#allocation2 + $0x208] sm:$0xff] %vm225_vm1, %v1379_v51  ;;  %v2284_v48 = vld [vmem:[#allocation2 + $0x131] sm:$0xff]  ;;  %v2468_v63 = vmax.f32 %v2436_v61, %v6036_v7  ;;  %v1286_v4 = vmax.f32 %v5992_v53, %v6033_v43 }
 0x19b   : > { %v1378_v14 = vmax.f32 %v1346_v6, %v6067_v38  ;;  %v6082_v39 = vmax.f32 %v2322_v29, %v2362_v9  ;;  %v2323_v36 = vmax.f32 %v2243_v58, %v2283_v31  ;;  %v934_v13 = vld [vmem:[#allocation2 + $0x26e] sm:$0xff]  ;;  %v1348_v18 = vmax.f32 %v1316_v59, %v6067_v38  ;;  %v2089_v61 = vld [vmem:[#allocation2 + $0x186] sm:$0xff] }
 0x19c   : > { %v2363_v2 = vld [vmem:[#allocation2 + $0x12a] sm:$0xff]  ;;  %v1381_v19 = vmax.f32 %v1349_v37, %v5512_v52  ;;  %v2364_v29 = vld [vmem:[#allocation2 + $0x132] sm:$0xff]  ;;  %v2469_v58 = vmax.f32 %v2437_v8, %v6056_v44  ;;  %v1318_v43 = vmax.f32 %v1286_v4, %v6067_v38  ;;  %v2438_v21 = vmax.f32 %v6006_v26, %v6036_v7 }
 0x19d   : > { %4637 = vmatmul.mubr.msk.f32.gmra.mrb[58].mxu0 %vm225_vm1, %v1378_v14  ;;  %2060 = vst.msk [vmem:[#allocation2 + $0x1f0] sm:$0xff] %vm225_vm1, %v1378_v14  ;;  %v2204_v11 = vld [vmem:[#allocation2 + $0x130] sm:$0xff]  ;;  %v2530_v49 = vmax.f32 %v2498_v15, %v6082_v39  ;;  %v6093_v22 = vmax.f32 %v2323_v36, %v2363_v2  ;;  %v2205_v3 = vld [vmem:[#allocation2 + $0x148] sm:$0xff]  ;;  %v1380_v25 = vmax.f32 %v1348_v18, %v5486_v50 }
 0x19e   : > { %v974_v23 = vld [vmem:[#allocation2 + $0x26f] sm:$0xff]  ;;  %4639 = vmatprep.mubr.msk.f32.mxu0 %vm225_vm1, %v1379_v51  ;;  %v2244_v6 = vmax.f32 %v2164_v12, %v2204_v11  ;;  %v2245_v30 = vmax.f32 %v2165_v35, %v2205_v3  ;;  %v2500_v27 = vmax.f32 %v2468_v63, %v6082_v39  ;;  %v2127_v28 = vld [vmem:[#allocation2 + $0x167] sm:$0xff]  ;;  %2063 = vst.msk [vmem:[#allocation2 + $0x228] sm:$0xff] %vm225_vm1, %v1381_v19 }
 0x19f   : > { %v1054_v33 = vld [vmem:[#allocation2 + $0x270] sm:$0xff]  ;;  %4710 = vmatmul.mubr.msk.f32.gmra.mrb[24].mxu1 %vm225_vm1, %v2530_v49  ;;  %2919 = vst.msk [vmem:[#allocation2 + $0xd0] sm:$0xff] %vm225_vm1, %v2530_v49  ;;  %v2531_v32 = vmax.f32 %v2499_v0, %v6093_v22  ;;  %v1014_v54 = vmax.f32 %v934_v13, %v974_v23  ;;  %2062 = vst.msk [vmem:[#allocation2 + $0x210] sm:$0xff] %vm225_vm1, %v1380_v25  ;;  %v2501_v53 = vmax.f32 %v2469_v58, %v6093_v22  ;;  %v2129_v35 = vld [vmem:[#allocation2 + $0x187] sm:$0xff] }
 0x1a0   : > { %v2086_v47 = vld [vmem:[#allocation2 + $0x14e] sm:$0xff]  ;;  %v2324_v45 = vmax.f32 %v2244_v6, %v2284_v48  ;;  %v2167_v11 = vmax.f32 %v2087_v40, %v2127_v28  ;;  %v1350_v49 = vmax.f32 %v1318_v43, %v5486_v50  ;;  %v2470_v38 = vmax.f32 %v2438_v21, %v6082_v39 }
 0x1a1   : > { %v2126_v5 = vld [vmem:[#allocation2 + $0x14f] sm:$0xff]  ;;  %4640 = vmatmul.mubr.msk.f32.gmra.mrb[60].mxu0 %vm225_vm1, %v1380_v25  ;;  %4712 = vmatprep.mubr.msk.f32.mxu1 %vm225_vm1, %v2531_v32  ;;  %2920 = vst.msk [vmem:[#allocation2 + $0xe8] sm:$0xff] %vm225_vm1, %v2531_v32  ;;  %v1094_v9 = vmax.f32 %v1014_v54, %v1054_v33  ;;  %v2439_v26 = vmax.f32 %v6024_v20, %v6056_v44 }
 0x1a2   : > { %v2285_v55 = vld [vmem:[#allocation2 + $0x149] sm:$0xff]  ;;  %v1134_v17 = vld [vmem:[#allocation2 + $0x271] sm:$0xff]  ;;  %4642 = vmatprep.mubr.msk.f32.mxu0 %vm225_vm1, %v1381_v19  ;;  %v6114_v14 = vmax.f32 %v2324_v45, %v2364_v29  ;;  %v2166_v46 = vmax.f32 %v2086_v47, %v2126_v5  ;;  %v2440_v5 = vmax.f32 %v6036_v7, %v6082_v39  ;;  %v2169_v32 = vmax.f32 %v2089_v61, %v2129_v35 }
 0x1a3   : > { %v2325_v15 = vmax.f32 %v2245_v30, %v2285_v55  ;;  %v2365_v51 = vld [vmem:[#allocation2 + $0x14a] sm:$0xff]  ;;  %v1214_v31 = vld [vmem:[#allocation2 + $0x272] sm:$0xff]  ;;  %v1174_v0 = vmax.f32 %v1094_v9, %v1134_v17  ;;  %v2471_v47 = vmax.f32 %v2439_v26, %v6093_v22  ;;  %v2441_v7 = vmax.f32 %v6056_v44, %v6093_v22 }
 0x1a4   : > { %v2206_v36 = vld [vmem:[#allocation2 + $0x150] sm:$0xff]  ;;  %v2532_v2 = vmax.f32 %v2500_v27, %v6114_v14  ;;  %v2207_v6 = vld [vmem:[#allocation2 + $0x168] sm:$0xff]  ;;  %v2502_v8 = vmax.f32 %v2470_v38, %v6114_v14  ;;  %v2472_v40 = vmax.f32 %v2440_v5, %v6114_v14 }
 0x1a5   : > { %v6116_v59 = vmax.f32 %v2325_v15, %v2365_v51  ;;  %v2088_v12 = vld [vmem:[#allocation2 + $0x16e] sm:$0xff]  ;;  %v2246_v18 = vmax.f32 %v2166_v46, %v2206_v36  ;;  %v6130_v3 = vmax.f32 %v1174_v0, %v1214_v31  ;;  %v2247_v48 = vmax.f32 %v2167_v11, %v2207_v6  ;;  %v2091_v51 = vld [vmem:[#allocation2 + $0x1a6] sm:$0xff] }
 0x1a6   : > { %v2128_v13 = vld [vmem:[#allocation2 + $0x16f] sm:$0xff]  ;;  %4713 = vmatmul.mubr.msk.f32.gmra.mrb[26].mxu1 %vm225_vm1, %v2532_v2  ;;  %2921 = vst.msk [vmem:[#allocation2 + $0xf0] sm:$0xff] %vm225_vm1, %v2532_v2  ;;  %v2131_v9 = vld [vmem:[#allocation2 + $0x1a7] sm:$0xff] }
 0x1a7   : > { %v2533_v23 = vmax.f32 %v2501_v53, %v6116_v59  ;;  %v2286_v37 = vld [vmem:[#allocation2 + $0x151] sm:$0xff]  ;;  %v2287_v63 = vld [vmem:[#allocation2 + $0x169] sm:$0xff]  ;;  %v2168_v30 = vmax.f32 %v2088_v12, %v2128_v13  ;;  %v1382_v55 = vmax.f32 %v1350_v49, %v6130_v3  ;;  %v2503_v58 = vmax.f32 %v2471_v47, %v6116_v59 }
 0x1a8   : > { %v2326_v33 = vmax.f32 %v2246_v18, %v2286_v37  ;;  %v2366_v25 = vld [vmem:[#allocation2 + $0x152] sm:$0xff]  ;;  %v2327_v17 = vmax.f32 %v2247_v48, %v2287_v63  ;;  %v2367_v29 = vld [vmem:[#allocation2 + $0x16a] sm:$0xff]  ;;  %v2473_v2 = vmax.f32 %v2441_v7, %v6116_v59  ;;  %v2442_v18 = vmax.f32 %v6082_v39, %v6114_v14 }
 0x1a9   : > { %4715 = vmatprep.mubr.msk.f32.mxu1 %vm225_vm1, %v2533_v23  ;;  %2922 = vst.msk [vmem:[#allocation2 + $0x108] sm:$0xff] %vm225_vm1, %v2533_v23  ;;  %v2208_v20 = vld [vmem:[#allocation2 + $0x170] sm:$0xff]  ;;  %v2209_v15 = vld [vmem:[#allocation2 + $0x188] sm:$0xff]  ;;  %4643 = vmatmul.mubr.msk.f32.gmra.mrb[62].mxu0 %vm225_vm1, %v1382_v55  ;;  %2064 = vst.msk [vmem:[#allocation2 + $0x230] sm:$0xff] %vm225_vm1, %v1382_v55  ;;  %v2171_v23 = vmax.f32 %v2091_v51, %v2131_v9 }
 0x1aa   : > { %v2090_v19 = vld [vmem:[#allocation2 + $0x18e] sm:$0xff]  ;;  %v6139_v54 = vmax.f32 %v2326_v33, %v2366_v25  ;;  %v2248_v27 = vmax.f32 %v2168_v30, %v2208_v20  ;;  %v2249_v28 = vmax.f32 %v2169_v32, %v2209_v15  ;;  %v6148_v46 = vmax.f32 %v2327_v17, %v2367_v29  ;;  %4647 = vmatprep.mubr.msk.f32.mxu0 %vm225_vm1, %v5439_v34  ;;  %v2093_v25 = vld [vmem:[#allocation2 + $0x1c6] sm:$0xff] }
 0x1ab   : > { %v2130_v45 = vld [vmem:[#allocation2 + $0x18f] sm:$0xff]  ;;  %v2443_v33 = vmax.f32 %v6093_v22, %v6116_v59  ;;  %v2133_v48 = vld [vmem:[#allocation2 + $0x1c7] sm:$0xff] }
 0x1ac   : > { %v2288_v4 = vld [vmem:[#allocation2 + $0x171] sm:$0xff]  ;;  %v2534_v31 = vmax.f32 %v2502_v8, %v6139_v54  ;;  %v2289_v43 = vld [vmem:[#allocation2 + $0x189] sm:$0xff]  ;;  %v2170_v36 = vmax.f32 %v2090_v19, %v2130_v45  ;;  %v2504_v12 = vmax.f32 %v2472_v40, %v6139_v54  ;;  %v2535_v11 = vmax.f32 %v2503_v58, %v6148_v46 }
 0x1ad   : > { %v2328_v53 = vmax.f32 %v2248_v27, %v2288_v4  ;;  %v2368_v21 = vld [vmem:[#allocation2 + $0x172] sm:$0xff]  ;;  %v2329_v44 = vmax.f32 %v2249_v28, %v2289_v43  ;;  %v2369_v13 = vld [vmem:[#allocation2 + $0x18a] sm:$0xff]  ;;  %v2505_v6 = vmax.f32 %v2473_v2, %v6148_v46  ;;  %v2474_v26 = vmax.f32 %v2442_v18, %v6139_v54  ;;  %4648 = vmatmul.mubr.msk.f32.vlgmr.msra.gmra.mrb[32].mxu0 %vm225_vm1, %v5427_v24 }
 0x1ae   : > { %v2210_v0 = vld [vmem:[#allocation2 + $0x190] sm:$0xff]  ;;  %4716 = vmatmul.mubr.msk.f32.gmra.mrb[28].mxu1 %vm225_vm1, %v2534_v31  ;;  %2923 = vst.msk [vmem:[#allocation2 + $0x110] sm:$0xff] %vm225_vm1, %v2534_v31  ;;  %v2211_v39 = vld [vmem:[#allocation2 + $0x1a8] sm:$0xff]  ;;  %2924 = vst.msk [vmem:[#allocation2 + $0x128] sm:$0xff] %vm225_vm1, %v2535_v11  ;;  %4650 = vmatprep.mubr.msk.f32.mxu0 %vm225_vm1, %v5463_v10  ;;  %v2475_v45 = vmax.f32 %v2443_v33, %v6148_v46  ;;  %v2444_v10 = vmax.f32 %v6114_v14, %v6139_v54 }
 0x1af   : > { %v6159_v61 = vmax.f32 %v2328_v53, %v2368_v21  ;;  %v2250_v34 = vmax.f32 %v2170_v36, %v2210_v0  ;;  %v2290_v35 = vld [vmem:[#allocation2 + $0x191] sm:$0xff]  ;;  %v6161_v38 = vmax.f32 %v2329_v44, %v2369_v13  ;;  %4718 = vmatprep.mubr.msk.f32.mxu1 %vm225_vm1, %v2535_v11  ;;  %v2251_v8 = vmax.f32 %v2171_v23, %v2211_v39  ;;  %v2291_v19 = vld [vmem:[#allocation2 + $0x1a9] sm:$0xff] }
 0x1b0   : > { %v2092_v49 = vld [vmem:[#allocation2 + $0x1ae] sm:$0xff]  ;;  %v2173_v15 = vmax.f32 %v2093_v25, %v2133_v48  ;;  %v2445_v28 = vmax.f32 %v6116_v59, %v6148_v46  ;;  %v2095_v51 = vld [vmem:[#allocation2 + $0x1e6] sm:$0xff] }
 0x1b1   : > { %v2132_v37 = vld [vmem:[#allocation2 + $0x1af] sm:$0xff]  ;;  %v2536_v63 = vmax.f32 %v2504_v12, %v6159_v61  ;;  %v2330_v30 = vmax.f32 %v2250_v34, %v2290_v35  ;;  %v2537_v22 = vmax.f32 %v2505_v6, %v6161_v38  ;;  %v2506_v32 = vmax.f32 %v2474_v26, %v6159_v61  ;;  %v2135_v9 = vld [vmem:[#allocation2 + $0x1e7] sm:$0xff]  ;;  %4651 = vmatmul.mubr.msk.f32.gmra.mrb[34].mxu0 %vm225_vm1, %v5455_v62 }
 0x1b2   : > { %v2094_v47 = vld [vmem:[#allocation2 + $0x1ce] sm:$0xff]  ;;  %v2172_v55 = vmax.f32 %v2092_v49, %v2132_v37  ;;  %v2331_v17 = vmax.f32 %v2251_v8, %v2291_v19  ;;  %v2507_v58 = vmax.f32 %v2475_v45, %v6161_v38  ;;  %v2476_v43 = vmax.f32 %v2444_v10, %v6159_v61  ;;  %4653 = vmatprep.mubr.msk.f32.mxu0 %vm225_vm1, %v5481_v41 }
 0x1b3   : > { %v2134_v20 = vld [vmem:[#allocation2 + $0x1cf] sm:$0xff]  ;;  %4719 = vmatmul.mubr.msk.f32.gmra.mrb[30].mxu1 %vm225_vm1, %v2536_v63  ;;  %2925 = vst.msk [vmem:[#allocation2 + $0x130] sm:$0xff] %vm225_vm1, %v2536_v63  ;;  %2926 = vst.msk [vmem:[#allocation2 + $0x148] sm:$0xff] %vm225_vm1, %v2537_v22  ;;  %v2477_v13 = vmax.f32 %v2445_v28, %v6161_v38  ;;  %v2446_v62 = vmax.f32 %v6139_v54, %v6159_v61  ;;  %v2175_v41 = vmax.f32 %v2095_v51, %v2135_v9  ;;  %v2137_v8 = vld [vmem:[#allocation2 + $0x207] sm:$0xff] }
 0x1b4   : > { %v2370_v5 = vld [vmem:[#allocation2 + $0x192] sm:$0xff]  ;;  %v2371_v29 = vld [vmem:[#allocation2 + $0x1aa] sm:$0xff]  ;;  %4721 = vmatprep.mubr.msk.f32.mxu1 %vm225_vm1, %v2537_v22  ;;  %v2174_v7 = vmax.f32 %v2094_v47, %v2134_v20  ;;  %v2447_v63 = vmax.f32 %v6148_v46, %v6161_v38 }
 0x1b5   : > { %v6179_v24 = vmax.f32 %v2330_v30, %v2370_v5  ;;  %v2212_v27 = vld [vmem:[#allocation2 + $0x1b0] sm:$0xff]  ;;  %v2213_v40 = vld [vmem:[#allocation2 + $0x1c8] sm:$0xff]  ;;  %v6191_v31 = vmax.f32 %v2331_v17, %v2371_v29  ;;  %4654 = vmatmul.mubr.msk.f32.gmra.mrb[36].mxu0 %vm225_vm1, %v5475_v42 }
 0x1b6   : > { %v2252_v4 = vmax.f32 %v2172_v55, %v2212_v27  ;;  %v2292_v53 = vld [vmem:[#allocation2 + $0x1b1] sm:$0xff]  ;;  %v2253_v36 = vmax.f32 %v2173_v15, %v2213_v40  ;;  %v2293_v44 = vld [vmem:[#allocation2 + $0x1c9] sm:$0xff]  ;;  %4656 = vmatprep.mubr.msk.f32.mxu0 %vm225_vm1, %v5515_v57 }
 0x1b7   : > { %v2538_v14 = vmax.f32 %v2506_v32, %v6179_v24  ;;  %v2214_v21 = vld [vmem:[#allocation2 + $0x1d0] sm:$0xff]  ;;  %v2539_v0 = vmax.f32 %v2507_v58, %v6191_v31  ;;  %v2508_v18 = vmax.f32 %v2476_v43, %v6179_v24  ;;  %v2509_v6 = vmax.f32 %v2477_v13, %v6191_v31  ;;  %v2215_v39 = vld [vmem:[#allocation2 + $0x1e8] sm:$0xff] }
 0x1b8   : > { %v2332_v12 = vmax.f32 %v2252_v4, %v2292_v53  ;;  %v2372_v59 = vld [vmem:[#allocation2 + $0x1b2] sm:$0xff]  ;;  %v2254_v2 = vmax.f32 %v2174_v7, %v2214_v21  ;;  %v2333_v11 = vmax.f32 %v2253_v36, %v2293_v44  ;;  %v2373_v37 = vld [vmem:[#allocation2 + $0x1ca] sm:$0xff]  ;;  %v2478_v54 = vmax.f32 %v2446_v62, %v6179_v24 }
 0x1b9   : > { %4722 = vmatmul.mubr.msk.f32.gmra.mrb[0].mxu1 %vm225_vm1, %v2538_v14  ;;  %2927 = vst.msk [vmem:[#allocation2 + $0x150] sm:$0xff] %vm225_vm1, %v2538_v14  ;;  %v2294_v34 = vld [vmem:[#allocation2 + $0x1d1] sm:$0xff]  ;;  %2928 = vst.msk [vmem:[#allocation2 + $0x168] sm:$0xff] %vm225_vm1, %v2539_v0  ;;  %v2255_v48 = vmax.f32 %v2175_v41, %v2215_v39  ;;  %v2097_v30 = vld [vmem:[#allocation2 + $0x206] sm:$0xff]  ;;  %v2479_v45 = vmax.f32 %v2447_v63, %v6191_v31  ;;  %v2448_v46 = vmax.f32 %v6159_v61, %v6179_v24 }
 0x1ba   : > { %v2096_v35 = vld [vmem:[#allocation2 + $0x1ee] sm:$0xff]  ;;  %v6203_v49 = vmax.f32 %v2332_v12, %v2372_v59  ;;  %v2334_v26 = vmax.f32 %v2254_v2, %v2294_v34  ;;  %4724 = vmatprep.mubr.msk.f32.mxu1 %vm225_vm1, %v2539_v0  ;;  %v6211_v33 = vmax.f32 %v2333_v11, %v2373_v37  ;;  %v2177_v15 = vmax.f32 %v2097_v30, %v2137_v8  ;;  %v2099_v4 = vld [vmem:[#allocation2 + $0x226] sm:$0xff] }
 0x1bb   : > { %v2136_v23 = vld [vmem:[#allocation2 + $0x1ef] sm:$0xff]  ;;  %v2449_v58 = vmax.f32 %v6161_v38, %v6191_v31  ;;  %v2139_v40 = vld [vmem:[#allocation2 + $0x227] sm:$0xff]  ;;  %4657 = vmatmul.mubr.msk.f32.gmra.mrb[38].mxu0 %vm225_vm1, %v5495_v16 }
 0x1bc   : > { %v2374_v25 = vld [vmem:[#allocation2 + $0x1d2] sm:$0xff]  ;;  %v2540_v47 = vmax.f32 %v2508_v18, %v6203_v49  ;;  %v2510_v22 = vmax.f32 %v2478_v54, %v6203_v49  ;;  %v2295_v5 = vld [vmem:[#allocation2 + $0x1e9] sm:$0xff]  ;;  %v2176_v42 = vmax.f32 %v2096_v35, %v2136_v23  ;;  %v2541_v32 = vmax.f32 %v2509_v6, %v6211_v33  ;;  %4659 = vmatprep.mubr.msk.f32.mxu0 %vm225_vm1, %v5535_v60 }
 0x1bd   : > { %v6218_v20 = vmax.f32 %v2334_v26, %v2374_v25  ;;  %v2335_v19 = vmax.f32 %v2255_v48, %v2295_v5  ;;  %v2216_v55 = vld [vmem:[#allocation2 + $0x1f0] sm:$0xff]  ;;  %v2511_v28 = vmax.f32 %v2479_v45, %v6211_v33  ;;  %v2480_v51 = vmax.f32 %v2448_v46, %v6203_v49  ;;  %v2217_v9 = vld [vmem:[#allocation2 + $0x208] sm:$0xff] }
 0x1be   : > { %v2098_v17 = vld [vmem:[#allocation2 + $0x20e] sm:$0xff]  ;;  %4725 = vmatmul.mubr.msk.f32.gmra.mrb[2].mxu1 %vm225_vm1, %v2540_v47  ;;  %2929 = vst.msk [vmem:[#allocation2 + $0x170] sm:$0xff] %vm225_vm1, %v2540_v47  ;;  %v2256_v10 = vmax.f32 %v2176_v42, %v2216_v55  ;;  %2930 = vst.msk [vmem:[#allocation2 + $0x188] sm:$0xff] %vm225_vm1, %v2541_v32  ;;  %v2257_v53 = vmax.f32 %v2177_v15, %v2217_v9  ;;  %v2481_v36 = vmax.f32 %v2449_v58, %v6211_v33  ;;  %v2946_v45 = vld [vmem:[#allocation2 + $0x46] sm:$0xff] }
 0x1bf   : > { %v2138_v29 = vld [vmem:[#allocation2 + $0x20f] sm:$0xff]  ;;  %v2542_v57 = vmax.f32 %v2510_v22, %v6218_v20  ;;  %4727 = vmatprep.mubr.msk.f32.mxu1 %vm225_vm1, %v2541_v32  ;;  %v2512_v12 = vmax.f32 %v2480_v51, %v6218_v20  ;;  %v2450_v44 = vmax.f32 %v6179_v24, %v6203_v49  ;;  %v2179_v13 = vmax.f32 %v2099_v4, %v2139_v40  ;;  %v6873_v55 = vld [vmem:[#allocation7_spill] sm:$0xff]  ;;  %v6874_v15 = vld [vmem:[#allocation10_spill] sm:$0xff] }
 0x1c0   : > { %v2375_v27 = vld [vmem:[#allocation2 + $0x1ea] sm:$0xff]  ;;  %v2376_v14 = vld [vmem:[#allocation2 + $0x1f2] sm:$0xff]  ;;  %v2178_v16 = vmax.f32 %v2098_v17, %v2138_v29  ;;  %4660 = vmatmul.mubr.msk.f32.gmra.mrb[40].mxu0 %vm225_vm1, %v5521_v56  ;;  %v2451_v37 = vmax.f32 %v6191_v31, %v6211_v33  ;;  %v2452_v22 = vmax.f32 %v6203_v49, %v6218_v20 }
 0x1c1   : > { %v6234_v61 = vmax.f32 %v2335_v19, %v2375_v27  ;;  %v2296_v7 = vld [vmem:[#allocation2 + $0x1f1] sm:$0xff]  ;;  %2931 = vst.msk [vmem:[#allocation2 + $0x190] sm:$0xff] %vm225_vm1, %v2542_v57  ;;  %v2297_v43 = vld [vmem:[#allocation2 + $0x209] sm:$0xff]  ;;  %v2482_v35 = vmax.f32 %v2450_v44, %v6218_v20 }
 0x1c2   : > { %v2336_v38 = vmax.f32 %v2256_v10, %v2296_v7  ;;  %v2218_v59 = vld [vmem:[#allocation2 + $0x210] sm:$0xff]  ;;  %4728 = vmatmul.mubr.msk.f32.gmra.mrb[4].mxu1 %vm225_vm1, %v2542_v57  ;;  %v2337_v0 = vmax.f32 %v2257_v53, %v2297_v43  ;;  %v2219_v34 = vld [vmem:[#allocation2 + $0x228] sm:$0xff] }
 0x1c3   : > { %v2543_v21 = vmax.f32 %v2511_v28, %v6234_v61  ;;  %v2100_v2 = vld [vmem:[#allocation2 + $0x22e] sm:$0xff]  ;;  %v2513_v18 = vmax.f32 %v2481_v36, %v6234_v61  ;;  %v2258_v11 = vmax.f32 %v2178_v16, %v2218_v59  ;;  %v2259_v23 = vmax.f32 %v2179_v13, %v2219_v34  ;;  %v2948_v27 = vld [vmem:[#allocation2 + $0x66] sm:$0xff] }
 0x1c4   : > { %v2140_v60 = vld [vmem:[#allocation2 + $0x22f] sm:$0xff]  ;;  %v6247_v62 = vmax.f32 %v2336_v38, %v2376_v14  ;;  %v2483_v8 = vmax.f32 %v2451_v37, %v6234_v61  ;;  %v2453_v19 = vmax.f32 %v6211_v33, %v6234_v61  ;;  %v2986_v10 = vld [vmem:[#allocation2 + $0x47] sm:$0xff] }
 0x1c5   : > { %4730 = vmatprep.mubr.msk.f32.mxu1 %vm225_vm1, %v2543_v21  ;;  %2932 = vst.msk [vmem:[#allocation2 + $0x1a8] sm:$0xff] %vm225_vm1, %v2543_v21  ;;  %v2377_v24 = vld [vmem:[#allocation2 + $0x20a] sm:$0xff]  ;;  %v2180_v48 = vmax.f32 %v2100_v2, %v2140_v60  ;;  %v2378_v63 = vld [vmem:[#allocation2 + $0x212] sm:$0xff]  ;;  %v3026_v16 = vmax.f32 %v2946_v45, %v2986_v10 }
 0x1c6   : > { %v2298_v41 = vld [vmem:[#allocation2 + $0x211] sm:$0xff]  ;;  %v6872_v6 = vld [vmem:[#allocation8_spill] sm:$0xff]  ;;  %v2544_v26 = vmax.f32 %v2512_v12, %v6247_v62  ;;  %v2417_v54 = vmax.f32 %v2337_v0, %v2377_v24  ;;  %v2514_v56 = vmax.f32 %v2482_v35, %v6247_v62  ;;  %v2484_v49 = vmax.f32 %v2452_v22, %v6247_v62 }
 0x1c7   : > { %4662 = vmatprep.mubr.msk.f32.mxu0 %vm225_vm1, %v6872_v6  ;;  %v2338_v39 = vmax.f32 %v2258_v11, %v2298_v41  ;;  %v2299_v25 = vld [vmem:[#allocation2 + $0x229] sm:$0xff]  ;;  %v2300_v29 = vld [vmem:[#allocation2 + $0x231] sm:$0xff]  ;;  %v2454_v57 = vmax.f32 %v6218_v20, %v6247_v62 }
 0x1c8   : > { %v2339_v30 = vmax.f32 %v2259_v23, %v2299_v25  ;;  %v2220_v47 = vld [vmem:[#allocation2 + $0x230] sm:$0xff]  ;;  %4731 = vmatmul.mubr.msk.f32.gmra.mrb[6].mxu1 %vm225_vm1, %v2544_v26  ;;  %2933 = vst.msk [vmem:[#allocation2 + $0x1b0] sm:$0xff] %vm225_vm1, %v2544_v26  ;;  %v2545_v31 = vmax.f32 %v2513_v18, %v2417_v54  ;;  %4663 = vmatmul.mubr.msk.f32.gmra.mrb[42].mxu0 %vm225_vm1, %v6873_v55  ;;  %v2950_v40 = vld [vmem:[#allocation2 + $0x86] sm:$0xff] }
 0x1c9   : > { %v2418_v5 = vmax.f32 %v2338_v39, %v2378_v63  ;;  %v2379_v42 = vld [vmem:[#allocation2 + $0x22a] sm:$0xff]  ;;  %v2260_v32 = vmax.f32 %v2180_v48, %v2220_v47  ;;  %v2515_v17 = vmax.f32 %v2483_v8, %v2417_v54  ;;  %4665 = vmatprep.mubr.msk.f32.mxu0 %vm225_vm1, %v6874_v15  ;;  %v2485_v4 = vmax.f32 %v2453_v19, %v2417_v54  ;;  %v2380_v9 = vld [vmem:[#allocation2 + $0x232] sm:$0xff]  ;;  %v6877_v25 = vld [vmem:[#allocation3_spill] sm:$0xff] }
 0x1ca   : > { %v2419_v46 = vmax.f32 %v2339_v30, %v2379_v42  ;;  %4733 = vmatprep.mubr.msk.f32.mxu1 %vm225_vm1, %v2545_v31  ;;  %2934 = vst.msk [vmem:[#allocation2 + $0x1c8] sm:$0xff] %vm225_vm1, %v2545_v31  ;;  %v2988_v28 = vld [vmem:[#allocation2 + $0x67] sm:$0xff]  ;;  %v2455_v20 = vmax.f32 %v6234_v61, %v2417_v54  ;;  %v6875_v59 = vld [vmem:[#allocation9_spill] sm:$0xff]  ;;  %v6881_v8 = vld [vmem:[#allocation6_spill] sm:$0xff] }
 0x1cb   : > { %v2546_v33 = vmax.f32 %v2514_v56, %v2418_v5  ;;  %v2340_v58 = vmax.f32 %v2260_v32, %v2300_v29  ;;  %v2990_v7 = vld [vmem:[#allocation2 + $0x87] sm:$0xff]  ;;  %v2516_v38 = vmax.f32 %v2484_v49, %v2418_v5  ;;  %v2486_v14 = vmax.f32 %v2454_v57, %v2418_v5  ;;  %v2983_v6 = vld [vmem:[#allocation2 + $0xf] sm:$0xff] }
 0x1cc   : > { %v2547_v51 = vmax.f32 %v2515_v17, %v2419_v46  ;;  %v2517_v43 = vmax.f32 %v2485_v4, %v2419_v46  ;;  %v2456_v36 = vmax.f32 %v6247_v62, %v2418_v5  ;;  %v3062_v21 = vld [vmem:[#allocation2 + $0x8] sm:$0xff]  ;;  %4666 = vmatmul.mubr.msk.f32.gmra.mrb[44].mxu0 %vm225_vm1, %v6875_v59  ;;  %v2487_v44 = vmax.f32 %v2455_v20, %v2419_v46  ;;  %v6878_v48 = vld [vmem:[#allocation5_spill] sm:$0xff]  ;;  %v6883_v29 = vld [vmem:[#allocation11_spill] sm:$0xff] }
 0x1cd   : > { %4734 = vmatmul.mubr.msk.f32.gmra.mrb[8].mxu1 %vm225_vm1, %v2546_v33  ;;  %2935 = vst.msk [vmem:[#allocation2 + $0x1d0] sm:$0xff] %vm225_vm1, %v2546_v33  ;;  %v2420_v53 = vmax.f32 %v2340_v58, %v2380_v9  ;;  %v3064_v12 = vld [vmem:[#allocation2 + $0x28] sm:$0xff]  ;;  %v3028_v61 = vmax.f32 %v2948_v27, %v2988_v28  ;;  %v3030_v13 = vmax.f32 %v2950_v40, %v2990_v7  ;;  %v3063_v17 = vld [vmem:[#allocation2 + $0x10] sm:$0xff] }
 0x1ce   : > { %4736 = vmatprep.mubr.msk.f32.mxu1 %vm225_vm1, %v2547_v51  ;;  %2936 = vst.msk [vmem:[#allocation2 + $0x1e8] sm:$0xff] %vm225_vm1, %v2547_v51  ;;  %v3142_v2 = vld [vmem:[#allocation2 + $0x9] sm:$0xff]  ;;  %v2549_v62 = vmax.f32 %v2517_v43, %v5460_v1  ;;  %v2519_v26 = vmax.f32 %v2487_v44, %v5460_v1  ;;  %v6879_v63 = vmax.f32 %v6877_v25, %v6878_v48  ;;  %v3143_v44 = vld [vmem:[#allocation2 + $0x11] sm:$0xff] }
 0x1cf   : > { %v3144_v60 = vld [vmem:[#allocation2 + $0x29] sm:$0xff]  ;;  %v2548_v18 = vmax.f32 %v2516_v38, %v2420_v53  ;;  %v2518_v11 = vmax.f32 %v2486_v14, %v2420_v53  ;;  %v2488_v34 = vmax.f32 %v2456_v36, %v2420_v53  ;;  %v3151_v25 = vld [vmem:[#allocation2 + $0x91] sm:$0xff] }
 0x1d0   : > { %v6876_v0 = vld [vmem:[#allocation12_spill] sm:$0xff]  ;;  %v3102_v56 = vmax.f32 %v6879_v63, %v3062_v21  ;;  %2938 = vst.msk [vmem:[#allocation2 + $0x208] sm:$0xff] %vm225_vm1, %v2549_v62  ;;  %v2551_v49 = vmax.f32 %v2519_v26, %v5512_v52  ;;  %v3225_v63 = vld [vmem:[#allocation2 + $0x32] sm:$0xff] }
 0x1d1   : > { %4668 = vmatprep.mubr.msk.f32.mxu0 %vm225_vm1, %v6876_v0  ;;  %v3066_v24 = vld [vmem:[#allocation2 + $0x48] sm:$0xff]  ;;  %4737 = vmatmul.mubr.msk.f32.gmra.mrb[10].mxu1 %vm225_vm1, %v2548_v18  ;;  %2937 = vst.msk [vmem:[#allocation2 + $0x1f0] sm:$0xff] %vm225_vm1, %v2548_v18  ;;  %v2550_v1 = vmax.f32 %v2518_v11, %v5486_v50  ;;  %v2520_v42 = vmax.f32 %v2488_v34, %v5486_v50  ;;  %v3065_v50 = vld [vmem:[#allocation2 + $0x30] sm:$0xff] }
 0x1d2   : > { %v3222_v41 = vld [vmem:[#allocation2 + $0xa] sm:$0xff]  ;;  %v3106_v31 = vmax.f32 %v3026_v16, %v3066_v24  ;;  %4739 = vmatprep.mubr.msk.f32.mxu1 %vm225_vm1, %v2549_v62  ;;  %4669 = vmatmul.mubr.msk.f32.gmra.mrb[46].mxu0 %vm225_vm1, %v6883_v29  ;;  %v3182_v27 = vmax.f32 %v3102_v56, %v3142_v2  ;;  %2940 = vst.msk [vmem:[#allocation2 + $0x228] sm:$0xff] %vm225_vm1, %v2551_v49  ;;  %v3229_v29 = vld [vmem:[#allocation2 + $0x72] sm:$0xff] }
 0x1d3   : > { %v3224_v35 = vld [vmem:[#allocation2 + $0x2a] sm:$0xff]  ;;  %2939 = vst.msk [vmem:[#allocation2 + $0x210] sm:$0xff] %vm225_vm1, %v2550_v1  ;;  %v2552_v4 = vmax.f32 %v2520_v42, %v6130_v3 }
 0x1d4   : > { %v6288_v23 = vld [vmem:[#allocation2 + $0xe] sm:$0xff]  ;;  %v3262_v14 = vmax.f32 %v3182_v27, %v3222_v41  ;;  %v2952_v36 = vld [vmem:[#allocation2 + $0xa6] sm:$0xff] }
 0x1d5   : > { %v6290_v37 = vld [vmem:[#allocation2 + $0x2e] sm:$0xff]  ;;  %v3023_v53 = vmax.f32 %v6288_v23, %v2983_v6  ;;  %4740 = vmatmul.mubr.msk.f32.gmra.mrb[12].mxu1 %vm225_vm1, %v2550_v1  ;;  %2941 = vst.msk [vmem:[#allocation2 + $0x230] sm:$0xff] %vm225_vm1, %v2552_v4 }
 0x1d6   : > { %v3068_v54 = vld [vmem:[#allocation2 + $0x68] sm:$0xff]  ;;  %4742 = vmatprep.mubr.msk.f32.mxu1 %vm225_vm1, %v2551_v49  ;;  %v3067_v0 = vld [vmem:[#allocation2 + $0x50] sm:$0xff] }
 0x1d7   : > { %v3070_v39 = vld [vmem:[#allocation2 + $0x88] sm:$0xff]  ;;  %v3108_v32 = vmax.f32 %v3028_v61, %v3068_v54  ;;  %v3145_v61 = vld [vmem:[#allocation2 + $0x31] sm:$0xff]  ;;  %v3103_v11 = vmax.f32 %v3023_v53, %v3063_v17 }
 0x1d8   : > { %v6880_v30 = vld [vmem:[#allocation4_spill] sm:$0xff]  ;;  %v3110_v19 = vmax.f32 %v3030_v13, %v3070_v39  ;;  %v3069_v18 = vld [vmem:[#allocation2 + $0x70] sm:$0xff] }
 0x1d9   : > { %v6882_v47 = vmax.f32 %v6880_v30, %v6881_v8  ;;  %v2985_v5 = vld [vmem:[#allocation2 + $0x2f] sm:$0xff]  ;;  %v2992_v16 = vld [vmem:[#allocation2 + $0xa7] sm:$0xff]  ;;  %v3183_v48 = vmax.f32 %v3103_v11, %v3143_v44  ;;  %4743 = vmatmul.mubr.msk.f32.gmra.mrb[14].mxu1 %vm225_vm1, %v2552_v4 }
 0x1da   : > { %v3146_v45 = vld [vmem:[#allocation2 + $0x49] sm:$0xff]  ;;  %v3025_v43 = vmax.f32 %v6290_v37, %v2985_v5  ;;  %v3149_v23 = vld [vmem:[#allocation2 + $0x71] sm:$0xff]  ;;  %v3032_v6 = vmax.f32 %v2952_v36, %v2992_v16 }
 0x1db   : > { %v3104_v22 = vmax.f32 %v6882_v47, %v3064_v12  ;;  %v3148_v55 = vld [vmem:[#allocation2 + $0x69] sm:$0xff]  ;;  %v3186_v40 = vmax.f32 %v3106_v31, %v3146_v45  ;;  %v3223_v37 = vld [vmem:[#allocation2 + $0x12] sm:$0xff] }
 0x1dc   : > { %v2947_v46 = vld [vmem:[#allocation2 + $0x4e] sm:$0xff]  ;;  %v3188_v28 = vmax.f32 %v3108_v32, %v3148_v55  ;;  %v3105_v24 = vmax.f32 %v3025_v43, %v3065_v50  ;;  %v3263_v45 = vmax.f32 %v3183_v48, %v3223_v37  ;;  %v2956_v16 = vld [vmem:[#allocation2 + $0xe6] sm:$0xff] }
 0x1dd   : > { %v3150_v57 = vld [vmem:[#allocation2 + $0x89] sm:$0xff]  ;;  %v3184_v10 = vmax.f32 %v3104_v22, %v3144_v60  ;;  %v3227_v47 = vld [vmem:[#allocation2 + $0x52] sm:$0xff] }
 0x1de   : > { %v3226_v15 = vld [vmem:[#allocation2 + $0x4a] sm:$0xff]  ;;  %v3190_v7 = vmax.f32 %v3110_v19, %v3150_v57  ;;  %v3185_v30 = vmax.f32 %v3105_v24, %v3145_v61  ;;  %v3231_v50 = vld [vmem:[#allocation2 + $0x92] sm:$0xff] }
 0x1df   : > { %v2949_v33 = vld [vmem:[#allocation2 + $0x6e] sm:$0xff]  ;;  %v3264_v20 = vmax.f32 %v3184_v10, %v3224_v35  ;;  %v6315_v21 = vmax.f32 %v3186_v40, %v3226_v15 }
 0x1e0   : > { %v2987_v58 = vld [vmem:[#allocation2 + $0x4f] sm:$0xff]  ;;  %v2994_v17 = vld [vmem:[#allocation2 + $0xc7] sm:$0xff]  ;;  %v3265_v49 = vmax.f32 %v3185_v30, %v3225_v63 }
 0x1e1   : > { %v2951_v51 = vld [vmem:[#allocation2 + $0x8e] sm:$0xff]  ;;  %v3027_v59 = vmax.f32 %v2947_v46, %v2987_v58  ;;  %v3302_v13 = vmax.f32 %v3262_v14, %v3264_v20  ;;  %v3304_v31 = vmax.f32 %v3264_v20, %v6315_v21  ;;  %v2954_v46 = vld [vmem:[#allocation2 + $0xc6] sm:$0xff] }
 0x1e2   : > { %v2989_v9 = vld [vmem:[#allocation2 + $0x6f] sm:$0xff] }
 0x1e3   : > { %v2991_v38 = vld [vmem:[#allocation2 + $0x8f] sm:$0xff]  ;;  %v3029_v2 = vmax.f32 %v2949_v33, %v2989_v9  ;;  %v3107_v41 = vmax.f32 %v3027_v59, %v3067_v0  ;;  %v3334_v26 = vmax.f32 %v3302_v13, %v6315_v21 }
 0x1e4   : > { %v3228_v52 = vld [vmem:[#allocation2 + $0x6a] sm:$0xff]  ;;  %v3031_v60 = vmax.f32 %v2951_v51, %v2991_v38 }
 0x1e5   : > { %v3230_v3 = vld [vmem:[#allocation2 + $0x8a] sm:$0xff]  ;;  %v6317_v12 = vmax.f32 %v3188_v28, %v3228_v52  ;;  %v3109_v54 = vmax.f32 %v3029_v2, %v3069_v18  ;;  %v3034_v52 = vmax.f32 %v2954_v46, %v2994_v17 }
 0x1e6   : > { %v3071_v62 = vld [vmem:[#allocation2 + $0x90] sm:$0xff]  ;;  %v6320_v34 = vmax.f32 %v3190_v7, %v3230_v3  ;;  %v3072_v56 = vld [vmem:[#allocation2 + $0xa8] sm:$0xff]  ;;  %v3303_v7 = vmax.f32 %v3263_v45, %v3265_v49 }
 0x1e7   : > { %v3147_v35 = vld [vmem:[#allocation2 + $0x51] sm:$0xff]  ;;  %v3111_v39 = vmax.f32 %v3031_v60, %v3071_v62  ;;  %v3112_v22 = vmax.f32 %v3032_v6, %v3072_v56  ;;  %v3366_v42 = vmax.f32 %v3334_v26, %v6317_v12  ;;  %v3189_v32 = vmax.f32 %v3109_v54, %v3149_v23  ;;  %v3152_v55 = vld [vmem:[#allocation2 + $0xa9] sm:$0xff] }
 0x1e8   : > { %v3187_v8 = vmax.f32 %v3107_v41, %v3147_v35  ;;  %v2953_v5 = vld [vmem:[#allocation2 + $0xae] sm:$0xff]  ;;  %v3336_v10 = vmax.f32 %v3304_v31, %v6317_v12  ;;  %v3306_v43 = vmax.f32 %v6315_v21, %v6317_v12 }
 0x1e9   : > { %v2993_v1 = vld [vmem:[#allocation2 + $0xaf] sm:$0xff]  ;;  %v3191_v19 = vmax.f32 %v3111_v39, %v3151_v25  ;;  %v3192_v27 = vmax.f32 %v3112_v22, %v3152_v55  ;;  %v3398_v58 = vmax.f32 %v3366_v42, %v6320_v34  ;;  %v6328_v4 = vmax.f32 %v3189_v32, %v3229_v29  ;;  %v2996_v3 = vld [vmem:[#allocation2 + $0xe7] sm:$0xff] }
 0x1ea   : > { %v3267_v57 = vmax.f32 %v3187_v8, %v3227_v47  ;;  %v2955_v15 = vld [vmem:[#allocation2 + $0xce] sm:$0xff]  ;;  %v3033_v40 = vmax.f32 %v2953_v5, %v2993_v1  ;;  %v3368_v9 = vmax.f32 %v3336_v10, %v6320_v34  ;;  %v3338_v11 = vmax.f32 %v3306_v43, %v6320_v34  ;;  %v2958_v42 = vld [vmem:[#allocation2 + $0x106] sm:$0xff] }
 0x1eb   : > { %v2995_v33 = vld [vmem:[#allocation2 + $0xcf] sm:$0xff]  ;;  %v6330_v28 = vmax.f32 %v3191_v19, %v3231_v50  ;;  %4747 = vmatprep.mubr.msk.f32.mxu1 %vm225_vm1, %v3398_v58  ;;  %v3036_v54 = vmax.f32 %v2956_v16, %v2996_v3  ;;  %v3308_v8 = vmax.f32 %v6317_v12, %v6320_v34  ;;  %v2998_v32 = vld [vmem:[#allocation2 + $0x107] sm:$0xff] }
 0x1ec   : > { %v3232_v51 = vld [vmem:[#allocation2 + $0xaa] sm:$0xff]  ;;  %v3305_v20 = vmax.f32 %v3265_v49, %v3267_v57  ;;  %v3035_v36 = vmax.f32 %v2955_v15, %v2995_v33  ;;  %v3335_v59 = vmax.f32 %v3303_v7, %v3267_v57  ;;  %v3307_v60 = vmax.f32 %v3267_v57, %v6328_v4  ;;  %v3233_v23 = vld [vmem:[#allocation2 + $0xb2] sm:$0xff] }
 0x1ed   : > { %v3073_v38 = vld [vmem:[#allocation2 + $0xb0] sm:$0xff]  ;;  %v3074_v53 = vld [vmem:[#allocation2 + $0xc8] sm:$0xff]  ;;  %v6336_v44 = vmax.f32 %v3192_v27, %v3232_v51  ;;  %v3309_v51 = vmax.f32 %v6328_v4, %v6330_v28 }
 0x1ee   : > { %v3113_v14 = vmax.f32 %v3033_v40, %v3073_v38  ;;  %v3153_v61 = vld [vmem:[#allocation2 + $0xb1] sm:$0xff]  ;;  %v3114_v13 = vmax.f32 %v3034_v52, %v3074_v53  ;;  %v3337_v18 = vmax.f32 %v3305_v20, %v6328_v4  ;;  %v3154_v62 = vld [vmem:[#allocation2 + $0xc9] sm:$0xff]  ;;  %v3367_v35 = vmax.f32 %v3335_v59, %v6328_v4 }
 0x1ef   : > { %v3075_v2 = vld [vmem:[#allocation2 + $0xd0] sm:$0xff]  ;;  %v3339_v26 = vmax.f32 %v3307_v60, %v6330_v28  ;;  %v3076_v30 = vld [vmem:[#allocation2 + $0xe8] sm:$0xff]  ;;  %v3400_v19 = vmax.f32 %v3368_v9, %v6336_v44  ;;  %v3370_v45 = vmax.f32 %v3338_v11, %v6336_v44  ;;  %v3340_v27 = vmax.f32 %v3308_v8, %v6336_v44 }
 0x1f0   : > { %v3193_v0 = vmax.f32 %v3113_v14, %v3153_v61  ;;  %v3115_v24 = vmax.f32 %v3035_v36, %v3075_v2  ;;  %v2957_v41 = vld [vmem:[#allocation2 + $0xee] sm:$0xff]  ;;  %v3194_v37 = vmax.f32 %v3114_v13, %v3154_v62  ;;  %v3369_v25 = vmax.f32 %v3337_v18, %v6330_v28  ;;  %v2960_v15 = vld [vmem:[#allocation2 + $0x126] sm:$0xff] }
 0x1f1   : > { %v2997_v21 = vld [vmem:[#allocation2 + $0xef] sm:$0xff]  ;;  %v3399_v47 = vmax.f32 %v3367_v35, %v6330_v28  ;;  %v3116_v31 = vmax.f32 %v3036_v54, %v3076_v30  ;;  %v3000_v33 = vld [vmem:[#allocation2 + $0x127] sm:$0xff]  ;;  %v3038_v9 = vmax.f32 %v2958_v42, %v2998_v32  ;;  %v3310_v53 = vmax.f32 %v6320_v34, %v6336_v44 }
 0x1f2   : > { %v3155_v6 = vld [vmem:[#allocation2 + $0xd1] sm:$0xff]  ;;  %v6343_v39 = vmax.f32 %v3193_v0, %v3233_v23  ;;  %v3156_v5 = vld [vmem:[#allocation2 + $0xe9] sm:$0xff]  ;;  %v3037_v1 = vmax.f32 %v2957_v41, %v2997_v21  ;;  %v3040_v61 = vmax.f32 %v2960_v15, %v3000_v33 }
 0x1f3   : > { %v3234_v48 = vld [vmem:[#allocation2 + $0xca] sm:$0xff]  ;;  %v3195_v63 = vmax.f32 %v3115_v24, %v3155_v6  ;;  %v3235_v56 = vld [vmem:[#allocation2 + $0xd2] sm:$0xff]  ;;  %4748 = vmatmul.mubr.msk.f32.vlgmr.msra.gmra.mrb[16].mxu1 %vm225_vm1, %v3399_v47  ;;  %v3196_v57 = vmax.f32 %v3116_v31, %v3156_v5 }
 0x1f4   : > { %v6349_v22 = vmax.f32 %v3194_v37, %v3234_v48  ;;  %v3371_v46 = vmax.f32 %v3339_v26, %v6343_v39  ;;  %v3077_v17 = vld [vmem:[#allocation2 + $0xf0] sm:$0xff]  ;;  %v3401_v49 = vmax.f32 %v3369_v25, %v6343_v39  ;;  %4750 = vmatprep.mubr.msk.f32.mxu1 %vm225_vm1, %v3400_v19  ;;  %v3078_v20 = vld [vmem:[#allocation2 + $0x108] sm:$0xff]  ;;  %v3341_v16 = vmax.f32 %v3309_v51, %v6343_v39 }
 0x1f5   : > { %v6353_v55 = vmax.f32 %v3195_v63, %v3235_v56  ;;  %v2959_v29 = vld [vmem:[#allocation2 + $0x10e] sm:$0xff]  ;;  %v3117_v10 = vmax.f32 %v3037_v1, %v3077_v17  ;;  %v3118_v3 = vmax.f32 %v3038_v9, %v3078_v20  ;;  %v3311_v34 = vmax.f32 %v6330_v28, %v6343_v39  ;;  %v2962_v23 = vld [vmem:[#allocation2 + $0x146] sm:$0xff] }
 0x1f6   : > { %v2999_v12 = vld [vmem:[#allocation2 + $0x10f] sm:$0xff]  ;;  %v3402_v58 = vmax.f32 %v3370_v45, %v6349_v22  ;;  %v3372_v36 = vmax.f32 %v3340_v27, %v6349_v22  ;;  %v3342_v0 = vmax.f32 %v3310_v53, %v6349_v22  ;;  %v3002_v37 = vld [vmem:[#allocation2 + $0x147] sm:$0xff]  ;;  %v3312_v31 = vmax.f32 %v6336_v44, %v6349_v22 }
 0x1f7   : > { %v3403_v50 = vmax.f32 %v3371_v46, %v6353_v55  ;;  %v3236_v40 = vld [vmem:[#allocation2 + $0xea] sm:$0xff]  ;;  %v3237_v14 = vld [vmem:[#allocation2 + $0xf2] sm:$0xff]  ;;  %v3039_v43 = vmax.f32 %v2959_v29, %v2999_v12  ;;  %4751 = vmatmul.mubr.msk.f32.gmra.mrb[18].mxu1 %vm225_vm1, %v3401_v49  ;;  %v3373_v24 = vmax.f32 %v3341_v16, %v6353_v55  ;;  %v3343_v25 = vmax.f32 %v3311_v34, %v6353_v55 }
 0x1f8   : > { %v3157_v7 = vld [vmem:[#allocation2 + $0xf1] sm:$0xff]  ;;  %v6364_v38 = vmax.f32 %v3196_v57, %v3236_v40  ;;  %v3158_v60 = vld [vmem:[#allocation2 + $0x109] sm:$0xff]  ;;  %4753 = vmatprep.mubr.msk.f32.mxu1 %vm225_vm1, %v3402_v58  ;;  %v3313_v19 = vmax.f32 %v6343_v39, %v6353_v55  ;;  %v3042_v45 = vmax.f32 %v2962_v23, %v3002_v37 }
 0x1f9   : > { %v3197_v52 = vmax.f32 %v3117_v10, %v3157_v7  ;;  %v3079_v59 = vld [vmem:[#allocation2 + $0x110] sm:$0xff]  ;;  %v3080_v62 = vld [vmem:[#allocation2 + $0x128] sm:$0xff]  ;;  %v3198_v41 = vmax.f32 %v3118_v3, %v3158_v60 }
 0x1fa   : > { %v2961_v13 = vld [vmem:[#allocation2 + $0x12e] sm:$0xff]  ;;  %v3119_v18 = vmax.f32 %v3039_v43, %v3079_v59  ;;  %v3404_v11 = vmax.f32 %v3372_v36, %v6364_v38  ;;  %v3120_v35 = vmax.f32 %v3040_v61, %v3080_v62  ;;  %v3374_v26 = vmax.f32 %v3342_v0, %v6364_v38  ;;  %v2964_v27 = vld [vmem:[#allocation2 + $0x166] sm:$0xff] }
 0x1fb   : > { %v3001_v2 = vld [vmem:[#allocation2 + $0x12f] sm:$0xff]  ;;  %v6371_v4 = vmax.f32 %v3197_v52, %v3237_v14  ;;  %4754 = vmatmul.mubr.msk.f32.gmra.mrb[20].mxu1 %vm225_vm1, %v3403_v50  ;;  %v3344_v44 = vmax.f32 %v3312_v31, %v6364_v38  ;;  %v3314_v57 = vmax.f32 %v6349_v22, %v6364_v38  ;;  %v3004_v10 = vld [vmem:[#allocation2 + $0x167] sm:$0xff] }
 0x1fc   : > { %v3159_v21 = vld [vmem:[#allocation2 + $0x111] sm:$0xff]  ;;  %v3160_v48 = vld [vmem:[#allocation2 + $0x129] sm:$0xff]  ;;  %v3041_v28 = vmax.f32 %v2961_v13, %v3001_v2  ;;  %4756 = vmatprep.mubr.msk.f32.mxu1 %vm225_vm1, %v3404_v11  ;;  %v3044_v3 = vmax.f32 %v2964_v27, %v3004_v10 }
 0x1fd   : > { %v3238_v6 = vld [vmem:[#allocation2 + $0x10a] sm:$0xff]  ;;  %v3199_v54 = vmax.f32 %v3119_v18, %v3159_v21  ;;  %v3405_v63 = vmax.f32 %v3373_v24, %v6371_v4  ;;  %v3239_v30 = vld [vmem:[#allocation2 + $0x112] sm:$0xff]  ;;  %v3200_v8 = vmax.f32 %v3120_v35, %v3160_v48  ;;  %v3375_v29 = vmax.f32 %v3343_v25, %v6371_v4 }
 0x1fe   : > { %v6382_v56 = vmax.f32 %v3198_v41, %v3238_v6  ;;  %v3240_v47 = vld [vmem:[#allocation2 + $0x12a] sm:$0xff]  ;;  %v3241_v33 = vld [vmem:[#allocation2 + $0x132] sm:$0xff]  ;;  %v3345_v58 = vmax.f32 %v3313_v19, %v6371_v4  ;;  %v3315_v16 = vmax.f32 %v6353_v55, %v6371_v4 }
 0x1ff   : > { %v3081_v5 = vld [vmem:[#allocation2 + $0x130] sm:$0xff]  ;;  %v6387_v1 = vmax.f32 %v3199_v54, %v3239_v30  ;;  %v6393_v12 = vmax.f32 %v3200_v8, %v3240_v47  ;;  %v3082_v49 = vld [vmem:[#allocation2 + $0x148] sm:$0xff]  ;;  %4757 = vmatmul.mubr.msk.f32.gmra.mrb[22].mxu1 %vm225_vm1, %v3405_v63 }
 0x200   : > { %v3121_v42 = vmax.f32 %v3041_v28, %v3081_v5  ;;  %v3161_v32 = vld [vmem:[#allocation2 + $0x131] sm:$0xff]  ;;  %v3406_v15 = vmax.f32 %v3374_v26, %v6382_v56  ;;  %v3122_v50 = vmax.f32 %v3042_v45, %v3082_v49  ;;  %v3376_v7 = vmax.f32 %v3344_v44, %v6382_v56  ;;  %v3162_v51 = vld [vmem:[#allocation2 + $0x149] sm:$0xff] }
 0x201   : > { %v2963_v46 = vld [vmem:[#allocation2 + $0x14e] sm:$0xff]  ;;  %v3407_v40 = vmax.f32 %v3375_v29, %v6387_v1  ;;  %v3346_v9 = vmax.f32 %v3314_v57, %v6382_v56  ;;  %v3377_v61 = vmax.f32 %v3345_v58, %v6387_v1  ;;  %v2966_v0 = vld [vmem:[#allocation2 + $0x186] sm:$0xff]  ;;  %v3347_v11 = vmax.f32 %v3315_v16, %v6387_v1 }
 0x202   : > { %v3003_v17 = vld [vmem:[#allocation2 + $0x14f] sm:$0xff]  ;;  %v3201_v39 = vmax.f32 %v3121_v42, %v3161_v32  ;;  %v3202_v53 = vmax.f32 %v3122_v50, %v3162_v51  ;;  %4759 = vmatprep.mubr.msk.f32.mxu1 %vm225_vm1, %v3406_v15  ;;  %v3408_v59 = vmax.f32 %v3376_v7, %v6393_v12  ;;  %v3006_v18 = vld [vmem:[#allocation2 + $0x187] sm:$0xff]  ;;  %v3316_v23 = vmax.f32 %v6364_v38, %v6382_v56 }
 0x203   : > { %v3043_v52 = vmax.f32 %v2963_v46, %v3003_v17  ;;  %v2965_v14 = vld [vmem:[#allocation2 + $0x16e] sm:$0xff]  ;;  %v3378_v13 = vmax.f32 %v3346_v9, %v6393_v12  ;;  %v3317_v6 = vmax.f32 %v6371_v4, %v6387_v1  ;;  %4760 = vmatmul.mubr.msk.f32.gmra.mrb[24].mxu1 %vm225_vm1, %v3407_v40  ;;  %v3046_v8 = vmax.f32 %v2966_v0, %v3006_v18  ;;  %v2968_v44 = vld [vmem:[#allocation2 + $0x1a6] sm:$0xff] }
 0x204   : > { %v3005_v20 = vld [vmem:[#allocation2 + $0x16f] sm:$0xff]  ;;  %v6404_v22 = vmax.f32 %v3201_v39, %v3241_v33  ;;  %4762 = vmatprep.mubr.msk.f32.mxu1 %vm225_vm1, %v3408_v59  ;;  %v3348_v31 = vmax.f32 %v3316_v23, %v6393_v12  ;;  %v3008_v49 = vld [vmem:[#allocation2 + $0x1a7] sm:$0xff]  ;;  %v3318_v10 = vmax.f32 %v6382_v56, %v6393_v12 }
 0x205   : > { %v3242_v43 = vld [vmem:[#allocation2 + $0x14a] sm:$0xff]  ;;  %v3045_v41 = vmax.f32 %v2965_v14, %v3005_v20  ;;  %v3243_v25 = vld [vmem:[#allocation2 + $0x152] sm:$0xff]  ;;  %v3048_v20 = vmax.f32 %v2968_v44, %v3008_v49 }
 0x206   : > { %v3083_v36 = vld [vmem:[#allocation2 + $0x150] sm:$0xff]  ;;  %v3084_v60 = vld [vmem:[#allocation2 + $0x168] sm:$0xff]  ;;  %v6412_v34 = vmax.f32 %v3202_v53, %v3242_v43  ;;  %v3409_v21 = vmax.f32 %v3377_v61, %v6404_v22  ;;  %v3379_v48 = vmax.f32 %v3347_v11, %v6404_v22  ;;  %v3349_v42 = vmax.f32 %v3317_v6, %v6404_v22 }
 0x207   : > { %v3123_v2 = vmax.f32 %v3043_v52, %v3083_v36  ;;  %v3163_v62 = vld [vmem:[#allocation2 + $0x151] sm:$0xff]  ;;  %v3124_v24 = vmax.f32 %v3044_v3, %v3084_v60  ;;  %v3164_v55 = vld [vmem:[#allocation2 + $0x169] sm:$0xff]  ;;  %v3319_v39 = vmax.f32 %v6387_v1, %v6404_v22 }
 0x208   : > { %v3085_v37 = vld [vmem:[#allocation2 + $0x170] sm:$0xff]  ;;  %v3410_v47 = vmax.f32 %v3378_v13, %v6412_v34  ;;  %v3086_v32 = vld [vmem:[#allocation2 + $0x188] sm:$0xff]  ;;  %v3380_v27 = vmax.f32 %v3348_v31, %v6412_v34  ;;  %4763 = vmatmul.mubr.msk.f32.gmra.mrb[26].mxu1 %vm225_vm1, %v3409_v21  ;;  %v3350_v56 = vmax.f32 %v3318_v10, %v6412_v34  ;;  %v3320_v59 = vmax.f32 %v6393_v12, %v6412_v34 }
 0x209   : > { %v3203_v35 = vmax.f32 %v3123_v2, %v3163_v62  ;;  %v2967_v26 = vld [vmem:[#allocation2 + $0x18e] sm:$0xff]  ;;  %v3204_v28 = vmax.f32 %v3124_v24, %v3164_v55  ;;  %v3125_v30 = vmax.f32 %v3045_v41, %v3085_v37  ;;  %v3126_v46 = vmax.f32 %v3046_v8, %v3086_v32  ;;  %v2970_v53 = vld [vmem:[#allocation2 + $0x1c6] sm:$0xff] }
 0x20a   : > { %v3007_v54 = vld [vmem:[#allocation2 + $0x18f] sm:$0xff]  ;;  %4765 = vmatprep.mubr.msk.f32.mxu1 %vm225_vm1, %v3410_v47  ;;  %v3010_v43 = vld [vmem:[#allocation2 + $0x1c7] sm:$0xff] }
 0x20b   : > { %v3244_v63 = vld [vmem:[#allocation2 + $0x16a] sm:$0xff]  ;;  %v6424_v38 = vmax.f32 %v3203_v35, %v3243_v25  ;;  %v3245_v5 = vld [vmem:[#allocation2 + $0x172] sm:$0xff]  ;;  %v3047_v29 = vmax.f32 %v2967_v26, %v3007_v54  ;;  %v3050_v23 = vmax.f32 %v2970_v53, %v3010_v43 }
 0x20c   : > { %v3165_v4 = vld [vmem:[#allocation2 + $0x171] sm:$0xff]  ;;  %v6428_v19 = vmax.f32 %v3204_v28, %v3244_v63  ;;  %v3166_v17 = vld [vmem:[#allocation2 + $0x189] sm:$0xff] }
 0x20d   : > { %v3205_v45 = vmax.f32 %v3125_v30, %v3165_v4  ;;  %v3411_v57 = vmax.f32 %v3379_v48, %v6424_v38  ;;  %v3087_v15 = vld [vmem:[#allocation2 + $0x190] sm:$0xff]  ;;  %v3381_v40 = vmax.f32 %v3349_v42, %v6424_v38  ;;  %v3206_v7 = vmax.f32 %v3126_v46, %v3166_v17  ;;  %v3088_v3 = vld [vmem:[#allocation2 + $0x1a8] sm:$0xff] }
 0x20e   : > { %v2969_v33 = vld [vmem:[#allocation2 + $0x1ae] sm:$0xff]  ;;  %v3127_v9 = vmax.f32 %v3047_v29, %v3087_v15  ;;  %v3412_v52 = vmax.f32 %v3380_v27, %v6428_v19  ;;  %v3351_v1 = vmax.f32 %v3319_v39, %v6424_v38  ;;  %v3382_v2 = vmax.f32 %v3350_v56, %v6428_v19  ;;  %v2972_v48 = vld [vmem:[#allocation2 + $0x1e6] sm:$0xff] }
 0x20f   : > { %v3009_v58 = vld [vmem:[#allocation2 + $0x1af] sm:$0xff]  ;;  %v6437_v50 = vmax.f32 %v3205_v45, %v3245_v5  ;;  %v3128_v0 = vmax.f32 %v3048_v20, %v3088_v3  ;;  %4766 = vmatmul.mubr.msk.f32.gmra.mrb[28].mxu1 %vm225_vm1, %v3411_v57  ;;  %v3352_v41 = vmax.f32 %v3320_v59, %v6428_v19  ;;  %v3321_v12 = vmax.f32 %v6404_v22, %v6424_v38  ;;  %v3012_v28 = vld [vmem:[#allocation2 + $0x1e7] sm:$0xff] }
 0x210   : > { %v3246_v51 = vld [vmem:[#allocation2 + $0x18a] sm:$0xff]  ;;  %v3049_v61 = vmax.f32 %v2969_v33, %v3009_v58  ;;  %v3247_v24 = vld [vmem:[#allocation2 + $0x192] sm:$0xff]  ;;  %4768 = vmatprep.mubr.msk.f32.mxu1 %vm225_vm1, %v3412_v52  ;;  %v3322_v25 = vmax.f32 %v6412_v34, %v6428_v19  ;;  %v3052_v57 = vmax.f32 %v2972_v48, %v3012_v28 }
 0x211   : > { %v3167_v14 = vld [vmem:[#allocation2 + $0x191] sm:$0xff]  ;;  %v6444_v36 = vmax.f32 %v3206_v7, %v3246_v51  ;;  %v3413_v13 = vmax.f32 %v3381_v40, %v6437_v50  ;;  %v3383_v60 = vmax.f32 %v3351_v1, %v6437_v50  ;;  %v3168_v55 = vld [vmem:[#allocation2 + $0x1a9] sm:$0xff]  ;;  %v3353_v5 = vmax.f32 %v3321_v12, %v6437_v50 }
 0x212   : > { %v3207_v16 = vmax.f32 %v3127_v9, %v3167_v14  ;;  %v3089_v18 = vld [vmem:[#allocation2 + $0x1b0] sm:$0xff]  ;;  %v3208_v26 = vmax.f32 %v3128_v0, %v3168_v55  ;;  %v3090_v54 = vld [vmem:[#allocation2 + $0x1c8] sm:$0xff]  ;;  %v3323_v34 = vmax.f32 %v6424_v38, %v6437_v50 }
 0x213   : > { %v2971_v62 = vld [vmem:[#allocation2 + $0x1ce] sm:$0xff]  ;;  %v3129_v21 = vmax.f32 %v3049_v61, %v3089_v18  ;;  %v3414_v37 = vmax.f32 %v3382_v2, %v6444_v36  ;;  %v3384_v30 = vmax.f32 %v3352_v41, %v6444_v36  ;;  %v3130_v22 = vmax.f32 %v3050_v23, %v3090_v54  ;;  %4769 = vmatmul.mubr.msk.f32.gmra.mrb[30].mxu1 %vm225_vm1, %v3413_v13  ;;  %v2974_v40 = vld [vmem:[#allocation2 + $0x206] sm:$0xff] }
 0x214   : > { %v3011_v11 = vld [vmem:[#allocation2 + $0x1cf] sm:$0xff]  ;;  %v6457_v6 = vmax.f32 %v3207_v16, %v3247_v24  ;;  %v3354_v45 = vmax.f32 %v3322_v25, %v6444_v36  ;;  %v3324_v38 = vmax.f32 %v6428_v19, %v6444_v36  ;;  %v3014_v7 = vld [vmem:[#allocation2 + $0x207] sm:$0xff] }
 0x215   : > { %v3169_v35 = vld [vmem:[#allocation2 + $0x1b1] sm:$0xff]  ;;  %v3051_v31 = vmax.f32 %v2971_v62, %v3011_v11  ;;  %v3170_v42 = vld [vmem:[#allocation2 + $0x1c9] sm:$0xff]  ;;  %4771 = vmatprep.mubr.msk.f32.mxu1 %vm225_vm1, %v3414_v37 }
 0x216   : > { %v3248_v63 = vld [vmem:[#allocation2 + $0x1aa] sm:$0xff]  ;;  %v3209_v8 = vmax.f32 %v3129_v21, %v3169_v35  ;;  %v3249_v47 = vld [vmem:[#allocation2 + $0x1b2] sm:$0xff]  ;;  %v3210_v29 = vmax.f32 %v3130_v22, %v3170_v42  ;;  %v3415_v15 = vmax.f32 %v3383_v60, %v6457_v6  ;;  %v3385_v39 = vmax.f32 %v3353_v5, %v6457_v6 }
 0x217   : > { %v6462_v4 = vmax.f32 %v3208_v26, %v3248_v63  ;;  %v3250_v32 = vld [vmem:[#allocation2 + $0x1ca] sm:$0xff]  ;;  %v3251_v52 = vld [vmem:[#allocation2 + $0x1d2] sm:$0xff]  ;;  %v3355_v56 = vmax.f32 %v3323_v34, %v6457_v6  ;;  %v3325_v16 = vmax.f32 %v6437_v50, %v6457_v6  ;;  %v3054_v60 = vmax.f32 %v2974_v40, %v3014_v7 }
 0x218   : > { %v3091_v46 = vld [vmem:[#allocation2 + $0x1d0] sm:$0xff]  ;;  %v6469_v17 = vmax.f32 %v3209_v8, %v3249_v47  ;;  %v3092_v58 = vld [vmem:[#allocation2 + $0x1e8] sm:$0xff]  ;;  %v6477_v51 = vmax.f32 %v3210_v29, %v3250_v32  ;;  %4772 = vmatmul.mubr.msk.f32.gmra.mrb[0].mxu1 %vm225_vm1, %v3415_v15 }
 0x219   : > { %v3131_v44 = vmax.f32 %v3051_v31, %v3091_v46  ;;  %v3171_v49 = vld [vmem:[#allocation2 + $0x1d1] sm:$0xff]  ;;  %v3386_v33 = vmax.f32 %v3354_v45, %v6462_v4  ;;  %v3132_v14 = vmax.f32 %v3052_v57, %v3092_v58  ;;  %v3416_v1 = vmax.f32 %v3384_v30, %v6462_v4  ;;  %v3172_v20 = vld [vmem:[#allocation2 + $0x1e9] sm:$0xff] }
 0x21a   : > { %v2973_v27 = vld [vmem:[#allocation2 + $0x1ee] sm:$0xff]  ;;  %v3356_v53 = vmax.f32 %v3324_v38, %v6462_v4  ;;  %v3387_v61 = vmax.f32 %v3355_v56, %v6469_v17  ;;  %v3417_v0 = vmax.f32 %v3385_v39, %v6469_v17  ;;  %v6491_v62 = vmax.f32 %v3325_v16, %v6469_v17  ;;  %v2976_v24 = vld [vmem:[#allocation2 + $0x226] sm:$0xff] }
 0x21b   : > { %v3013_v10 = vld [vmem:[#allocation2 + $0x1ef] sm:$0xff]  ;;  %v3211_v9 = vmax.f32 %v3131_v44, %v3171_v49  ;;  %v3212_v13 = vmax.f32 %v3132_v14, %v3172_v20  ;;  %4774 = vmatprep.mubr.msk.f32.mxu1 %vm225_vm1, %v3416_v1  ;;  %v3326_v11 = vmax.f32 %v6444_v36, %v6462_v4  ;;  %v3016_v55 = vld [vmem:[#allocation2 + $0x227] sm:$0xff]  ;;  %v3418_v41 = vmax.f32 %v3386_v33, %v6477_v51 }
 0x21c   : > { %v3053_v43 = vmax.f32 %v2973_v27, %v3013_v10  ;;  %v2975_v3 = vld [vmem:[#allocation2 + $0x20e] sm:$0xff]  ;;  %v3388_v35 = vmax.f32 %v3356_v53, %v6477_v51  ;;  %v3327_v36 = vmax.f32 %v6457_v6, %v6469_v17  ;;  %4775 = vmatmul.mubr.msk.f32.gmra.mrb[2].mxu1 %vm225_vm1, %v3417_v0  ;;  %v3056_v5 = vmax.f32 %v2976_v24, %v3016_v55  ;;  %v2978_v42 = vld [vmem:[#allocation2 + $0x246] sm:$0xff] }
 0x21d   : > { %v3015_v19 = vld [vmem:[#allocation2 + $0x20f] sm:$0xff]  ;;  %v6485_v59 = vmax.f32 %v3211_v9, %v3251_v52  ;;  %v3358_v48 = vmax.f32 %v3326_v11, %v6477_v51  ;;  %4777 = vmatprep.mubr.msk.f32.mxu1 %vm225_vm1, %v3418_v41  ;;  %v3328_v44 = vmax.f32 %v6462_v4, %v6477_v51  ;;  %v3018_v15 = vld [vmem:[#allocation2 + $0x247] sm:$0xff] }
 0x21e   : > { %v3093_v2 = vld [vmem:[#allocation2 + $0x1f0] sm:$0xff]  ;;  %v3094_v50 = vld [vmem:[#allocation2 + $0x208] sm:$0xff]  ;;  %v3055_v26 = vmax.f32 %v2975_v3, %v3015_v19 }
 0x21f   : > { %v3133_v18 = vmax.f32 %v3053_v43, %v3093_v2  ;;  %v3252_v21 = vld [vmem:[#allocation2 + $0x1ea] sm:$0xff]  ;;  %v3134_v23 = vmax.f32 %v3054_v60, %v3094_v50  ;;  %v3419_v8 = vmax.f32 %v3387_v61, %v6485_v59  ;;  %v3253_v47 = vld [vmem:[#allocation2 + $0x1f2] sm:$0xff]  ;;  %v3389_v45 = vmax.f32 %v6491_v62, %v6485_v59 }
 0x220   : > { %v3173_v12 = vld [vmem:[#allocation2 + $0x1f1] sm:$0xff]  ;;  %v3174_v37 = vld [vmem:[#allocation2 + $0x209] sm:$0xff]  ;;  %v6497_v54 = vmax.f32 %v3212_v13, %v3252_v21  ;;  %v3359_v34 = vmax.f32 %v3327_v36, %v6485_v59  ;;  %v3329_v4 = vmax.f32 %v6469_v17, %v6485_v59  ;;  %v3058_v2 = vmax.f32 %v2978_v42, %v3018_v15 }
 0x221   : > { %v3213_v25 = vmax.f32 %v3133_v18, %v3173_v12  ;;  %v3095_v28 = vld [vmem:[#allocation2 + $0x210] sm:$0xff]  ;;  %v3214_v22 = vmax.f32 %v3134_v23, %v3174_v37  ;;  %v3096_v29 = vld [vmem:[#allocation2 + $0x228] sm:$0xff]  ;;  %4778 = vmatmul.mubr.msk.f32.gmra.mrb[4].mxu1 %vm225_vm1, %v3419_v8 }
 0x222   : > { %v2977_v63 = vld [vmem:[#allocation2 + $0x22e] sm:$0xff]  ;;  %v3135_v31 = vmax.f32 %v3055_v26, %v3095_v28  ;;  %v3136_v27 = vmax.f32 %v3056_v5, %v3096_v29  ;;  %v3420_v58 = vmax.f32 %v3388_v35, %v6497_v54  ;;  %v3390_v38 = vmax.f32 %v3358_v48, %v6497_v54  ;;  %v2980_v16 = vld [vmem:[#allocation2 + $0x266] sm:$0xff] }
 0x223   : > { %v3017_v30 = vld [vmem:[#allocation2 + $0x22f] sm:$0xff]  ;;  %v6505_v32 = vmax.f32 %v3213_v25, %v3253_v47  ;;  %v3360_v9 = vmax.f32 %v3328_v44, %v6497_v54  ;;  %v3330_v17 = vmax.f32 %v6477_v51, %v6497_v54  ;;  %v3020_v60 = vld [vmem:[#allocation2 + $0x267] sm:$0xff] }
 0x224   : > { %v3254_v46 = vld [vmem:[#allocation2 + $0x20a] sm:$0xff]  ;;  %v3057_v10 = vmax.f32 %v2977_v63, %v3017_v30  ;;  %v3255_v40 = vld [vmem:[#allocation2 + $0x212] sm:$0xff]  ;;  %4780 = vmatprep.mubr.msk.f32.mxu1 %vm225_vm1, %v3420_v58  ;;  %v3060_v36 = vmax.f32 %v2980_v16, %v3020_v60 }
 0x225   : > { %v3175_v6 = vld [vmem:[#allocation2 + $0x211] sm:$0xff]  ;;  %v6512_v49 = vmax.f32 %v3214_v22, %v3254_v46  ;;  %v3176_v7 = vld [vmem:[#allocation2 + $0x229] sm:$0xff]  ;;  %v3391_v14 = vmax.f32 %v3359_v34, %v6505_v32  ;;  %v3361_v13 = vmax.f32 %v3329_v4, %v6505_v32  ;;  %v3421_v0 = vmax.f32 %v3389_v45, %v6505_v32 }
 0x226   : > { %v3215_v57 = vmax.f32 %v3135_v31, %v3175_v6  ;;  %v2979_v39 = vld [vmem:[#allocation2 + $0x24e] sm:$0xff]  ;;  %v3216_v1 = vmax.f32 %v3136_v27, %v3176_v7  ;;  %v3331_v35 = vmax.f32 %v6485_v59, %v6505_v32 }
 0x227   : > { %v3019_v33 = vld [vmem:[#allocation2 + $0x24f] sm:$0xff]  ;;  %v3392_v19 = vmax.f32 %v3360_v9, %v6512_v49  ;;  %v3422_v55 = vmax.f32 %v3390_v38, %v6512_v49  ;;  %v3362_v21 = vmax.f32 %v3330_v17, %v6512_v49  ;;  %4781 = vmatmul.mubr.msk.f32.gmra.mrb[6].mxu1 %vm225_vm1, %v3421_v0  ;;  %v3332_v59 = vmax.f32 %v6497_v54, %v6512_v49 }
 0x228   : > { %v3097_v52 = vld [vmem:[#allocation2 + $0x230] sm:$0xff]  ;;  %v3295_v56 = vmax.f32 %v3215_v57, %v3255_v40  ;;  %v3098_v53 = vld [vmem:[#allocation2 + $0x248] sm:$0xff]  ;;  %v3059_v11 = vmax.f32 %v2979_v39, %v3019_v33 }
 0x229   : > { %v3137_v20 = vmax.f32 %v3057_v10, %v3097_v52  ;;  %v3099_v43 = vld [vmem:[#allocation2 + $0x250] sm:$0xff]  ;;  %v3138_v41 = vmax.f32 %v3058_v2, %v3098_v53  ;;  %v3100_v12 = vld [vmem:[#allocation2 + $0x268] sm:$0xff]  ;;  %4783 = vmatprep.mubr.msk.f32.mxu1 %vm225_vm1, %v3422_v55 }
 0x22a   : > { %v3256_v3 = vld [vmem:[#allocation2 + $0x22a] sm:$0xff]  ;;  %v3423_v51 = vmax.f32 %v3391_v14, %v3295_v56  ;;  %v3257_v26 = vld [vmem:[#allocation2 + $0x232] sm:$0xff]  ;;  %v3393_v25 = vmax.f32 %v3361_v13, %v3295_v56  ;;  %v3139_v28 = vmax.f32 %v3059_v11, %v3099_v43  ;;  %v3363_v5 = vmax.f32 %v3331_v35, %v3295_v56 }
 0x22b   : > { %v3177_v61 = vld [vmem:[#allocation2 + $0x231] sm:$0xff]  ;;  %v3296_v18 = vmax.f32 %v3216_v1, %v3256_v3  ;;  %v3178_v50 = vld [vmem:[#allocation2 + $0x249] sm:$0xff]  ;;  %v3140_v42 = vmax.f32 %v3060_v36, %v3100_v12  ;;  %v3333_v57 = vmax.f32 %v6505_v32, %v3295_v56 }
 0x22c   : > { %v3217_v62 = vmax.f32 %v3137_v20, %v3177_v61  ;;  %v3179_v24 = vld [vmem:[#allocation2 + $0x251] sm:$0xff]  ;;  %v3218_v8 = vmax.f32 %v3138_v41, %v3178_v50  ;;  %v3180_v47 = vld [vmem:[#allocation2 + $0x269] sm:$0xff]  ;;  %4784 = vmatmul.mubr.msk.f32.gmra.mrb[8].mxu1 %vm225_vm1, %v3423_v51 }
 0x22d   : > { %v2981_v23 = vld [vmem:[#allocation2 + $0x26e] sm:$0xff]  ;;  %v3424_v63 = vmax.f32 %v3392_v19, %v3296_v18  ;;  %v3219_v31 = vmax.f32 %v3139_v28, %v3179_v24  ;;  %v3394_v6 = vmax.f32 %v3362_v21, %v3296_v18  ;;  %v3364_v29 = vmax.f32 %v3332_v59, %v3296_v18 }
 0x22e   : > { %v3021_v37 = vld [vmem:[#allocation2 + $0x26f] sm:$0xff]  ;;  %v3297_v30 = vmax.f32 %v3217_v62, %v3257_v26  ;;  %v3220_v27 = vmax.f32 %v3140_v42, %v3180_v47 }
 0x22f   : > { %v3258_v48 = vld [vmem:[#allocation2 + $0x24a] sm:$0xff]  ;;  %v3061_v45 = vmax.f32 %v2981_v23, %v3021_v37  ;;  %v3259_v34 = vld [vmem:[#allocation2 + $0x252] sm:$0xff]  ;;  %4786 = vmatprep.mubr.msk.f32.mxu1 %vm225_vm1, %v3424_v63 }
 0x230   : > { %v3101_v22 = vld [vmem:[#allocation2 + $0x270] sm:$0xff]  ;;  %v3298_v46 = vmax.f32 %v3218_v8, %v3258_v48  ;;  %v3425_v54 = vmax.f32 %v3393_v25, %v3297_v30  ;;  %v3299_v49 = vmax.f32 %v3219_v31, %v3259_v34  ;;  %v3395_v39 = vmax.f32 %v3363_v5, %v3297_v30  ;;  %v6588_v8 = vld [vmem:[%s6849_s4] ss:$0 sm:$0xff] }
 0x231   : > { %v3181_v44 = vld [vmem:[#allocation2 + $0x271] sm:$0xff]  ;;  %v3141_v15 = vmax.f32 %v3061_v45, %v3101_v22  ;;  %v3365_v58 = vmax.f32 %v3333_v57, %v3297_v30  ;;  %v6543_v1 = vpop.f32.mrb[48].mxu0 }
 0x232   : > { %v3260_v10 = vld [vmem:[#allocation2 + $0x26a] sm:$0xff]  ;;  %v3426_v38 = vmax.f32 %v3394_v6, %v3298_v46  ;;  %v3396_v7 = vmax.f32 %v3364_v29, %v3298_v46  ;;  %v3261_v9 = vld [vmem:[#allocation2 + $0x272] sm:$0xff]  ;;  %4787 = vmatmul.mubr.msk.f32.gmra.mrb[10].mxu1 %vm225_vm1, %v3425_v54  ;;  %v3427_v32 = vmax.f32 %v3395_v39, %v3299_v49  ;;  %v6545_v20 = vpop.f32.mrb[49].mxu0 }
 0x233   : > { %v3221_v33 = vmax.f32 %v3141_v15, %v3181_v44  ;;  %v3300_v40 = vmax.f32 %v3220_v27, %v3260_v10  ;;  %v3397_v4 = vmax.f32 %v3365_v58, %v3299_v49 }
 0x234   : > { %4789 = vmatprep.mubr.msk.f32.mxu1 %vm225_vm1, %v3426_v38 }
 0x235   : > { %v3301_v52 = vmax.f32 %v3221_v33, %v3261_v9  ;;  %v3428_v56 = vmax.f32 %v3396_v7, %v3300_v40 }
 0x236   : > { %4790 = vmatmul.mubr.msk.f32.gmra.mrb[12].mxu1 %vm225_vm1, %v3427_v32 }
 0x237   : > { %4792 = vmatprep.mubr.msk.f32.mxu1 %vm225_vm1, %v3428_v56  ;;  %v3429_v14 = vmax.f32 %v3397_v4, %v3301_v52 }
 0x23a   : > { %4793 = vmatmul.mubr.msk.f32.gmra.mrb[14].mxu1 %vm225_vm1, %v3429_v14 }
 0x23f   : > { %v6547_v53 = vpop.f32.mrb[50].mxu0 }
 0x240   : > { %v6549_v43 = vpop.f32.mrb[51].mxu0 }
 0x251   : > { %v6551_v16 = vpop.f32.mrb[52].mxu0 }
 0x252   : > { %v6553_v3 = vpop.f32.mrb[53].mxu0 }
 0x259   : > { %v6555_v19 = vpop.f32.mrb[54].mxu0 }
 0x25a   : > { %v6557_v61 = vpop.f32.mrb[55].mxu0 }
 0x263   : > { %v6559_v13 = vpop.f32.mrb[56].mxu0 }
 0x264   : > { %v6561_v2 = vpop.f32.mrb[57].mxu0 }
 0x270   : > { %v6563_v17 = vpop.f32.mrb[58].mxu0 }
 0x271   : > { %v6565_v60 = vpop.f32.mrb[59].mxu0 }
 0x274   : > { %v6567_v0 = vpop.f32.mrb[60].mxu0 }
 0x275   : > { %v6569_v18 = vpop.f32.mrb[61].mxu0 }
 0x27c   : > { %v6571_v62 = vpop.f32.mrb[62].mxu0 }
 0x27d   : > { %v6573_v50 = vpop.f32.mrb[63].mxu0 }
 0x280   : > { %v4649_v11 = vpop.f32.mrb[32].mxu0 }
 0x281   : > { %v1874_v24 = vpop.f32.mrb[33].mxu0 }
 0x284   : > { %v4652_v55 = vpop.f32.mrb[34].mxu0 }
 0x285   : > { %v1884_v41 = vpop.f32.mrb[35].mxu0 }
 0x288   : > { %v4655_v21 = vpop.f32.mrb[36].mxu0 }
 0x289   : > { %v1894_v35 = vpop.f32.mrb[37].mxu0 }
 0x28e   : > { %v4658_v12 = vpop.f32.mrb[38].mxu0 }
 0x28f   : > { %v1904_v23 = vpop.f32.mrb[39].mxu0 }
 0x293   : > { %v4661_v37 = vpop.f32.mrb[40].mxu0 }
 0x294   : > { %v1914_v51 = vpop.f32.mrb[41].mxu0 }
 0x29b   : > { %v4664_v26 = vpop.f32.mrb[42].mxu0 }
 0x29c   : > { %v6575_v25 = vpop.f32.mrb[43].mxu0 }
 0x29f   : > { %v6577_v48 = vpop.f32.mrb[44].mxu0 }
 0x2a0   : > { %v6579_v28 = vpop.f32.mrb[45].mxu0 }
 0x2a5   : > { %v6581_v36 = vpop.f32.mrb[46].mxu0 }
 0x2a6   : > { %v6583_v63 = vpop.f32.mrb[47].mxu0 }
 0x2c6   : > { %v4749_v30 = vpop.f32.mrb[16].mxu1 }
 0x2c7   : > { %v4797_v47 = vadd.f32 %v4749_v30, %v4649_v11  ;;  %v3596_v59 = vpop.f32.mrb[17].mxu1 }
 0x2c8   : > { %v4798_v22 = vadd.f32 %v3596_v59, %v1874_v24 }
 0x2c9   : > { %v6591_v31 = vadd.f32 %v4797_v47, %v6588_v8 }
 0x2ca   : > { %v6594_v5 = vadd.f32 %v4798_v22, %v6588_v8  ;;  %v4752_v42 = vpop.f32.mrb[18].mxu1 }
 0x2cb   : > { %v4345_v45 = vmul.f32 -1.442695, %v6591_v31  ;;  %v4799_v46 = vadd.f32 %v4752_v42, %v4652_v55  ;;  %v3606_v6 = vpop.f32.mrb[19].mxu1 }
 0x2cc   : > { %v4344_v34 = vmul.f32 -1.442695, %v6594_v5  ;;  %v4800_v29 = vadd.f32 %v3606_v6, %v1884_v41 }
 0x2cd   : > { %5030 = vpow2.f32 %v4345_v45  ;;  %v6599_v44 = vadd.f32 %v4799_v46, %v6588_v8 }
 0x2ce   : > { %5032 = vpow2.f32 %v4344_v34  ;;  %v6602_v57 = vadd.f32 %v4800_v29, %v6588_v8  ;;  %v4755_v27 = vpop.f32.mrb[20].mxu1 }
 0x2cf   : > { %v4347_v10 = vmul.f32 -1.442695, %v6599_v44  ;;  %v4801_v15 = vadd.f32 %v4755_v27, %v4655_v21  ;;  %v3616_v54 = vpop.f32.mrb[21].mxu1 }
 0x2d0   : > { %v4346_v49 = vmul.f32 -1.442695, %v6602_v57  ;;  %v4802_v39 = vadd.f32 %v3616_v54, %v1894_v35 }
 0x2d1   : > { %5034 = vpow2.f32 %v4347_v10  ;;  %v6607_v33 = vadd.f32 %v4801_v15, %v6588_v8 }
 0x2d2   : > { %5036 = vpow2.f32 %v4346_v49  ;;  %v6610_v58 = vadd.f32 %v4802_v39, %v6588_v8  ;;  %v4758_v38 = vpop.f32.mrb[22].mxu1 }
 0x2d3   : > { %v4349_v40 = vmul.f32 -1.442695, %v6607_v33  ;;  %v4803_v7 = vadd.f32 %v4758_v38, %v4658_v12  ;;  %v3626_v9 = vpop.f32.mrb[23].mxu1 }
 0x2d4   : > { %v4348_v32 = vmul.f32 -1.442695, %v6610_v58  ;;  %v4804_v52 = vadd.f32 %v3626_v9, %v1904_v23 }
 0x2d5   : > { %5038 = vpow2.f32 %v4349_v40  ;;  %v6615_v4 = vadd.f32 %v4803_v7, %v6588_v8 }
 0x2d6   : > { %5040 = vpow2.f32 %v4348_v32  ;;  %v6618_v56 = vadd.f32 %v4804_v52, %v6588_v8  ;;  %v4761_v14 = vpop.f32.mrb[24].mxu1 }
 0x2d7   : > { %v5031_v11 = vpop.eup %5030  ;;  %v4351_v24 = vmul.f32 -1.442695, %v6615_v4  ;;  %v4805_v55 = vadd.f32 %v4761_v14, %v4661_v37  ;;  %v3636_v41 = vpop.f32.mrb[25].mxu1 }
 0x2d8   : > { %v5033_v21 = vpop.eup %5032  ;;  %v3923_v35 = vadd.f32 1.0, %v5031_v11  ;;  %v4350_v12 = vmul.f32 -1.442695, %v6618_v56  ;;  %v4806_v30 = vadd.f32 %v3636_v41, %v1914_v51 }
 0x2d9   : > { %v3922_v23 = vadd.f32 1.0, %v5033_v21  ;;  %5042 = vpow2.f32 %v4351_v24  ;;  %v6623_v47 = vadd.f32 %v4805_v55, %v6588_v8 }
 0x2da   : > { %5044 = vrcp.f32 %v3923_v35  ;;  %v6626_v59 = vadd.f32 %v4806_v30, %v6588_v8 }
 0x2db   : > { %v4764_v22 = vpop.f32.mrb[26].mxu1  ;;  %v5035_v42 = vpop.eup %5034  ;;  %5046 = vrcp.f32 %v3922_v23  ;;  %v4353_v37 = vmul.f32 -1.442695, %v6623_v47 }
 0x2dc   : > { %v4807_v45 = vadd.f32 %v4764_v22, %v4664_v26  ;;  %v3646_v46 = vpop.f32.mrb[27].mxu1  ;;  %v5037_v6 = vpop.eup %5036  ;;  %v3925_v34 = vadd.f32 1.0, %v5035_v42  ;;  %5048 = vpow2.f32 %v4350_v12  ;;  %v4352_v51 = vmul.f32 -1.442695, %v6626_v59 }
 0x2dd   : > { %v4808_v29 = vadd.f32 %v3646_v46, %v6575_v25  ;;  %v3924_v27 = vadd.f32 1.0, %v5037_v6  ;;  %5050 = vpow2.f32 %v4353_v37 }
 0x2de   : > { %v6632_v10 = vadd.f32 %v4807_v45, %v6588_v8  ;;  %5052 = vrcp.f32 %v3925_v34 }
 0x2df   : > { %v6635_v15 = vadd.f32 %v4808_v29, %v6588_v8  ;;  %v5039_v49 = vpop.eup %5038  ;;  %5054 = vrcp.f32 %v3924_v27 }
 0x2e0   : > { %v4355_v26 = vmul.f32 -1.442695, %v6632_v10  ;;  %v5041_v40 = vpop.eup %5040  ;;  %v3927_v7 = vadd.f32 1.0, %v5039_v49  ;;  %5056 = vpow2.f32 %v4352_v51 }
 0x2e1   : > { %v4354_v25 = vmul.f32 -1.442695, %v6635_v15  ;;  %v3926_v32 = vadd.f32 1.0, %v5041_v40 }
 0x2e2   : > { %v4767_v54 = vpop.f32.mrb[28].mxu1  ;;  %5058 = vpow2.f32 %v4355_v26 }
 0x2e3   : > { %v4809_v39 = vadd.f32 %v4767_v54, %v6577_v48  ;;  %v3656_v38 = vpop.f32.mrb[29].mxu1  ;;  %5060 = vrcp.f32 %v3927_v7  ;;  %v5043_v48 = vpop.eup %5042 }
 0x2e4   : > { %v4810_v9 = vadd.f32 %v3656_v38, %v6579_v28  ;;  %5062 = vrcp.f32 %v3926_v32  ;;  %v5045_v21 = vpop.eup %5044  ;;  %v3929_v28 = vadd.f32 1.0, %v5043_v48 }
 0x2e5   : > { %v6642_v52 = vadd.f32 %v4809_v39, %v6588_v8  ;;  %5064 = vpow2.f32 %v4354_v25  ;;  %v5047_v30 = vpop.eup %5046  ;;  %v4019_v23 = vmul.f32 %v5045_v21, %v6591_v31 }
 0x2e6   : > { %v6645_v14 = vadd.f32 %v4810_v9, %v6588_v8  ;;  %v4770_v11 = vpop.f32.mrb[30].mxu1  ;;  %v5049_v22 = vpop.eup %5048  ;;  %v4018_v42 = vmul.f32 %v5047_v30, %v6594_v5 }
 0x2e7   : > { %v4357_v24 = vmul.f32 -1.442695, %v6642_v52  ;;  %v4811_v55 = vadd.f32 %v4770_v11, %v6581_v36  ;;  %v3666_v41 = vpop.f32.mrb[31].mxu1  ;;  %v5051_v46 = vpop.eup %5050  ;;  %4051 = vst.msk [vmem:[%s6654_s15 + $0x8] sm:$0xff] %vm316_vm0, %v4019_v23 }
 0x2e8   : > { %v4356_v35 = vmul.f32 -1.442695, %v6645_v14  ;;  %v4812_v12 = vadd.f32 %v3666_v41, %v6583_v63  ;;  %v3928_v63 = vadd.f32 1.0, %v5049_v22  ;;  %v5053_v51 = vpop.eup %5052  ;;  %4050 = vst.msk [vmem:[%s6654_s15] sm:$0xff] %vm316_vm0, %v4018_v42  ;;  %v3931_v5 = vadd.f32 1.0, %v5051_v46 }
 0x2e9   : > { %5066 = vpow2.f32 %v4357_v24  ;;  %v6660_v36 = vadd.f32 %v4811_v55, %v6588_v8  ;;  %v5055_v54 = vpop.eup %5054  ;;  %v4021_v49 = vmul.f32 %v5053_v51, %v6599_v44 }
 0x2ea   : > { %5068 = vrcp.f32 %v3929_v28  ;;  %v6664_v37 = vadd.f32 %v4812_v12, %v6588_v8  ;;  %v5057_v39 = vpop.eup %5056 }
 0x2eb   : > { %v4773_v45 = vpop.f32.mrb[0].mxu1  ;;  %5070 = vpow2.f32 %v4356_v35  ;;  %v4359_v31 = vmul.f32 -1.442695, %v6660_v36  ;;  %4053 = vst.msk [vmem:[%s6654_s15 + $0x18] sm:$0xff] %vm316_vm0, %v4021_v49 }
 0x2ec   : > { %v4813_v6 = vadd.f32 %v4773_v45, %v6543_v1  ;;  %v3676_v34 = vpop.f32.mrb[1].mxu1  ;;  %v4358_v29 = vmul.f32 -1.442695, %v6664_v37  ;;  %5072 = vrcp.f32 %v3928_v63  ;;  %v4020_v1 = vmul.f32 %v5055_v54, %v6602_v57  ;;  %v5059_v7 = vpop.eup %5058 }
 0x2ed   : > { %v4814_v27 = vadd.f32 %v3676_v34, %v6545_v20  ;;  %5074 = vrcp.f32 %v3931_v5  ;;  %v3930_v20 = vadd.f32 1.0, %v5057_v39  ;;  %v5061_v32 = vpop.eup %5060  ;;  %v3933_v57 = vadd.f32 1.0, %v5059_v7 }
 0x2ee   : > { %v6676_v26 = vadd.f32 %v4813_v6, %v6588_v8  ;;  %5076 = vpow2.f32 %v4359_v31  ;;  %4052 = vst.msk [vmem:[%s6654_s15 + $0x10] sm:$0xff] %vm316_vm0, %v4020_v1  ;;  %v5063_v24 = vpop.eup %5062  ;;  %v4023_v55 = vmul.f32 %v5061_v32, %v6607_v33 }
 0x2ef   : > { %v6680_v38 = vadd.f32 %v4814_v27, %v6588_v8  ;;  %v4776_v40 = vpop.f32.mrb[2].mxu1  ;;  %5078 = vpow2.f32 %v4358_v29  ;;  %v4022_v21 = vmul.f32 %v5063_v24, %v6610_v58 }
 0x2f0   : > { %v4361_v44 = vmul.f32 -1.442695, %v6676_v26  ;;  %v4815_v25 = vadd.f32 %v4776_v40, %v6547_v53  ;;  %v3686_v9 = vpop.f32.mrb[3].mxu1  ;;  %5080 = vrcp.f32 %v3930_v20  ;;  %v5065_v53 = vpop.eup %5064  ;;  %4055 = vst.msk [vmem:[%s6654_s15 + $0x28] sm:$0xff] %vm316_vm0, %v4023_v55 }
 0x2f1   : > { %v4360_v11 = vmul.f32 -1.442695, %v6680_v38  ;;  %v4816_v48 = vadd.f32 %v3686_v9, %v6549_v43  ;;  %5082 = vrcp.f32 %v3933_v57  ;;  %v3932_v43 = vadd.f32 1.0, %v5065_v53  ;;  %4054 = vst.msk [vmem:[%s6654_s15 + $0x20] sm:$0xff] %vm316_vm0, %v4022_v21 }
 0x2f2   : > { %v6692_v41 = vadd.f32 %v4815_v25, %v6588_v8  ;;  %5084 = vpow2.f32 %v4361_v44 }
 0x2f3   : > { %v6696_v28 = vadd.f32 %v4816_v48, %v6588_v8  ;;  %v5067_v12 = vpop.eup %5066  ;;  %5086 = vpow2.f32 %v4360_v11 }
 0x2f4   : > { %v4779_v35 = vpop.f32.mrb[4].mxu1  ;;  %v4363_v33 = vmul.f32 -1.442695, %v6692_v41  ;;  %v5069_v22 = vpop.eup %5068  ;;  %v3935_v58 = vadd.f32 1.0, %v5067_v12  ;;  %5088 = vrcp.f32 %v3932_v43 }
 0x2f5   : > { %v4817_v30 = vadd.f32 %v4779_v35, %v6551_v16  ;;  %v3696_v23 = vpop.f32.mrb[5].mxu1  ;;  %v5071_v45 = vpop.eup %5070  ;;  %v4025_v46 = vmul.f32 %v5069_v22, %v6615_v4  ;;  %v4362_v63 = vmul.f32 -1.442695, %v6696_v28 }
 0x2f6   : > { %v4818_v42 = vadd.f32 %v3696_v23, %v6553_v3  ;;  %5090 = vrcp.f32 %v3935_v58  ;;  %v3934_v16 = vadd.f32 1.0, %v5071_v45  ;;  %v5073_v51 = vpop.eup %5072 }
 0x2f7   : > { %v6708_v31 = vadd.f32 %v4817_v30, %v6588_v8  ;;  %4057 = vst.msk [vmem:[%s6654_s15 + $0x38] sm:$0xff] %vm316_vm0, %v4025_v46  ;;  %5092 = vpow2.f32 %v4363_v33  ;;  %v5075_v29 = vpop.eup %5074  ;;  %v4024_v27 = vmul.f32 %v5073_v51, %v6618_v56 }
 0x2f8   : > { %v6711_v6 = vadd.f32 %v4818_v42, %v6588_v8  ;;  %5094 = vrcp.f32 %v3934_v16  ;;  %v5077_v39 = vpop.eup %5076  ;;  %v4027_v1 = vmul.f32 %v5075_v29, %v6623_v47 }
 0x2f9   : > { %v4365_v3 = vmul.f32 -1.442695, %v6708_v31  ;;  %5096 = vpow2.f32 %v4362_v63  ;;  %v5079_v7 = vpop.eup %5078  ;;  %4056 = vst.msk [vmem:[%s6654_s15 + $0x30] sm:$0xff] %vm316_vm0, %v4024_v27 }
 0x2fa   : > { %v4782_v34 = vpop.f32.mrb[6].mxu1  ;;  %v4364_v54 = vmul.f32 -1.442695, %v6711_v6  ;;  %v5081_v44 = vpop.eup %5080  ;;  %4059 = vst.msk [vmem:[%s6654_s15 + $0x48] sm:$0xff] %vm316_vm0, %v4027_v1 }
 0x2fb   : > { %v4819_v4 = vadd.f32 %v4782_v34, %v6555_v19  ;;  %v3706_v5 = vpop.f32.mrb[7].mxu1  ;;  %v3937_v19 = vadd.f32 1.0, %v5077_v39  ;;  %5098 = vpow2.f32 %v4365_v3  ;;  %v5083_v32 = vpop.eup %5082  ;;  %v4026_v57 = vmul.f32 %v5081_v44, %v6626_v59 }
 0x2fc   : > { %v4820_v49 = vadd.f32 %v3706_v5, %v6557_v61  ;;  %v3936_v61 = vadd.f32 1.0, %v5079_v7  ;;  %5100 = vpow2.f32 %v4364_v54  ;;  %v5085_v24 = vpop.eup %5084  ;;  %v4029_v55 = vmul.f32 %v5083_v32, %v6632_v10 }
 0x2fd   : > { %v6722_v40 = vadd.f32 %v4819_v4, %v6588_v8  ;;  %5102 = vrcp.f32 %v3937_v19  ;;  %v5087_v21 = vpop.eup %5086  ;;  %4058 = vst.msk [vmem:[%s6654_s15 + $0x40] sm:$0xff] %vm316_vm0, %v4026_v57 }
 0x2fe   : > { %v6727_v20 = vadd.f32 %v4820_v49, %v6588_v8  ;;  %5104 = vrcp.f32 %v3936_v61  ;;  %v5089_v12 = vpop.eup %5088  ;;  %4061 = vst.msk [vmem:[%s6654_s15 + $0x58] sm:$0xff] %vm316_vm0, %v4029_v55 }
 0x2ff   : > { %v4785_v56 = vpop.f32.mrb[8].mxu1  ;;  %v4367_v47 = vmul.f32 -1.442695, %v6722_v40  ;;  %v4028_v23 = vmul.f32 %v5089_v12, %v6635_v15 }
 0x300   : > { %v4821_v25 = vadd.f32 %v4785_v56, %v6559_v13  ;;  %v3716_v9 = vpop.f32.mrb[9].mxu1  ;;  %v4366_v11 = vmul.f32 -1.442695, %v6727_v20  ;;  %v3939_v13 = vadd.f32 1.0, %v5085_v24  ;;  %v5091_v30 = vpop.eup %5090 }
 0x301   : > { %v4822_v48 = vadd.f32 %v3716_v9, %v6561_v2  ;;  %5106 = vpow2.f32 %v4367_v47  ;;  %v3938_v2 = vadd.f32 1.0, %v5087_v21  ;;  %v5093_v42 = vpop.eup %5092  ;;  %v4031_v45 = vmul.f32 %v5091_v30, %v6642_v52  ;;  %4060 = vst.msk [vmem:[%s6654_s15 + $0x50] sm:$0xff] %vm316_vm0, %v4028_v23 }
 0x302   : > { %v6738_v53 = vadd.f32 %v4821_v25, %v6588_v8  ;;  %5108 = vpow2.f32 %v4366_v11  ;;  %v5095_v63 = vpop.eup %5094 }
 0x303   : > { %v6743_v35 = vadd.f32 %v4822_v48, %v6588_v8  ;;  %5110 = vrcp.f32 %v3939_v13  ;;  %v5097_v34 = vpop.eup %5096  ;;  %4063 = vst.msk [vmem:[%s6654_s15 + $0x68] sm:$0xff] %vm316_vm0, %v4031_v45 }
 0x304   : > { %v4369_v10 = vmul.f32 -1.442695, %v6738_v53  ;;  %5112 = vrcp.f32 %v3938_v2  ;;  %v3940_v5 = vadd.f32 1.0, %v5097_v34 }
 0x305   : > { %v4788_v59 = vpop.f32.mrb[10].mxu1  ;;  %v4368_v22 = vmul.f32 -1.442695, %v6743_v35  ;;  %v5099_v4 = vpop.eup %5098 }
 0x306   : > { %v4823_v43 = vadd.f32 %v4788_v59, %v6563_v17  ;;  %v3726_v33 = vpop.f32.mrb[11].mxu1  ;;  %v3941_v17 = vadd.f32 1.0, %v5093_v42  ;;  %5114 = vpow2.f32 %v4369_v10  ;;  %v5101_v27 = vpop.eup %5100  ;;  %v3943_v54 = vadd.f32 1.0, %v5099_v4 }
 0x307   : > { %v4824_v58 = vadd.f32 %v3726_v33, %v6565_v60  ;;  %v4030_v60 = vmul.f32 %v5095_v63, %v6645_v14  ;;  %5116 = vpow2.f32 %v4368_v22  ;;  %v5103_v39 = vpop.eup %5102 }
 0x308   : > { %v6754_v46 = vadd.f32 %v4823_v43, %v6588_v8  ;;  %5118 = vrcp.f32 %v3941_v17  ;;  %v5105_v19 = vpop.eup %5104 }
 0x309   : > { %v6759_v15 = vadd.f32 %v4824_v58, %v6588_v8  ;;  %v4791_v16 = vpop.f32.mrb[12].mxu1  ;;  %4062 = vst.msk [vmem:[%s6654_s15 + $0x60] sm:$0xff] %vm316_vm0, %v4030_v60  ;;  %v4032_v25 = vmul.f32 %v5105_v19, %v6664_v37 }
 0x30a   : > { %v4371_v52 = vmul.f32 -1.442695, %v6754_v46  ;;  %v4825_v51 = vadd.f32 %v4791_v16, %v6567_v0  ;;  %v3736_v3 = vpop.f32.mrb[13].mxu1  ;;  %v3942_v0 = vadd.f32 1.0, %v5101_v27 }
 0x30b   : > { %v4826_v29 = vadd.f32 %v3736_v3, %v6569_v18  ;;  %v4370_v49 = vmul.f32 -1.442695, %v6759_v15  ;;  %v4033_v18 = vmul.f32 %v5103_v39, %v6660_v36  ;;  %v5107_v47 = vpop.eup %5106  ;;  %4064 = vst.msk [vmem:[%s6654_s15 + $0x70] sm:$0xff] %vm316_vm0, %v4032_v25 }
 0x30c   : > { %5120 = vpow2.f32 %v4371_v52  ;;  %v6771_v14 = vadd.f32 %v4825_v51, %v6588_v8  ;;  %v5109_v32 = vpop.eup %5108  ;;  %v3945_v57 = vadd.f32 1.0, %v5107_v47 }
 0x30d   : > { %5122 = vrcp.f32 %v3940_v5  ;;  %v6774_v1 = vadd.f32 %v4826_v29, %v6588_v8  ;;  %v4794_v7 = vpop.f32.mrb[14].mxu1  ;;  %4065 = vst.msk [vmem:[%s6654_s15 + $0x78] sm:$0xff] %vm316_vm0, %v4033_v18  ;;  %v5111_v48 = vpop.eup %5110 }
 0x30e   : > { %5124 = vrcp.f32 %v3943_v54  ;;  %v4373_v56 = vmul.f32 -1.442695, %v6771_v14  ;;  %v4827_v44 = vadd.f32 %v4794_v7, %v6571_v62  ;;  %v3746_v61 = vpop.f32.mrb[15].mxu1  ;;  %v3944_v62 = vadd.f32 1.0, %v5109_v32 }
 0x30f   : > { %5126 = vrcp.f32 %v3942_v0  ;;  %v4828_v9 = vadd.f32 %v3746_v61, %v6573_v50  ;;  %v4372_v36 = vmul.f32 -1.442695, %v6774_v1  ;;  %v5113_v50 = vpop.eup %5112  ;;  %v4035_v24 = vmul.f32 %v5111_v48, %v6676_v26 }
 0x310   : > { %5128 = vpow2.f32 %v4370_v49  ;;  %v6785_v11 = vadd.f32 %v4827_v44, %v6588_v8  ;;  %v5115_v21 = vpop.eup %5114  ;;  %v4034_v13 = vmul.f32 %v5113_v50, %v6680_v38 }
 0x311   : > { %5130 = vpow2.f32 %v4373_v56  ;;  %v6790_v37 = vadd.f32 %v4828_v9, %v6588_v8  ;;  %v5117_v59 = vpop.eup %5116  ;;  %4067 = vst.msk [vmem:[%s6654_s15 + $0x88] sm:$0xff] %vm316_vm0, %v4035_v24  ;;  %v3947_v12 = vadd.f32 1.0, %v5115_v21 }
 0x312   : > { %5132 = vrcp.f32 %v3945_v57  ;;  %v4375_v55 = vmul.f32 -1.442695, %v6785_v11  ;;  %v5119_v8 = vpop.eup %5118  ;;  %4066 = vst.msk [vmem:[%s6654_s15 + $0x80] sm:$0xff] %vm316_vm0, %v4034_v13  ;;  %v3946_v10 = vadd.f32 1.0, %v5117_v59 }
 0x313   : > { %5134 = vrcp.f32 %v3944_v62  ;;  %v4374_v2 = vmul.f32 -1.442695, %v6790_v37  ;;  %v4037_v43 = vmul.f32 %v5119_v8, %v6692_v41 }
 0x314   : > { %5136 = vpow2.f32 %v4372_v36 }
 0x315   : > { %5138 = vpow2.f32 %v4375_v55  ;;  %4069 = vst.msk [vmem:[%s6654_s15 + $0x98] sm:$0xff] %vm316_vm0, %v4037_v43 }
 0x316   : > { %v5121_v26 = vpop.eup %5120  ;;  %5140 = vrcp.f32 %v3947_v12 }
 0x317   : > { %v5123_v38 = vpop.eup %5122  ;;  %5142 = vrcp.f32 %v3946_v10  ;;  %v3949_v33 = vadd.f32 1.0, %v5121_v26 }
 0x318   : > { %v5125_v30 = vpop.eup %5124  ;;  %v4036_v23 = vmul.f32 %v5123_v38, %v6696_v28  ;;  %5144 = vpow2.f32 %v4374_v2 }
 0x319   : > { %v5127_v22 = vpop.eup %5126  ;;  %v4039_v58 = vmul.f32 %v5125_v30, %v6708_v31  ;;  %5146 = vrcp.f32 %v3949_v33 }
 0x31a   : > { %v5129_v42 = vpop.eup %5128  ;;  %4068 = vst.msk [vmem:[%s6654_s15 + $0x90] sm:$0xff] %vm316_vm0, %v4036_v23  ;;  %v4038_v41 = vmul.f32 %v5127_v22, %v6711_v6 }
 0x31b   : > { %v5131_v45 = vpop.eup %5130  ;;  %4071 = vst.msk [vmem:[%s6654_s15 + $0xa8] sm:$0xff] %vm316_vm0, %v4039_v58  ;;  %v3948_v63 = vadd.f32 1.0, %v5129_v42 }
 0x31c   : > { %v5133_v17 = vpop.eup %5132  ;;  %4070 = vst.msk [vmem:[%s6654_s15 + $0xa0] sm:$0xff] %vm316_vm0, %v4038_v41  ;;  %v3951_v28 = vadd.f32 1.0, %v5131_v45 }
 0x31d   : > { %v5135_v16 = vpop.eup %5134  ;;  %v4041_v34 = vmul.f32 %v5133_v17, %v6722_v40  ;;  %5148 = vrcp.f32 %v3948_v63 }
 0x31e   : > { %v5137_v31 = vpop.eup %5136  ;;  %v4040_v60 = vmul.f32 %v5135_v16, %v6727_v20  ;;  %5150 = vrcp.f32 %v3951_v28 }
 0x31f   : > { %v5139_v6 = vpop.eup %5138  ;;  %4073 = vst.msk [vmem:[%s6654_s15 + $0xb8] sm:$0xff] %vm316_vm0, %v4041_v34  ;;  %v3950_v52 = vadd.f32 1.0, %v5137_v31 }
 0x320   : > { %v5141_v51 = vpop.eup %5140  ;;  %4072 = vst.msk [vmem:[%s6654_s15 + $0xb0] sm:$0xff] %vm316_vm0, %v4040_v60  ;;  %v3953_v3 = vadd.f32 1.0, %v5139_v6 }
 0x321   : > { %v5143_v4 = vpop.eup %5142  ;;  %v4043_v5 = vmul.f32 %v5141_v51, %v6738_v53  ;;  %5152 = vrcp.f32 %v3950_v52 }
 0x322   : > { %v5145_v40 = vpop.eup %5144  ;;  %v4042_v20 = vmul.f32 %v5143_v4, %v6743_v35  ;;  %5154 = vrcp.f32 %v3953_v3 }
 0x323   : > { %v5147_v29 = vpop.eup %5146  ;;  %4075 = vst.msk [vmem:[%s6654_s15 + $0xc8] sm:$0xff] %vm316_vm0, %v4043_v5  ;;  %v3952_v27 = vadd.f32 1.0, %v5145_v40 }
 0x324   : > { %4074 = vst.msk [vmem:[%s6654_s15 + $0xc0] sm:$0xff] %vm316_vm0, %v4042_v20  ;;  %v4045_v54 = vmul.f32 %v5147_v29, %v6754_v46 }
 0x325   : > { %5156 = vrcp.f32 %v3952_v27 }
 0x326   : > { %4077 = vst.msk [vmem:[%s6654_s15 + $0xd8] sm:$0xff] %vm316_vm0, %v4045_v54 }
 0x327   : > { %v5149_v53 = vpop.eup %5148 }
 0x328   : > { %v5151_v49 = vpop.eup %5150  ;;  %v4044_v39 = vmul.f32 %v5149_v53, %v6759_v15 }
 0x329   : > { %v4047_v35 = vmul.f32 %v5151_v49, %v6771_v14 }
 0x32a   : > { %4076 = vst.msk [vmem:[%s6654_s15 + $0xd0] sm:$0xff] %vm316_vm0, %v4044_v39 }
 0x32b   : > { %v5153_v0 = vpop.eup %5152  ;;  %4079 = vst.msk [vmem:[%s6654_s15 + $0xe8] sm:$0xff] %vm316_vm0, %v4047_v35 }
 0x32c   : > { %v5155_v7 = vpop.eup %5154  ;;  %v4046_v19 = vmul.f32 %v5153_v0, %v6774_v1 }
 0x32d   : > { %v4049_v46 = vmul.f32 %v5155_v7, %v6785_v11 }
 0x32e   : > { %4078 = vst.msk [vmem:[%s6654_s15 + $0xe0] sm:$0xff] %vm316_vm0, %v4046_v19 }
 0x32f   : > { %v5157_v18 = vpop.eup %5156  ;;  %4081 = vst.msk [vmem:[%s6654_s15 + $0xf8] sm:$0xff] %vm316_vm0, %v4049_v46 }
 0x330   : > { %v4048_v56 = vmul.f32 %v5157_v18, %v6790_v37 }
 0x332   : > { %4080 = vst.msk [vmem:[%s6654_s15 + $0xf0] sm:$0xff] %vm316_vm0, %v4048_v56 }
 0x333 PF: > { %s15_s18 = sadd.s32 1, %s5164_s18  }
 0x334   : > { %p12_p4 = scmp.ge.s32.totalorder %s15_s18, 4  }
 0x336   :  { %14 = sbr.rel (!%p12_p4) target bundleno = 1 (0x1), region = 72 }

</bundles_post_ra>
